<compile_context>
chip_gen: v7x
topology: tpu7x:2x2x1
jax: 0.10.0
libtpu: 0.0.40
codegen_flags: <defaults>
</compile_context>

<pallas_src>
import numpy as np
import jax
import jax.numpy as jnp
from jax.experimental import pallas as pl
from jax.experimental.pallas import tpu as pltpu

# ----------------------------- config (small synthetic shapes) -----------------------------
BATCH = 2          # N
C_IN = 3           # RGB
IMG = 16           # H = W
PATCH = 4          # patch size -> 4x4 = 16 patches
NUM_PATCH = (IMG // PATCH) ** 2           # 16
TOKENS = NUM_PATCH + 1                    # 17 (patches + cls)
T_PAD = 24                                # token axis padded to a sublane multiple (8)
CLS_ROW = NUM_PATCH                       # cls token moved AFTER the patch rows (row 16)
DIM = 128          # stand-in for in_planes=768
HEADS = 4
DHEAD = DIM // HEADS                      # 32
MLP_DIM = 4 * DIM                         # 512
DIVIDE_LENGTH = 4
PATCH_LEN = NUM_PATCH // DIVIDE_LENGTH    # 4
K_IN = C_IN * PATCH * PATCH               # 48
K_PAD = 128                               # patch-embed K padded to a lane multiple
OUT_ROWS = 1 + DIVIDE_LENGTH              # 5 feature rows per sample (global + 4 local)
LN_EPS = 1e-6
BN_EPS = 1e-5
ATTN_SCALE = 1.0 / (DHEAD ** 0.5)
NEG_INF = -1e30


# ----------------------------- fused Pallas kernel -----------------------------
def _ln(x, g, b):
    mu = jnp.mean(x, axis=-1, keepdims=True)
    var = jnp.mean((x - mu) ** 2, axis=-1, keepdims=True)
    return (x - mu) * jax.lax.rsqrt(var + LN_EPS) * g + b


def _fused_kernel(patches_ref, patch_w_ref, clspos_ref, kmask_ref,
                  basen_g_ref, basen_b_ref,
                  ln1_g_ref, ln1_b_ref, w_qkv_ref, b_qkv_ref,
                  w_proj_ref, b_proj_ref, ln2_g_ref, ln2_b_ref,
                  w_fc1_ref, b_fc1_ref, w_fc2_ref, b_fc2_ref,
                  lnf_g_ref, lnf_b_ref, seg_ref,
                  bng_s_ref, bng_b_ref, bnl_s_ref, bnl_b_ref,
                  out_ref):
    bt = patches_ref.shape[0]          # samples in this tile
    m_rows = bt * T_PAD                # matmul M dimension (batch folded into sublanes)
    bf16 = jnp.bfloat16

    # ---- patch embed; zero pad/cls rows pick up cls/pos/patch-bias via clspos (no concat) ----
    p = patches_ref[...].reshape(m_rows, K_PAD)                               # bf16
    tok = jnp.dot(p, patch_w_ref[...], preferred_element_type=jnp.float32)    # (m_rows, DIM) f32
    feats3 = tok.reshape(bt, T_PAD, DIM) + clspos_ref[...][None, :, :]        # (bt, T_PAD, DIM)
    feats = feats3.reshape(m_rows, DIM)

    # global feature = backbone final LayerNorm of the cls token (row CLS_ROW of each sample)
    gf = _ln(feats3[:, CLS_ROW:CLS_ROW + 1, :], basen_g_ref[...], basen_b_ref[...])  # (bt,1,DIM)

    # ---- b2 block: pre-LN MHSA ----
    h = _ln(feats, ln1_g_ref[...], ln1_b_ref[...])
    qkv = jnp.dot(h.astype(bf16), w_qkv_ref[...],
                  preferred_element_type=jnp.float32) + b_qkv_ref[...]        # (m_rows, 3*DIM)
    qkv3 = qkv.reshape(bt, T_PAD, 3 * DIM)
    kmask = kmask_ref[...][None, :, :]                                        # (1,1,T_PAD)

    x1 = feats + b_proj_ref[...]
    for hd in range(HEADS):                                                   # static unroll
        q = qkv3[:, :, hd * DHEAD:(hd + 1) * DHEAD].astype(bf16)              # (bt,T_PAD,DHEAD)
        k = qkv3[:, :, DIM + hd * DHEAD:DIM + (hd + 1) * DHEAD].astype(bf16)
        v = qkv3[:, :, 2 * DIM + hd * DHEAD:2 * DIM + (hd + 1) * DHEAD].astype(bf16)
        s = jnp.einsum('bqd,bkd->bqk', q, k,
                       preferred_element_type=jnp.float32) * ATTN_SCALE + kmask
        s = s - jnp.max(s, axis=-1, keepdims=True)
        e = jnp.exp(s)
        pr = e / jnp.sum(e, axis=-1, keepdims=True)                           # exact reciprocal
        o = jnp.einsum('bqk,bkd->bqd', pr.astype(bf16), v,
                       preferred_element_type=jnp.float32)                    # (bt,T_PAD,DHEAD)
        # per-head accumulation into the residual (no head lane-concat)
        x1 = x1 + jnp.dot(o.reshape(m_rows, DHEAD).astype(bf16),
                          w_proj_ref[hd * DHEAD:(hd + 1) * DHEAD, :],
                          preferred_element_type=jnp.float32)

    # ---- b2 block: MLP ----
    h2 = _ln(x1, ln2_g_ref[...], ln2_b_ref[...])
    m = jnp.dot(h2.astype(bf16), w_fc1_ref[...],
                preferred_element_type=jnp.float32) + b_fc1_ref[...]
    m = jax.nn.gelu(m)   # TODO(synk): tanh approximation (PyTorch default is exact erf)
    m = jnp.dot(m.astype(bf16), w_fc2_ref[...],
                preferred_element_type=jnp.float32) + b_fc2_ref[...]
    x2 = x1 + m

    # ---- final LayerNorm of the b2 branch ----
    b2f = _ln(x2, lnf_g_ref[...], lnf_b_ref[...])                             # (m_rows, DIM)

    # ---- 4 local segment means: one block-diagonal MXU matmul (zeros cls & padded rows) ----
    loc = jnp.dot(seg_ref[...], b2f.astype(bf16),
                  preferred_element_type=jnp.float32)                         # (bt*4, DIM)
    loc = loc.reshape(bt, DIVIDE_LENGTH, DIM)

    # ---- BN(eval) (+/4 folded for locals); two tile-aligned stores, no lane concat ----
    out_ref[:, 0:1, :] = gf * bng_s_ref[...][None, :, :] + bng_b_ref[...][None, :, :]
    out_ref[:, 1:OUT_ROWS, :] = loc * bnl_s_ref[...][None, :, :] + bnl_b_ref[...][None, :, :]


# ----------------------------- parameter init / folding -----------------------------
def init_params(key):
    ks = jax.random.split(key, 8)
    std = 0.02
    return {
        "pixel_mean": jnp.array([0.485, 0.456, 0.406], jnp.float32),
        "pixel_std": jnp.array([0.229, 0.224, 0.225], jnp.float32),
        # backbone stand-in: patch embed + cls/pos + norm
        "patch_w": std * jax.random.normal(ks[0], (K_IN, DIM), jnp.float32),
        "patch_b": jnp.zeros((DIM,), jnp.float32),
        "cls_token": std * jax.random.normal(ks[1], (1, 1, DIM), jnp.float32),
        "pos_embed": std * jax.random.normal(ks[2], (1, TOKENS, DIM), jnp.float32),
        "base_norm_g": jnp.ones((DIM,), jnp.float32),
        "base_norm_b": jnp.zeros((DIM,), jnp.float32),
        # b2 = copy of last transformer block + final layer norm
        "ln1_g": jnp.ones((DIM,), jnp.float32),
        "ln1_b": jnp.zeros((DIM,), jnp.float32),
        "w_qkv": std * jax.random.normal(ks[3], (DIM, 3 * DIM), jnp.float32),
        "b_qkv": jnp.zeros((3 * DIM,), jnp.float32),
        "w_proj": std * jax.random.normal(ks[4], (DIM, DIM), jnp.float32),
        "b_proj": jnp.zeros((DIM,), jnp.float32),
        "ln2_g": jnp.ones((DIM,), jnp.float32),
        "ln2_b": jnp.zeros((DIM,), jnp.float32),
        "w_fc1": std * jax.random.normal(ks[5], (DIM, MLP_DIM), jnp.float32),
        "b_fc1": jnp.zeros((MLP_DIM,), jnp.float32),
        "w_fc2": std * jax.random.normal(ks[6], (MLP_DIM, DIM), jnp.float32),
        "b_fc2": jnp.zeros((DIM,), jnp.float32),
        "lnf_g": jnp.ones((DIM,), jnp.float32),
        "lnf_b": jnp.zeros((DIM,), jnp.float32),
        # bottleneck / bottleneck_1..4 (BatchNorm1d eval, kaiming init -> gamma=1, beta=0)
        "bn_gamma": jnp.ones((5, DIM), jnp.float32),
        "bn_beta": jnp.zeros((5, DIM), jnp.float32),
        "bn_rmean": jnp.zeros((5, DIM), jnp.float32),
        "bn_rvar": jnp.ones((5, DIM), jnp.float32),
    }


def prepare_inference_params(p):
    """Fold preprocess into patch embed, relocate cls to row 16, fold BN(+/4), cast weights bf16."""
    # preprocess fold: ((x-mean)/std) @ W + b  ==  x @ (W/std) + (b - (mean/std) @ W)
    mean_rows = jnp.repeat(p["pixel_mean"], PATCH * PATCH)          # (K_IN,)
    std_rows = jnp.repeat(p["pixel_std"], PATCH * PATCH)
    w_fold = p["patch_w"] / std_rows[:, None]
    b_fold = p["patch_b"] - (mean_rows / std_rows) @ p["patch_w"]
    patch_w = jnp.zeros((K_PAD, DIM), jnp.float32).at[:K_IN].set(w_fold)

    # cls/pos (+ folded patch bias); cls at row CLS_ROW so patch rows stay sublane-aligned
    clspos = jnp.zeros((T_PAD, DIM), jnp.float32)
    clspos = clspos.at[:NUM_PATCH].set(p["pos_embed"][0, 1:] + b_fold[None, :])
    clspos = clspos.at[CLS_ROW].set(p["cls_token"][0, 0] + p["pos_embed"][0, 0])

    # precomputed additive key mask (rows >= TOKENS are padding)
    kmask = jnp.where(jnp.arange(T_PAD)[None, :] < TOKENS, 0.0, NEG_INF).astype(jnp.float32)

    # BatchNorm1d (eval) -> scale/shift; /4 folded into the 4 local bottlenecks only
    inv = jax.lax.rsqrt(p["bn_rvar"] + BN_EPS)
    scale = p["bn_gamma"] * inv
    shift = p["bn_beta"] - p["bn_rmean"] * scale

    r1 = lambda a: a.reshape(1, -1)
    bf = lambda a: a.astype(jnp.bfloat16)
    return {
        "patch_w": bf(patch_w),
        "clspos": clspos,
        "kmask": kmask,
        "basen_g": r1(p["base_norm_g"]), "basen_b": r1(p["base_norm_b"]),
        "ln1_g": r1(p["ln1_g"]), "ln1_b": r1(p["ln1_b"]),
        "w_qkv": bf(p["w_qkv"]), "b_qkv": r1(p["b_qkv"]),
        "w_proj": bf(p["w_proj"]), "b_proj": r1(p["b_proj"]),
        "ln2_g": r1(p["ln2_g"]), "ln2_b": r1(p["ln2_b"]),
        "w_fc1": bf(p["w_fc1"]), "b_fc1": r1(p["b_fc1"]),
        "w_fc2": bf(p["w_fc2"]), "b_fc2": r1(p["b_fc2"]),
        "lnf_g": r1(p["lnf_g"]), "lnf_b": r1(p["lnf_b"]),
        "bn_scale_g": scale[0:1], "bn_shift_g": shift[0:1],
        "bn_scale_l": scale[1:5] * 0.25, "bn_shift_l": shift[1:5] * 0.25,
    }


def _segment_matrix(b_tile):
    """Block-diagonal (b_tile*4, b_tile*T_PAD) averaging matrix over patch rows 0..15 per sample."""
    seg = np.zeros((b_tile * DIVIDE_LENGTH, b_tile * T_PAD), np.float32)
    for s in range(b_tile):
        for j in range(DIVIDE_LENGTH):
            c = s * T_PAD + j * PATCH_LEN
            seg[s * DIVIDE_LENGTH + j, c:c + PATCH_LEN] = 1.0 / PATCH_LEN
    return jnp.asarray(seg, dtype=jnp.bfloat16)     # 0.25 is exact in bf16


# ----------------------------- forward -----------------------------
def _const_spec(shape):
    nd = len(shape)
    return pl.BlockSpec(shape, lambda i, _nd=nd: (0,) * _nd)


def forward(x, cp, *, b_tile=None):
    """Eval forward of build_transformer_local (neck_feat='after', use_4d=False)."""
    n = x.shape[0]
    if b_tile is None:
        # fold the batch into the matmul M dimension (M = b_tile*T_PAD rows per MXU op);
        # bigger tiles amortize per-step overhead and fill the 128/256-wide MXU rows while
        # multiple grid steps still shard across v7x's two TensorCores ("parallel").
        b_tile = n if n <= 16 else 16
    n_pad = pl.cdiv(n, b_tile) * b_tile

    # im2col staging (tiny XLA reshape/transpose); pad K 48->128 lanes, tokens 16->24 rows
    # (the zero rows pick up cls/pos inside the kernel -> no in-kernel sublane concat),
    # pad batch to a b_tile multiple, cast to bf16 (halves the input DMA).
    patches = x.reshape(n, C_IN, IMG // PATCH, PATCH, IMG // PATCH, PATCH)
    patches = patches.transpose(0, 2, 4, 1, 3, 5).reshape(n, NUM_PATCH, K_IN)
    patches = jnp.pad(patches, ((0, n_pad - n), (0, T_PAD - NUM_PATCH), (0, K_PAD - K_IN)))
    patches = patches.astype(jnp.bfloat16)

    # note: `x = shuffle_unit(features, shift, groups)` in the reference is a dead assignment
    # (its result is never used afterwards), so it is not computed here.

    seg_bd = _segment_matrix(b_tile)
    consts = [cp["patch_w"], cp["clspos"], cp["kmask"],
              cp["basen_g"], cp["basen_b"],
              cp["ln1_g"], cp["ln1_b"], cp["w_qkv"], cp["b_qkv"],
              cp["w_proj"], cp["b_proj"], cp["ln2_g"], cp["ln2_b"],
              cp["w_fc1"], cp["b_fc1"], cp["w_fc2"], cp["b_fc2"],
              cp["lnf_g"], cp["lnf_b"], seg_bd,
              cp["bn_scale_g"], cp["bn_shift_g"], cp["bn_scale_l"], cp["bn_shift_l"]]

    steps = n_pad // b_tile
    m_rows = b_tile * T_PAD
    nbytes = lambda a: int(a.size) * a.dtype.itemsize
    const_bytes = sum(nbytes(a) for a in consts)

    flops_per_step = (
        2 * m_rows * K_PAD * DIM
        + 2 * m_rows * DIM * (3 * DIM)
        + HEADS * b_tile * 2 * (2 * T_PAD * T_PAD * DHEAD)
        + 2 * m_rows * DIM * DIM
        + 2 * m_rows * DIM * MLP_DIM * 2
        + 2 * (b_tile * DIVIDE_LENGTH) * m_rows * DIM
    )
    trans_per_step = HEADS * b_tile * T_PAD * T_PAD + m_rows * MLP_DIM + 8 * m_rows
    cost = pl.CostEstimate(
        flops=steps * flops_per_step,
        transcendentals=steps * trans_per_step,
        bytes_accessed=const_bytes + nbytes(patches) + n_pad * OUT_ROWS * DIM * 4)

    # scoped-VMEM request sized from the actual buffers (double-buffered IO/consts +
    # f32 activation slabs) instead of a blanket 32 MiB.
    io_bytes = b_tile * T_PAD * K_PAD * 2 + b_tile * OUT_ROWS * DIM * 4
    act_bytes = m_rows * (8 * DIM + MLP_DIM) * 4
    vmem_limit = int(max(8 << 20, 2 * (const_bytes + io_bytes) + 4 * act_bytes))

    in_specs = ([pl.BlockSpec((b_tile, T_PAD, K_PAD), lambda i: (i, 0, 0))]
                + [_const_spec(a.shape) for a in consts])

    out = pl.pallas_call(
        _fused_kernel,
        out_shape=jax.ShapeDtypeStruct((n_pad, OUT_ROWS, DIM), jnp.float32),
        grid=(steps,),
        in_specs=in_specs,
        out_specs=pl.BlockSpec((b_tile, OUT_ROWS, DIM), lambda i: (i, 0, 0)),
        compiler_params=pltpu.CompilerParams(
            dimension_semantics=("parallel",),
            vmem_limit_bytes=vmem_limit),
        cost_estimate=cost,
    )(patches, *consts)

    feats_4D = None   # use_4d == False
    return out[:n].reshape(n, OUT_ROWS * DIM), feats_4D


# ----------------------------- main -----------------------------
if __name__ == "__main__":
    key = jax.random.PRNGKey(0)
    kx, kp = jax.random.split(key)
    x = jax.random.uniform(kx, (BATCH, C_IN, IMG, IMG), jnp.float32)
    params = init_params(kp)
    cparams = prepare_inference_params(params)

    out, feats_4d = forward(x, cparams)
    out = jax.block_until_ready(out)

    assert out.shape == (BATCH, 5 * DIM), out.shape
    assert out.dtype == jnp.float32
    assert feats_4d is None
    assert bool(jnp.all(jnp.isfinite(out)))
    print("KERNEL_OK")
</pallas_src>

<mosaic_0001>
module attributes {stable_mosaic.version = 11 : i64} {
  func.func @_fused_kernel(%arg0: i32, %arg1: memref<2x24x128xbf16, #tpu.memory_space<vmem>>, %arg2: memref<128x128xbf16, #tpu.memory_space<vmem>>, %arg3: memref<24x128xf32, #tpu.memory_space<vmem>>, %arg4: memref<1x24xf32, #tpu.memory_space<vmem>>, %arg5: memref<1x128xf32, #tpu.memory_space<vmem>>, %arg6: memref<1x128xf32, #tpu.memory_space<vmem>>, %arg7: memref<1x128xf32, #tpu.memory_space<vmem>>, %arg8: memref<1x128xf32, #tpu.memory_space<vmem>>, %arg9: memref<128x384xbf16, #tpu.memory_space<vmem>>, %arg10: memref<1x384xf32, #tpu.memory_space<vmem>>, %arg11: memref<128x128xbf16, #tpu.memory_space<vmem>>, %arg12: memref<1x128xf32, #tpu.memory_space<vmem>>, %arg13: memref<1x128xf32, #tpu.memory_space<vmem>>, %arg14: memref<1x128xf32, #tpu.memory_space<vmem>>, %arg15: memref<128x512xbf16, #tpu.memory_space<vmem>>, %arg16: memref<1x512xf32, #tpu.memory_space<vmem>>, %arg17: memref<512x128xbf16, #tpu.memory_space<vmem>>, %arg18: memref<1x128xf32, #tpu.memory_space<vmem>>, %arg19: memref<1x128xf32, #tpu.memory_space<vmem>>, %arg20: memref<1x128xf32, #tpu.memory_space<vmem>>, %arg21: memref<8x48xbf16, #tpu.memory_space<vmem>>, %arg22: memref<1x128xf32, #tpu.memory_space<vmem>>, %arg23: memref<1x128xf32, #tpu.memory_space<vmem>>, %arg24: memref<4x128xf32, #tpu.memory_space<vmem>>, %arg25: memref<4x128xf32, #tpu.memory_space<vmem>>, %arg26: memref<2x5x128xf32, #tpu.memory_space<vmem>>) attributes {dimension_semantics = [#tpu.dimension_semantics<parallel>], iteration_bounds = array<i64: 1>, scalar_prefetch = 0 : i64, scratch_operands = 0 : i64, tpu.core_type = #tpu.core_type<tc>, window_params = [{transform_indices = @transform_0, window_bounds = array<i64: 2, 24, 128>}, {pipeline_mode = #tpu.pipeline_mode<synchronous>, transform_indices = @transform_1, window_bounds = array<i64: 128, 128>}, {pipeline_mode = #tpu.pipeline_mode<synchronous>, transform_indices = @transform_2, window_bounds = array<i64: 24, 128>}, {pipeline_mode = #tpu.pipeline_mode<synchronous>, transform_indices = @transform_3, window_bounds = array<i64: 1, 24>}, {pipeline_mode = #tpu.pipeline_mode<synchronous>, transform_indices = @transform_4, window_bounds = array<i64: 1, 128>}, {pipeline_mode = #tpu.pipeline_mode<synchronous>, transform_indices = @transform_5, window_bounds = array<i64: 1, 128>}, {pipeline_mode = #tpu.pipeline_mode<synchronous>, transform_indices = @transform_6, window_bounds = array<i64: 1, 128>}, {pipeline_mode = #tpu.pipeline_mode<synchronous>, transform_indices = @transform_7, window_bounds = array<i64: 1, 128>}, {pipeline_mode = #tpu.pipeline_mode<synchronous>, transform_indices = @transform_8, window_bounds = array<i64: 128, 384>}, {pipeline_mode = #tpu.pipeline_mode<synchronous>, transform_indices = @transform_9, window_bounds = array<i64: 1, 384>}, {pipeline_mode = #tpu.pipeline_mode<synchronous>, transform_indices = @transform_10, window_bounds = array<i64: 128, 128>}, {pipeline_mode = #tpu.pipeline_mode<synchronous>, transform_indices = @transform_11, window_bounds = array<i64: 1, 128>}, {pipeline_mode = #tpu.pipeline_mode<synchronous>, transform_indices = @transform_12, window_bounds = array<i64: 1, 128>}, {pipeline_mode = #tpu.pipeline_mode<synchronous>, transform_indices = @transform_13, window_bounds = array<i64: 1, 128>}, {pipeline_mode = #tpu.pipeline_mode<synchronous>, transform_indices = @transform_14, window_bounds = array<i64: 128, 512>}, {pipeline_mode = #tpu.pipeline_mode<synchronous>, transform_indices = @transform_15, window_bounds = array<i64: 1, 512>}, {pipeline_mode = #tpu.pipeline_mode<synchronous>, transform_indices = @transform_16, window_bounds = array<i64: 512, 128>}, {pipeline_mode = #tpu.pipeline_mode<synchronous>, transform_indices = @transform_17, window_bounds = array<i64: 1, 128>}, {pipeline_mode = #tpu.pipeline_mode<synchronous>, transform_indices = @transform_18, window_bounds = array<i64: 1, 128>}, {pipeline_mode = #tpu.pipeline_mode<synchronous>, transform_indices = @transform_19, window_bounds = array<i64: 1, 128>}, {pipeline_mode = #tpu.pipeline_mode<synchronous>, transform_indices = @transform_20, window_bounds = array<i64: 8, 48>}, {pipeline_mode = #tpu.pipeline_mode<synchronous>, transform_indices = @transform_21, window_bounds = array<i64: 1, 128>}, {pipeline_mode = #tpu.pipeline_mode<synchronous>, transform_indices = @transform_22, window_bounds = array<i64: 1, 128>}, {pipeline_mode = #tpu.pipeline_mode<synchronous>, transform_indices = @transform_23, window_bounds = array<i64: 4, 128>}, {pipeline_mode = #tpu.pipeline_mode<synchronous>, transform_indices = @transform_24, window_bounds = array<i64: 4, 128>}, {transform_indices = @transform_25, window_bounds = array<i64: 2, 5, 128>}]} {
    %c0 = arith.constant 0 : index
    %c0_0 = arith.constant 0 : index
    %c0_1 = arith.constant 0 : index
    %0 = vector.load %arg1[%c0, %c0_0, %c0_1] : memref<2x24x128xbf16, #tpu.memory_space<vmem>>, vector<2x24x128xbf16>
    %1 = vector.shape_cast %0 : vector<2x24x128xbf16> to vector<48x128xbf16>
    %c0_2 = arith.constant 0 : index
    %c0_3 = arith.constant 0 : index
    %2 = vector.load %arg2[%c0_2, %c0_3] : memref<128x128xbf16, #tpu.memory_space<vmem>>, vector<128x128xbf16>
    %cst = arith.constant dense<0.000000e+00> : vector<48x128xf32>
    %3 = tpu.matmul %1, %2, %cst {dimension_numbers = #tpu.dot_dimension_numbers<[1], [0], [0], [1], [0, 0, 1, 1], [], []>} : vector<48x128xbf16>, vector<128x128xbf16>, vector<48x128xf32> -> vector<48x128xf32>
    %4 = vector.shape_cast %3 : vector<48x128xf32> to vector<2x24x128xf32>
    %c0_4 = arith.constant 0 : index
    %c0_5 = arith.constant 0 : index
    %5 = vector.load %arg3[%c0_4, %c0_5] : memref<24x128xf32, #tpu.memory_space<vmem>>, vector<24x128xf32>
    %6 = vector.shape_cast %5 : vector<24x128xf32> to vector<1x24x128xf32>
    %7 = vector.broadcast %6 : vector<1x24x128xf32> to vector<2x24x128xf32>
    %8 = arith.addf %4, %7 : vector<2x24x128xf32>
    %9 = vector.shape_cast %8 : vector<2x24x128xf32> to vector<48x128xf32>
    %10 = vector.extract_strided_slice %8 {offsets = [0, 16, 0], sizes = [2, 1, 128], strides = [1, 1, 1]} : vector<2x24x128xf32> to vector<2x1x128xf32>
    %c0_6 = arith.constant 0 : index
    %c0_7 = arith.constant 0 : index
    %11 = vector.load %arg5[%c0_6, %c0_7] : memref<1x128xf32, #tpu.memory_space<vmem>>, vector<1x128xf32>
    %c0_8 = arith.constant 0 : index
    %c0_9 = arith.constant 0 : index
    %12 = vector.load %arg6[%c0_8, %c0_9] : memref<1x128xf32, #tpu.memory_space<vmem>>, vector<1x128xf32>
    %cst_10 = arith.constant dense<0.000000e+00> : vector<2x1xf32>
    %13 = vector.multi_reduction <add>, %10, %cst_10 [2] : vector<2x1x128xf32> to vector<2x1xf32>
    %14 = vector.shape_cast %13 : vector<2x1xf32> to vector<2x1x1xf32>
    %cst_11 = arith.constant 1.280000e+02 : f32
    %15 = vector.broadcast %cst_11 : f32 to vector<2x1x1xf32>
    %16 = arith.divf %14, %15 : vector<2x1x1xf32>
    %17 = vector.broadcast %16 : vector<2x1x1xf32> to vector<2x1x128xf32>
    %18 = arith.subf %10, %17 : vector<2x1x128xf32>
    %19 = arith.mulf %18, %18 : vector<2x1x128xf32>
    %cst_12 = arith.constant dense<0.000000e+00> : vector<2x1xf32>
    %20 = vector.multi_reduction <add>, %19, %cst_12 [2] : vector<2x1x128xf32> to vector<2x1xf32>
    %21 = vector.shape_cast %20 : vector<2x1xf32> to vector<2x1x1xf32>
    %cst_13 = arith.constant 1.280000e+02 : f32
    %22 = vector.broadcast %cst_13 : f32 to vector<2x1x1xf32>
    %23 = arith.divf %21, %22 : vector<2x1x1xf32>
    %24 = vector.broadcast %16 : vector<2x1x1xf32> to vector<2x1x128xf32>
    %25 = arith.subf %10, %24 : vector<2x1x128xf32>
    %cst_14 = arith.constant 9.99999997E-7 : f32
    %26 = vector.broadcast %cst_14 : f32 to vector<2x1x1xf32>
    %27 = arith.addf %23, %26 : vector<2x1x1xf32>
    %28 = math.rsqrt %27 : vector<2x1x1xf32>
    %29 = vector.broadcast %28 : vector<2x1x1xf32> to vector<2x1x128xf32>
    %30 = arith.mulf %25, %29 : vector<2x1x128xf32>
    %31 = vector.shape_cast %11 : vector<1x128xf32> to vector<1x1x128xf32>
    %32 = vector.broadcast %31 : vector<1x1x128xf32> to vector<2x1x128xf32>
    %33 = arith.mulf %30, %32 : vector<2x1x128xf32>
    %34 = vector.shape_cast %12 : vector<1x128xf32> to vector<1x1x128xf32>
    %35 = vector.broadcast %34 : vector<1x1x128xf32> to vector<2x1x128xf32>
    %36 = arith.addf %33, %35 : vector<2x1x128xf32>
    %c0_15 = arith.constant 0 : index
    %c0_16 = arith.constant 0 : index
    %37 = vector.load %arg7[%c0_15, %c0_16] : memref<1x128xf32, #tpu.memory_space<vmem>>, vector<1x128xf32>
    %c0_17 = arith.constant 0 : index
    %c0_18 = arith.constant 0 : index
    %38 = vector.load %arg8[%c0_17, %c0_18] : memref<1x128xf32, #tpu.memory_space<vmem>>, vector<1x128xf32>
    %cst_19 = arith.constant dense<0.000000e+00> : vector<48xf32>
    %39 = vector.multi_reduction <add>, %9, %cst_19 [1] : vector<48x128xf32> to vector<48xf32>
    %40 = vector.shape_cast %39 : vector<48xf32> to vector<48x1xf32>
    %cst_20 = arith.constant 1.280000e+02 : f32
    %41 = vector.broadcast %cst_20 : f32 to vector<48x1xf32>
    %42 = arith.divf %40, %41 : vector<48x1xf32>
    %43 = vector.broadcast %42 : vector<48x1xf32> to vector<48x128xf32>
    %44 = arith.subf %9, %43 : vector<48x128xf32>
    %45 = arith.mulf %44, %44 : vector<48x128xf32>
    %cst_21 = arith.constant dense<0.000000e+00> : vector<48xf32>
    %46 = vector.multi_reduction <add>, %45, %cst_21 [1] : vector<48x128xf32> to vector<48xf32>
    %47 = vector.shape_cast %46 : vector<48xf32> to vector<48x1xf32>
    %cst_22 = arith.constant 1.280000e+02 : f32
    %48 = vector.broadcast %cst_22 : f32 to vector<48x1xf32>
    %49 = arith.divf %47, %48 : vector<48x1xf32>
    %50 = vector.broadcast %42 : vector<48x1xf32> to vector<48x128xf32>
    %51 = arith.subf %9, %50 : vector<48x128xf32>
    %cst_23 = arith.constant 9.99999997E-7 : f32
    %52 = vector.broadcast %cst_23 : f32 to vector<48x1xf32>
    %53 = arith.addf %49, %52 : vector<48x1xf32>
    %54 = math.rsqrt %53 : vector<48x1xf32>
    %55 = vector.broadcast %54 : vector<48x1xf32> to vector<48x128xf32>
    %56 = arith.mulf %51, %55 : vector<48x128xf32>
    %57 = vector.broadcast %37 : vector<1x128xf32> to vector<48x128xf32>
    %58 = arith.mulf %56, %57 : vector<48x128xf32>
    %59 = vector.broadcast %38 : vector<1x128xf32> to vector<48x128xf32>
    %60 = arith.addf %58, %59 : vector<48x128xf32>
    %61 = arith.truncf %60 : vector<48x128xf32> to vector<48x128xbf16>
    %c0_24 = arith.constant 0 : index
    %c0_25 = arith.constant 0 : index
    %62 = vector.load %arg9[%c0_24, %c0_25] : memref<128x384xbf16, #tpu.memory_space<vmem>>, vector<128x384xbf16>
    %cst_26 = arith.constant dense<0.000000e+00> : vector<48x384xf32>
    %63 = tpu.matmul %61, %62, %cst_26 {dimension_numbers = #tpu.dot_dimension_numbers<[1], [0], [0], [1], [0, 0, 1, 1], [], []>} : vector<48x128xbf16>, vector<128x384xbf16>, vector<48x384xf32> -> vector<48x384xf32>
    %c0_27 = arith.constant 0 : index
    %c0_28 = arith.constant 0 : index
    %64 = vector.load %arg10[%c0_27, %c0_28] : memref<1x384xf32, #tpu.memory_space<vmem>>, vector<1x384xf32>
    %65 = vector.broadcast %64 : vector<1x384xf32> to vector<48x384xf32>
    %66 = arith.addf %63, %65 : vector<48x384xf32>
    %67 = vector.shape_cast %66 : vector<48x384xf32> to vector<2x24x384xf32>
    %c0_29 = arith.constant 0 : index
    %c0_30 = arith.constant 0 : index
    %68 = vector.load %arg4[%c0_29, %c0_30] : memref<1x24xf32, #tpu.memory_space<vmem>>, vector<1x24xf32>
    %69 = vector.shape_cast %68 : vector<1x24xf32> to vector<1x1x24xf32>
    %c0_31 = arith.constant 0 : index
    %c0_32 = arith.constant 0 : index
    %70 = vector.load %arg12[%c0_31, %c0_32] : memref<1x128xf32, #tpu.memory_space<vmem>>, vector<1x128xf32>
    %71 = vector.broadcast %70 : vector<1x128xf32> to vector<48x128xf32>
    %72 = arith.addf %9, %71 : vector<48x128xf32>
    %73 = vector.extract_strided_slice %67 {offsets = [0, 0, 0], sizes = [2, 24, 32], strides = [1, 1, 1]} : vector<2x24x384xf32> to vector<2x24x32xf32>
    %74 = arith.truncf %73 : vector<2x24x32xf32> to vector<2x24x32xbf16>
    %75 = vector.extract_strided_slice %67 {offsets = [0, 0, 128], sizes = [2, 24, 32], strides = [1, 1, 1]} : vector<2x24x384xf32> to vector<2x24x32xf32>
    %76 = arith.truncf %75 : vector<2x24x32xf32> to vector<2x24x32xbf16>
    %77 = vector.extract_strided_slice %67 {offsets = [0, 0, 256], sizes = [2, 24, 32], strides = [1, 1, 1]} : vector<2x24x384xf32> to vector<2x24x32xf32>
    %78 = arith.truncf %77 : vector<2x24x32xf32> to vector<2x24x32xbf16>
    "tpu.trace_start"() <{level = 10 : i32, message = "bqd,bkd->bqk"}> : () -> ()
    %cst_33 = arith.constant dense<0.000000e+00> : vector<2x24x24xf32>
    %79 = tpu.matmul %74, %76, %cst_33 {dimension_numbers = #tpu.dot_dimension_numbers<[2], [2], [1], [1], [0, 0, 0, 1, 1, 1], [0], [0]>} : vector<2x24x32xbf16>, vector<2x24x32xbf16>, vector<2x24x24xf32> -> vector<2x24x24xf32>
    "tpu.trace_stop"() : () -> ()
    %cst_34 = arith.constant 0.176776692 : f32
    %80 = vector.broadcast %cst_34 : f32 to vector<2x24x24xf32>
    %81 = arith.mulf %79, %80 : vector<2x24x24xf32>
    %82 = vector.broadcast %69 : vector<1x1x24xf32> to vector<2x24x24xf32>
    %83 = arith.addf %81, %82 : vector<2x24x24xf32>
    %cst_35 = arith.constant dense<0xFF800000> : vector<2x24xf32>
    %84 = vector.multi_reduction <maximumf>, %83, %cst_35 [2] : vector<2x24x24xf32> to vector<2x24xf32>
    %85 = vector.shape_cast %84 : vector<2x24xf32> to vector<2x24x1xf32>
    %86 = vector.broadcast %85 : vector<2x24x1xf32> to vector<2x24x24xf32>
    %87 = arith.subf %83, %86 : vector<2x24x24xf32>
    %88 = math.exp %87 : vector<2x24x24xf32>
    %cst_36 = arith.constant dense<0.000000e+00> : vector<2x24xf32>
    %89 = vector.multi_reduction <add>, %88, %cst_36 [2] : vector<2x24x24xf32> to vector<2x24xf32>
    %90 = vector.shape_cast %89 : vector<2x24xf32> to vector<2x24x1xf32>
    %91 = vector.broadcast %90 : vector<2x24x1xf32> to vector<2x24x24xf32>
    %92 = arith.divf %88, %91 : vector<2x24x24xf32>
    %93 = arith.truncf %92 : vector<2x24x24xf32> to vector<2x24x24xbf16>
    "tpu.trace_start"() <{level = 10 : i32, message = "bqk,bkd->bqd"}> : () -> ()
    %cst_37 = arith.constant dense<0.000000e+00> : vector<2x24x32xf32>
    %94 = tpu.matmul %93, %78, %cst_37 {dimension_numbers = #tpu.dot_dimension_numbers<[2], [1], [1], [2], [0, 0, 0, 1, 1, 2], [0], [0]>} : vector<2x24x24xbf16>, vector<2x24x32xbf16>, vector<2x24x32xf32> -> vector<2x24x32xf32>
    "tpu.trace_stop"() : () -> ()
    %95 = vector.shape_cast %94 : vector<2x24x32xf32> to vector<48x32xf32>
    %96 = arith.truncf %95 : vector<48x32xf32> to vector<48x32xbf16>
    %c0_38 = arith.constant 0 : index
    %c0_39 = arith.constant 0 : index
    %97 = vector.load %arg11[%c0_38, %c0_39] : memref<128x128xbf16, #tpu.memory_space<vmem>>, vector<32x128xbf16>
    %cst_40 = arith.constant dense<0.000000e+00> : vector<48x128xf32>
    %98 = tpu.matmul %96, %97, %cst_40 {dimension_numbers = #tpu.dot_dimension_numbers<[1], [0], [0], [1], [0, 0, 1, 1], [], []>} : vector<48x32xbf16>, vector<32x128xbf16>, vector<48x128xf32> -> vector<48x128xf32>
    %99 = arith.addf %72, %98 : vector<48x128xf32>
    %100 = vector.extract_strided_slice %67 {offsets = [0, 0, 32], sizes = [2, 24, 32], strides = [1, 1, 1]} : vector<2x24x384xf32> to vector<2x24x32xf32>
    %101 = arith.truncf %100 : vector<2x24x32xf32> to vector<2x24x32xbf16>
    %102 = vector.extract_strided_slice %67 {offsets = [0, 0, 160], sizes = [2, 24, 32], strides = [1, 1, 1]} : vector<2x24x384xf32> to vector<2x24x32xf32>
    %103 = arith.truncf %102 : vector<2x24x32xf32> to vector<2x24x32xbf16>
    %104 = vector.extract_strided_slice %67 {offsets = [0, 0, 288], sizes = [2, 24, 32], strides = [1, 1, 1]} : vector<2x24x384xf32> to vector<2x24x32xf32>
    %105 = arith.truncf %104 : vector<2x24x32xf32> to vector<2x24x32xbf16>
    "tpu.trace_start"() <{level = 10 : i32, message = "bqd,bkd->bqk"}> : () -> ()
    %cst_41 = arith.constant dense<0.000000e+00> : vector<2x24x24xf32>
    %106 = tpu.matmul %101, %103, %cst_41 {dimension_numbers = #tpu.dot_dimension_numbers<[2], [2], [1], [1], [0, 0, 0, 1, 1, 1], [0], [0]>} : vector<2x24x32xbf16>, vector<2x24x32xbf16>, vector<2x24x24xf32> -> vector<2x24x24xf32>
    "tpu.trace_stop"() : () -> ()
    %cst_42 = arith.constant 0.176776692 : f32
    %107 = vector.broadcast %cst_42 : f32 to vector<2x24x24xf32>
    %108 = arith.mulf %106, %107 : vector<2x24x24xf32>
    %109 = vector.broadcast %69 : vector<1x1x24xf32> to vector<2x24x24xf32>
    %110 = arith.addf %108, %109 : vector<2x24x24xf32>
    %cst_43 = arith.constant dense<0xFF800000> : vector<2x24xf32>
    %111 = vector.multi_reduction <maximumf>, %110, %cst_43 [2] : vector<2x24x24xf32> to vector<2x24xf32>
    %112 = vector.shape_cast %111 : vector<2x24xf32> to vector<2x24x1xf32>
    %113 = vector.broadcast %112 : vector<2x24x1xf32> to vector<2x24x24xf32>
    %114 = arith.subf %110, %113 : vector<2x24x24xf32>
    %115 = math.exp %114 : vector<2x24x24xf32>
    %cst_44 = arith.constant dense<0.000000e+00> : vector<2x24xf32>
    %116 = vector.multi_reduction <add>, %115, %cst_44 [2] : vector<2x24x24xf32> to vector<2x24xf32>
    %117 = vector.shape_cast %116 : vector<2x24xf32> to vector<2x24x1xf32>
    %118 = vector.broadcast %117 : vector<2x24x1xf32> to vector<2x24x24xf32>
    %119 = arith.divf %115, %118 : vector<2x24x24xf32>
    %120 = arith.truncf %119 : vector<2x24x24xf32> to vector<2x24x24xbf16>
    "tpu.trace_start"() <{level = 10 : i32, message = "bqk,bkd->bqd"}> : () -> ()
    %cst_45 = arith.constant dense<0.000000e+00> : vector<2x24x32xf32>
    %121 = tpu.matmul %120, %105, %cst_45 {dimension_numbers = #tpu.dot_dimension_numbers<[2], [1], [1], [2], [0, 0, 0, 1, 1, 2], [0], [0]>} : vector<2x24x24xbf16>, vector<2x24x32xbf16>, vector<2x24x32xf32> -> vector<2x24x32xf32>
    "tpu.trace_stop"() : () -> ()
    %122 = vector.shape_cast %121 : vector<2x24x32xf32> to vector<48x32xf32>
    %123 = arith.truncf %122 : vector<48x32xf32> to vector<48x32xbf16>
    %c32 = arith.constant 32 : index
    %c0_46 = arith.constant 0 : index
    %124 = vector.load %arg11[%c32, %c0_46] : memref<128x128xbf16, #tpu.memory_space<vmem>>, vector<32x128xbf16>
    %cst_47 = arith.constant dense<0.000000e+00> : vector<48x128xf32>
    %125 = tpu.matmul %123, %124, %cst_47 {dimension_numbers = #tpu.dot_dimension_numbers<[1], [0], [0], [1], [0, 0, 1, 1], [], []>} : vector<48x32xbf16>, vector<32x128xbf16>, vector<48x128xf32> -> vector<48x128xf32>
    %126 = arith.addf %99, %125 : vector<48x128xf32>
    %127 = vector.extract_strided_slice %67 {offsets = [0, 0, 64], sizes = [2, 24, 32], strides = [1, 1, 1]} : vector<2x24x384xf32> to vector<2x24x32xf32>
    %128 = arith.truncf %127 : vector<2x24x32xf32> to vector<2x24x32xbf16>
    %129 = vector.extract_strided_slice %67 {offsets = [0, 0, 192], sizes = [2, 24, 32], strides = [1, 1, 1]} : vector<2x24x384xf32> to vector<2x24x32xf32>
    %130 = arith.truncf %129 : vector<2x24x32xf32> to vector<2x24x32xbf16>
    %131 = vector.extract_strided_slice %67 {offsets = [0, 0, 320], sizes = [2, 24, 32], strides = [1, 1, 1]} : vector<2x24x384xf32> to vector<2x24x32xf32>
    %132 = arith.truncf %131 : vector<2x24x32xf32> to vector<2x24x32xbf16>
    "tpu.trace_start"() <{level = 10 : i32, message = "bqd,bkd->bqk"}> : () -> ()
    %cst_48 = arith.constant dense<0.000000e+00> : vector<2x24x24xf32>
    %133 = tpu.matmul %128, %130, %cst_48 {dimension_numbers = #tpu.dot_dimension_numbers<[2], [2], [1], [1], [0, 0, 0, 1, 1, 1], [0], [0]>} : vector<2x24x32xbf16>, vector<2x24x32xbf16>, vector<2x24x24xf32> -> vector<2x24x24xf32>
    "tpu.trace_stop"() : () -> ()
    %cst_49 = arith.constant 0.176776692 : f32
    %134 = vector.broadcast %cst_49 : f32 to vector<2x24x24xf32>
    %135 = arith.mulf %133, %134 : vector<2x24x24xf32>
    %136 = vector.broadcast %69 : vector<1x1x24xf32> to vector<2x24x24xf32>
    %137 = arith.addf %135, %136 : vector<2x24x24xf32>
    %cst_50 = arith.constant dense<0xFF800000> : vector<2x24xf32>
    %138 = vector.multi_reduction <maximumf>, %137, %cst_50 [2] : vector<2x24x24xf32> to vector<2x24xf32>
    %139 = vector.shape_cast %138 : vector<2x24xf32> to vector<2x24x1xf32>
    %140 = vector.broadcast %139 : vector<2x24x1xf32> to vector<2x24x24xf32>
    %141 = arith.subf %137, %140 : vector<2x24x24xf32>
    %142 = math.exp %141 : vector<2x24x24xf32>
    %cst_51 = arith.constant dense<0.000000e+00> : vector<2x24xf32>
    %143 = vector.multi_reduction <add>, %142, %cst_51 [2] : vector<2x24x24xf32> to vector<2x24xf32>
    %144 = vector.shape_cast %143 : vector<2x24xf32> to vector<2x24x1xf32>
    %145 = vector.broadcast %144 : vector<2x24x1xf32> to vector<2x24x24xf32>
    %146 = arith.divf %142, %145 : vector<2x24x24xf32>
    %147 = arith.truncf %146 : vector<2x24x24xf32> to vector<2x24x24xbf16>
    "tpu.trace_start"() <{level = 10 : i32, message = "bqk,bkd->bqd"}> : () -> ()
    %cst_52 = arith.constant dense<0.000000e+00> : vector<2x24x32xf32>
    %148 = tpu.matmul %147, %132, %cst_52 {dimension_numbers = #tpu.dot_dimension_numbers<[2], [1], [1], [2], [0, 0, 0, 1, 1, 2], [0], [0]>} : vector<2x24x24xbf16>, vector<2x24x32xbf16>, vector<2x24x32xf32> -> vector<2x24x32xf32>
    "tpu.trace_stop"() : () -> ()
    %149 = vector.shape_cast %148 : vector<2x24x32xf32> to vector<48x32xf32>
    %150 = arith.truncf %149 : vector<48x32xf32> to vector<48x32xbf16>
    %c64 = arith.constant 64 : index
    %c0_53 = arith.constant 0 : index
    %151 = vector.load %arg11[%c64, %c0_53] : memref<128x128xbf16, #tpu.memory_space<vmem>>, vector<32x128xbf16>
    %cst_54 = arith.constant dense<0.000000e+00> : vector<48x128xf32>
    %152 = tpu.matmul %150, %151, %cst_54 {dimension_numbers = #tpu.dot_dimension_numbers<[1], [0], [0], [1], [0, 0, 1, 1], [], []>} : vector<48x32xbf16>, vector<32x128xbf16>, vector<48x128xf32> -> vector<48x128xf32>
    %153 = arith.addf %126, %152 : vector<48x128xf32>
    %154 = vector.extract_strided_slice %67 {offsets = [0, 0, 96], sizes = [2, 24, 32], strides = [1, 1, 1]} : vector<2x24x384xf32> to vector<2x24x32xf32>
    %155 = arith.truncf %154 : vector<2x24x32xf32> to vector<2x24x32xbf16>
    %156 = vector.extract_strided_slice %67 {offsets = [0, 0, 224], sizes = [2, 24, 32], strides = [1, 1, 1]} : vector<2x24x384xf32> to vector<2x24x32xf32>
    %157 = arith.truncf %156 : vector<2x24x32xf32> to vector<2x24x32xbf16>
    %158 = vector.extract_strided_slice %67 {offsets = [0, 0, 352], sizes = [2, 24, 32], strides = [1, 1, 1]} : vector<2x24x384xf32> to vector<2x24x32xf32>
    %159 = arith.truncf %158 : vector<2x24x32xf32> to vector<2x24x32xbf16>
    "tpu.trace_start"() <{level = 10 : i32, message = "bqd,bkd->bqk"}> : () -> ()
    %cst_55 = arith.constant dense<0.000000e+00> : vector<2x24x24xf32>
    %160 = tpu.matmul %155, %157, %cst_55 {dimension_numbers = #tpu.dot_dimension_numbers<[2], [2], [1], [1], [0, 0, 0, 1, 1, 1], [0], [0]>} : vector<2x24x32xbf16>, vector<2x24x32xbf16>, vector<2x24x24xf32> -> vector<2x24x24xf32>
    "tpu.trace_stop"() : () -> ()
    %cst_56 = arith.constant 0.176776692 : f32
    %161 = vector.broadcast %cst_56 : f32 to vector<2x24x24xf32>
    %162 = arith.mulf %160, %161 : vector<2x24x24xf32>
    %163 = vector.broadcast %69 : vector<1x1x24xf32> to vector<2x24x24xf32>
    %164 = arith.addf %162, %163 : vector<2x24x24xf32>
    %cst_57 = arith.constant dense<0xFF800000> : vector<2x24xf32>
    %165 = vector.multi_reduction <maximumf>, %164, %cst_57 [2] : vector<2x24x24xf32> to vector<2x24xf32>
    %166 = vector.shape_cast %165 : vector<2x24xf32> to vector<2x24x1xf32>
    %167 = vector.broadcast %166 : vector<2x24x1xf32> to vector<2x24x24xf32>
    %168 = arith.subf %164, %167 : vector<2x24x24xf32>
    %169 = math.exp %168 : vector<2x24x24xf32>
    %cst_58 = arith.constant dense<0.000000e+00> : vector<2x24xf32>
    %170 = vector.multi_reduction <add>, %169, %cst_58 [2] : vector<2x24x24xf32> to vector<2x24xf32>
    %171 = vector.shape_cast %170 : vector<2x24xf32> to vector<2x24x1xf32>
    %172 = vector.broadcast %171 : vector<2x24x1xf32> to vector<2x24x24xf32>
    %173 = arith.divf %169, %172 : vector<2x24x24xf32>
    %174 = arith.truncf %173 : vector<2x24x24xf32> to vector<2x24x24xbf16>
    "tpu.trace_start"() <{level = 10 : i32, message = "bqk,bkd->bqd"}> : () -> ()
    %cst_59 = arith.constant dense<0.000000e+00> : vector<2x24x32xf32>
    %175 = tpu.matmul %174, %159, %cst_59 {dimension_numbers = #tpu.dot_dimension_numbers<[2], [1], [1], [2], [0, 0, 0, 1, 1, 2], [0], [0]>} : vector<2x24x24xbf16>, vector<2x24x32xbf16>, vector<2x24x32xf32> -> vector<2x24x32xf32>
    "tpu.trace_stop"() : () -> ()
    %176 = vector.shape_cast %175 : vector<2x24x32xf32> to vector<48x32xf32>
    %177 = arith.truncf %176 : vector<48x32xf32> to vector<48x32xbf16>
    %c96 = arith.constant 96 : index
    %c0_60 = arith.constant 0 : index
    %178 = vector.load %arg11[%c96, %c0_60] : memref<128x128xbf16, #tpu.memory_space<vmem>>, vector<32x128xbf16>
    %cst_61 = arith.constant dense<0.000000e+00> : vector<48x128xf32>
    %179 = tpu.matmul %177, %178, %cst_61 {dimension_numbers = #tpu.dot_dimension_numbers<[1], [0], [0], [1], [0, 0, 1, 1], [], []>} : vector<48x32xbf16>, vector<32x128xbf16>, vector<48x128xf32> -> vector<48x128xf32>
    %180 = arith.addf %153, %179 : vector<48x128xf32>
    %c0_62 = arith.constant 0 : index
    %c0_63 = arith.constant 0 : index
    %181 = vector.load %arg13[%c0_62, %c0_63] : memref<1x128xf32, #tpu.memory_space<vmem>>, vector<1x128xf32>
    %c0_64 = arith.constant 0 : index
    %c0_65 = arith.constant 0 : index
    %182 = vector.load %arg14[%c0_64, %c0_65] : memref<1x128xf32, #tpu.memory_space<vmem>>, vector<1x128xf32>
    %cst_66 = arith.constant dense<0.000000e+00> : vector<48xf32>
    %183 = vector.multi_reduction <add>, %180, %cst_66 [1] : vector<48x128xf32> to vector<48xf32>
    %184 = vector.shape_cast %183 : vector<48xf32> to vector<48x1xf32>
    %cst_67 = arith.constant 1.280000e+02 : f32
    %185 = vector.broadcast %cst_67 : f32 to vector<48x1xf32>
    %186 = arith.divf %184, %185 : vector<48x1xf32>
    %187 = vector.broadcast %186 : vector<48x1xf32> to vector<48x128xf32>
    %188 = arith.subf %180, %187 : vector<48x128xf32>
    %189 = arith.mulf %188, %188 : vector<48x128xf32>
    %cst_68 = arith.constant dense<0.000000e+00> : vector<48xf32>
    %190 = vector.multi_reduction <add>, %189, %cst_68 [1] : vector<48x128xf32> to vector<48xf32>
    %191 = vector.shape_cast %190 : vector<48xf32> to vector<48x1xf32>
    %cst_69 = arith.constant 1.280000e+02 : f32
    %192 = vector.broadcast %cst_69 : f32 to vector<48x1xf32>
    %193 = arith.divf %191, %192 : vector<48x1xf32>
    %194 = vector.broadcast %186 : vector<48x1xf32> to vector<48x128xf32>
    %195 = arith.subf %180, %194 : vector<48x128xf32>
    %cst_70 = arith.constant 9.99999997E-7 : f32
    %196 = vector.broadcast %cst_70 : f32 to vector<48x1xf32>
    %197 = arith.addf %193, %196 : vector<48x1xf32>
    %198 = math.rsqrt %197 : vector<48x1xf32>
    %199 = vector.broadcast %198 : vector<48x1xf32> to vector<48x128xf32>
    %200 = arith.mulf %195, %199 : vector<48x128xf32>
    %201 = vector.broadcast %181 : vector<1x128xf32> to vector<48x128xf32>
    %202 = arith.mulf %200, %201 : vector<48x128xf32>
    %203 = vector.broadcast %182 : vector<1x128xf32> to vector<48x128xf32>
    %204 = arith.addf %202, %203 : vector<48x128xf32>
    %205 = arith.truncf %204 : vector<48x128xf32> to vector<48x128xbf16>
    %c0_71 = arith.constant 0 : index
    %c0_72 = arith.constant 0 : index
    %206 = vector.load %arg15[%c0_71, %c0_72] : memref<128x512xbf16, #tpu.memory_space<vmem>>, vector<128x512xbf16>
    %cst_73 = arith.constant dense<0.000000e+00> : vector<48x512xf32>
    %207 = tpu.matmul %205, %206, %cst_73 {dimension_numbers = #tpu.dot_dimension_numbers<[1], [0], [0], [1], [0, 0, 1, 1], [], []>} : vector<48x128xbf16>, vector<128x512xbf16>, vector<48x512xf32> -> vector<48x512xf32>
    %c0_74 = arith.constant 0 : index
    %c0_75 = arith.constant 0 : index
    %208 = vector.load %arg16[%c0_74, %c0_75] : memref<1x512xf32, #tpu.memory_space<vmem>>, vector<1x512xf32>
    %209 = vector.broadcast %208 : vector<1x512xf32> to vector<48x512xf32>
    %210 = arith.addf %207, %209 : vector<48x512xf32>
    %211 = arith.mulf %210, %210 : vector<48x512xf32>
    %212 = arith.mulf %210, %211 : vector<48x512xf32>
    %cst_76 = arith.constant 4.471500e-02 : f32
    %213 = vector.broadcast %cst_76 : f32 to vector<48x512xf32>
    %214 = arith.mulf %213, %212 : vector<48x512xf32>
    %215 = arith.addf %210, %214 : vector<48x512xf32>
    %cst_77 = arith.constant 0.797884583 : f32
    %216 = vector.broadcast %cst_77 : f32 to vector<48x512xf32>
    %217 = arith.mulf %216, %215 : vector<48x512xf32>
    %218 = math.tanh %217 : vector<48x512xf32>
    %cst_78 = arith.constant 1.000000e+00 : f32
    %219 = vector.broadcast %cst_78 : f32 to vector<48x512xf32>
    %220 = arith.addf %219, %218 : vector<48x512xf32>
    %cst_79 = arith.constant 5.000000e-01 : f32
    %221 = vector.broadcast %cst_79 : f32 to vector<48x512xf32>
    %222 = arith.mulf %221, %220 : vector<48x512xf32>
    %223 = arith.mulf %210, %222 : vector<48x512xf32>
    %224 = arith.truncf %223 : vector<48x512xf32> to vector<48x512xbf16>
    %c0_80 = arith.constant 0 : index
    %c0_81 = arith.constant 0 : index
    %225 = vector.load %arg17[%c0_80, %c0_81] : memref<512x128xbf16, #tpu.memory_space<vmem>>, vector<512x128xbf16>
    %cst_82 = arith.constant dense<0.000000e+00> : vector<48x128xf32>
    %226 = tpu.matmul %224, %225, %cst_82 {dimension_numbers = #tpu.dot_dimension_numbers<[1], [0], [0], [1], [0, 0, 1, 1], [], []>} : vector<48x512xbf16>, vector<512x128xbf16>, vector<48x128xf32> -> vector<48x128xf32>
    %c0_83 = arith.constant 0 : index
    %c0_84 = arith.constant 0 : index
    %227 = vector.load %arg18[%c0_83, %c0_84] : memref<1x128xf32, #tpu.memory_space<vmem>>, vector<1x128xf32>
    %228 = vector.broadcast %227 : vector<1x128xf32> to vector<48x128xf32>
    %229 = arith.addf %226, %228 : vector<48x128xf32>
    %230 = arith.addf %180, %229 : vector<48x128xf32>
    %c0_85 = arith.constant 0 : index
    %c0_86 = arith.constant 0 : index
    %231 = vector.load %arg19[%c0_85, %c0_86] : memref<1x128xf32, #tpu.memory_space<vmem>>, vector<1x128xf32>
    %c0_87 = arith.constant 0 : index
    %c0_88 = arith.constant 0 : index
    %232 = vector.load %arg20[%c0_87, %c0_88] : memref<1x128xf32, #tpu.memory_space<vmem>>, vector<1x128xf32>
    %cst_89 = arith.constant dense<0.000000e+00> : vector<48xf32>
    %233 = vector.multi_reduction <add>, %230, %cst_89 [1] : vector<48x128xf32> to vector<48xf32>
    %234 = vector.shape_cast %233 : vector<48xf32> to vector<48x1xf32>
    %cst_90 = arith.constant 1.280000e+02 : f32
    %235 = vector.broadcast %cst_90 : f32 to vector<48x1xf32>
    %236 = arith.divf %234, %235 : vector<48x1xf32>
    %237 = vector.broadcast %236 : vector<48x1xf32> to vector<48x128xf32>
    %238 = arith.subf %230, %237 : vector<48x128xf32>
    %239 = arith.mulf %238, %238 : vector<48x128xf32>
    %cst_91 = arith.constant dense<0.000000e+00> : vector<48xf32>
    %240 = vector.multi_reduction <add>, %239, %cst_91 [1] : vector<48x128xf32> to vector<48xf32>
    %241 = vector.shape_cast %240 : vector<48xf32> to vector<48x1xf32>
    %cst_92 = arith.constant 1.280000e+02 : f32
    %242 = vector.broadcast %cst_92 : f32 to vector<48x1xf32>
    %243 = arith.divf %241, %242 : vector<48x1xf32>
    %244 = vector.broadcast %236 : vector<48x1xf32> to vector<48x128xf32>
    %245 = arith.subf %230, %244 : vector<48x128xf32>
    %cst_93 = arith.constant 9.99999997E-7 : f32
    %246 = vector.broadcast %cst_93 : f32 to vector<48x1xf32>
    %247 = arith.addf %243, %246 : vector<48x1xf32>
    %248 = math.rsqrt %247 : vector<48x1xf32>
    %249 = vector.broadcast %248 : vector<48x1xf32> to vector<48x128xf32>
    %250 = arith.mulf %245, %249 : vector<48x128xf32>
    %251 = vector.broadcast %231 : vector<1x128xf32> to vector<48x128xf32>
    %252 = arith.mulf %250, %251 : vector<48x128xf32>
    %253 = vector.broadcast %232 : vector<1x128xf32> to vector<48x128xf32>
    %254 = arith.addf %252, %253 : vector<48x128xf32>
    %c0_94 = arith.constant 0 : index
    %c0_95 = arith.constant 0 : index
    %255 = vector.load %arg21[%c0_94, %c0_95] : memref<8x48xbf16, #tpu.memory_space<vmem>>, vector<8x48xbf16>
    %256 = arith.truncf %254 : vector<48x128xf32> to vector<48x128xbf16>
    %cst_96 = arith.constant dense<0.000000e+00> : vector<8x128xf32>
    %257 = tpu.matmul %255, %256, %cst_96 {dimension_numbers = #tpu.dot_dimension_numbers<[1], [0], [0], [1], [0, 0, 1, 1], [], []>} : vector<8x48xbf16>, vector<48x128xbf16>, vector<8x128xf32> -> vector<8x128xf32>
    %258 = vector.shape_cast %257 : vector<8x128xf32> to vector<2x4x128xf32>
    %c0_97 = arith.constant 0 : index
    %c0_98 = arith.constant 0 : index
    %259 = vector.load %arg22[%c0_97, %c0_98] : memref<1x128xf32, #tpu.memory_space<vmem>>, vector<1x128xf32>
    %260 = vector.shape_cast %259 : vector<1x128xf32> to vector<1x1x128xf32>
    %261 = vector.broadcast %260 : vector<1x1x128xf32> to vector<2x1x128xf32>
    %262 = arith.mulf %36, %261 : vector<2x1x128xf32>
    %c0_99 = arith.constant 0 : index
    %c0_100 = arith.constant 0 : index
    %263 = vector.load %arg23[%c0_99, %c0_100] : memref<1x128xf32, #tpu.memory_space<vmem>>, vector<1x128xf32>
    %264 = vector.shape_cast %263 : vector<1x128xf32> to vector<1x1x128xf32>
    %265 = vector.broadcast %264 : vector<1x1x128xf32> to vector<2x1x128xf32>
    %266 = arith.addf %262, %265 : vector<2x1x128xf32>
    %c0_101 = arith.constant 0 : index
    %c0_102 = arith.constant 0 : index
    %c0_103 = arith.constant 0 : index
    %267 = vector.load %arg26[%c0_101, %c0_102, %c0_103] : memref<2x5x128xf32, #tpu.memory_space<vmem>>, vector<2x1x128xf32>
    tpu.vector_store %arg26[%c0_101, %c0_102, %c0_103], %266 {strides = array<i32>} : memref<2x5x128xf32, #tpu.memory_space<vmem>>, vector<2x1x128xf32>,
    %c0_104 = arith.constant 0 : index
    %c0_105 = arith.constant 0 : index
    %268 = vector.load %arg24[%c0_104, %c0_105] : memref<4x128xf32, #tpu.memory_space<vmem>>, vector<4x128xf32>
    %269 = vector.shape_cast %268 : vector<4x128xf32> to vector<1x4x128xf32>
    %270 = vector.broadcast %269 : vector<1x4x128xf32> to vector<2x4x128xf32>
    %271 = arith.mulf %258, %270 : vector<2x4x128xf32>
    %c0_106 = arith.constant 0 : index
    %c0_107 = arith.constant 0 : index
    %272 = vector.load %arg25[%c0_106, %c0_107] : memref<4x128xf32, #tpu.memory_space<vmem>>, vector<4x128xf32>
    %273 = vector.shape_cast %272 : vector<4x128xf32> to vector<1x4x128xf32>
    %274 = vector.broadcast %273 : vector<1x4x128xf32> to vector<2x4x128xf32>
    %275 = arith.addf %271, %274 : vector<2x4x128xf32>
    %c0_108 = arith.constant 0 : index
    %c1 = arith.constant 1 : index
    %c0_109 = arith.constant 0 : index
    %276 = vector.load %arg26[%c0_108, %c1, %c0_109] : memref<2x5x128xf32, #tpu.memory_space<vmem>>, vector<2x4x128xf32>
    tpu.vector_store %arg26[%c0_108, %c1, %c0_109], %275 {strides = array<i32>} : memref<2x5x128xf32, #tpu.memory_space<vmem>>, vector<2x4x128xf32>,
    return
  }
  func.func @transform_0(%arg0: i32) -> (i32, i32, i32) {
    %c0_i32 = arith.constant 0 : i32
    %c0_i32_0 = arith.constant 0 : i32
    %c0_i32_1 = arith.constant 0 : i32
    return %arg0, %c0_i32, %c0_i32_0 : i32, i32, i32
  }
  func.func @transform_1(%arg0: i32) -> (i32, i32) {
    %c0_i32 = arith.constant 0 : i32
    %c0_i32_0 = arith.constant 0 : i32
    %c0_i32_1 = arith.constant 0 : i32
    return %c0_i32, %c0_i32_0 : i32, i32
  }
  func.func @transform_2(%arg0: i32) -> (i32, i32) {
    %c0_i32 = arith.constant 0 : i32
    %c0_i32_0 = arith.constant 0 : i32
    %c0_i32_1 = arith.constant 0 : i32
    return %c0_i32, %c0_i32_0 : i32, i32
  }
  func.func @transform_3(%arg0: i32) -> (i32, i32) {
    %c0_i32 = arith.constant 0 : i32
    %c0_i32_0 = arith.constant 0 : i32
    %c0_i32_1 = arith.constant 0 : i32
    return %c0_i32, %c0_i32_0 : i32, i32
  }
  func.func @transform_4(%arg0: i32) -> (i32, i32) {
    %c0_i32 = arith.constant 0 : i32
    %c0_i32_0 = arith.constant 0 : i32
    %c0_i32_1 = arith.constant 0 : i32
    return %c0_i32, %c0_i32_0 : i32, i32
  }
  func.func @transform_5(%arg0: i32) -> (i32, i32) {
    %c0_i32 = arith.constant 0 : i32
    %c0_i32_0 = arith.constant 0 : i32
    %c0_i32_1 = arith.constant 0 : i32
    return %c0_i32, %c0_i32_0 : i32, i32
  }
  func.func @transform_6(%arg0: i32) -> (i32, i32) {
    %c0_i32 = arith.constant 0 : i32
    %c0_i32_0 = arith.constant 0 : i32
    %c0_i32_1 = arith.constant 0 : i32
    return %c0_i32, %c0_i32_0 : i32, i32
  }
  func.func @transform_7(%arg0: i32) -> (i32, i32) {
    %c0_i32 = arith.constant 0 : i32
    %c0_i32_0 = arith.constant 0 : i32
    %c0_i32_1 = arith.constant 0 : i32
    return %c0_i32, %c0_i32_0 : i32, i32
  }
  func.func @transform_8(%arg0: i32) -> (i32, i32) {
    %c0_i32 = arith.constant 0 : i32
    %c0_i32_0 = arith.constant 0 : i32
    %c0_i32_1 = arith.constant 0 : i32
    return %c0_i32, %c0_i32_0 : i32, i32
  }
  func.func @transform_9(%arg0: i32) -> (i32, i32) {
    %c0_i32 = arith.constant 0 : i32
    %c0_i32_0 = arith.constant 0 : i32
    %c0_i32_1 = arith.constant 0 : i32
    return %c0_i32, %c0_i32_0 : i32, i32
  }
  func.func @transform_10(%arg0: i32) -> (i32, i32) {
    %c0_i32 = arith.constant 0 : i32
    %c0_i32_0 = arith.constant 0 : i32
    %c0_i32_1 = arith.constant 0 : i32
    return %c0_i32, %c0_i32_0 : i32, i32
  }
  func.func @transform_11(%arg0: i32) -> (i32, i32) {
    %c0_i32 = arith.constant 0 : i32
    %c0_i32_0 = arith.constant 0 : i32
    %c0_i32_1 = arith.constant 0 : i32
    return %c0_i32, %c0_i32_0 : i32, i32
  }
  func.func @transform_12(%arg0: i32) -> (i32, i32) {
    %c0_i32 = arith.constant 0 : i32
    %c0_i32_0 = arith.constant 0 : i32
    %c0_i32_1 = arith.constant 0 : i32
    return %c0_i32, %c0_i32_0 : i32, i32
  }
  func.func @transform_13(%arg0: i32) -> (i32, i32) {
    %c0_i32 = arith.constant 0 : i32
    %c0_i32_0 = arith.constant 0 : i32
    %c0_i32_1 = arith.constant 0 : i32
    return %c0_i32, %c0_i32_0 : i32, i32
  }
  func.func @transform_14(%arg0: i32) -> (i32, i32) {
    %c0_i32 = arith.constant 0 : i32
    %c0_i32_0 = arith.constant 0 : i32
    %c0_i32_1 = arith.constant 0 : i32
    return %c0_i32, %c0_i32_0 : i32, i32
  }
  func.func @transform_15(%arg0: i32) -> (i32, i32) {
    %c0_i32 = arith.constant 0 : i32
    %c0_i32_0 = arith.constant 0 : i32
    %c0_i32_1 = arith.constant 0 : i32
    return %c0_i32, %c0_i32_0 : i32, i32
  }
  func.func @transform_16(%arg0: i32) -> (i32, i32) {
    %c0_i32 = arith.constant 0 : i32
    %c0_i32_0 = arith.constant 0 : i32
    %c0_i32_1 = arith.constant 0 : i32
    return %c0_i32, %c0_i32_0 : i32, i32
  }
  func.func @transform_17(%arg0: i32) -> (i32, i32) {
    %c0_i32 = arith.constant 0 : i32
    %c0_i32_0 = arith.constant 0 : i32
    %c0_i32_1 = arith.constant 0 : i32
    return %c0_i32, %c0_i32_0 : i32, i32
  }
  func.func @transform_18(%arg0: i32) -> (i32, i32) {
    %c0_i32 = arith.constant 0 : i32
    %c0_i32_0 = arith.constant 0 : i32
    %c0_i32_1 = arith.constant 0 : i32
    return %c0_i32, %c0_i32_0 : i32, i32
  }
  func.func @transform_19(%arg0: i32) -> (i32, i32) {
    %c0_i32 = arith.constant 0 : i32
    %c0_i32_0 = arith.constant 0 : i32
    %c0_i32_1 = arith.constant 0 : i32
    return %c0_i32, %c0_i32_0 : i32, i32
  }
  func.func @transform_20(%arg0: i32) -> (i32, i32) {
    %c0_i32 = arith.constant 0 : i32
    %c0_i32_0 = arith.constant 0 : i32
    %c0_i32_1 = arith.constant 0 : i32
    return %c0_i32, %c0_i32_0 : i32, i32
  }
  func.func @transform_21(%arg0: i32) -> (i32, i32) {
    %c0_i32 = arith.constant 0 : i32
    %c0_i32_0 = arith.constant 0 : i32
    %c0_i32_1 = arith.constant 0 : i32
    return %c0_i32, %c0_i32_0 : i32, i32
  }
  func.func @transform_22(%arg0: i32) -> (i32, i32) {
    %c0_i32 = arith.constant 0 : i32
    %c0_i32_0 = arith.constant 0 : i32
    %c0_i32_1 = arith.constant 0 : i32
    return %c0_i32, %c0_i32_0 : i32, i32
  }
  func.func @transform_23(%arg0: i32) -> (i32, i32) {
    %c0_i32 = arith.constant 0 : i32
    %c0_i32_0 = arith.constant 0 : i32
    %c0_i32_1 = arith.constant 0 : i32
    return %c0_i32, %c0_i32_0 : i32, i32
  }
  func.func @transform_24(%arg0: i32) -> (i32, i32) {
    %c0_i32 = arith.constant 0 : i32
    %c0_i32_0 = arith.constant 0 : i32
    %c0_i32_1 = arith.constant 0 : i32
    return %c0_i32, %c0_i32_0 : i32, i32
  }
  func.func @transform_25(%arg0: i32) -> (i32, i32, i32) {
    %c0_i32 = arith.constant 0 : i32
    %c0_i32_0 = arith.constant 0 : i32
    %c0_i32_1 = arith.constant 0 : i32
    return %arg0, %c0_i32, %c0_i32_0 : i32, i32, i32
  }
}

</mosaic_0001>

<bundles_post_ra>
// kernel: tpu_custom_call.1
= control target key start
LH: loop header
LB: loop body
LE: loop exit
PB: predicated region body
PF: predicated region fallthrough
CT: control target
= control target key end

     0   :  { %s6061_s0 = inlined_call_operand.hbm [shape: bf16[2,24,128], index: 0, kind: input, shape index: {}]   ;;  %s6062_s1 = inlined_call_operand.hbm [shape: bf16[128,128], index: 1, kind: input, shape index: {}]   ;;  %s6063_s2 = inlined_call_operand.hbm [shape: f32[24,128], index: 2, kind: input, shape index: {}]   ;;  %s6064_s3 = inlined_call_operand.vmem [shape: f32[1,24], index: 3, kind: input, shape index: {}]   ;;  %s6065_s4 = inlined_call_operand.vmem [shape: f32[1,128], index: 4, kind: input, shape index: {}]   ;;  %s6066_s5 = inlined_call_operand.hbm [shape: f32[1,128], index: 5, kind: input, shape index: {}]   ;;  %s6067_s6 = inlined_call_operand.vmem [shape: f32[1,128], index: 6, kind: input, shape index: {}]   ;;  %s6068_s7 = inlined_call_operand.vmem [shape: f32[1,128], index: 7, kind: input, shape index: {}]   ;;  %s6069_s8 = inlined_call_operand.hbm [shape: bf16[128,384], index: 8, kind: input, shape index: {}]   ;;  %s6070_s9 = inlined_call_operand.vmem [shape: f32[1,384], index: 9, kind: input, shape index: {}]   ;;  %s6071_s10 = inlined_call_operand.hbm [shape: bf16[128,128], index: 10, kind: input, shape index: {}]   ;;  %s6072_s11 = inlined_call_operand.vmem [shape: f32[1,128], index: 11, kind: input, shape index: {}]   ;;  %s6073_s12 = inlined_call_operand.vmem [shape: f32[1,128], index: 12, kind: input, shape index: {}]   ;;  %s6074_s13 = inlined_call_operand.vmem [shape: f32[1,128], index: 13, kind: input, shape index: {}]   ;;  %s6075_s14 = inlined_call_operand.hbm [shape: bf16[128,512], index: 14, kind: input, shape index: {}]   ;;  %s6076_s15 = inlined_call_operand.vmem [shape: f32[1,512], index: 15, kind: input, shape index: {}]   ;;  %s6077_s16 = inlined_call_operand.hbm [shape: bf16[512,128], index: 16, kind: input, shape index: {}]   ;;  %s6078_s17 = inlined_call_operand.vmem [shape: f32[1,128], index: 17, kind: input, shape index: {}]   ;;  %s6079_s18 = inlined_call_operand.vmem [shape: f32[1,128], index: 18, kind: input, shape index: {}]   ;;  %s6080_s19 = inlined_call_operand.vmem [shape: f32[1,128], index: 19, kind: input, shape index: {}]   ;;  %s6081_s20 = inlined_call_operand.vmem [shape: bf16[8,48], index: 20, kind: input, shape index: {}]   ;;  %s6082_s21 = inlined_call_operand.vmem [shape: f32[1,128], index: 21, kind: input, shape index: {}]   ;;  %s6083_s22 = inlined_call_operand.vmem [shape: f32[1,128], index: 22, kind: input, shape index: {}]   ;;  %s6084_s23 = inlined_call_operand.vmem [shape: f32[4,128], index: 23, kind: input, shape index: {}]   ;;  %s6085_s24 = inlined_call_operand.vmem [shape: f32[4,128], index: 24, kind: input, shape index: {}]   ;;  %s6086_s25 = inlined_call_operand.vmem [shape: f32[2,5,128], index: 25, kind: output, shape index: {}]  }
   0x1   :  { %6098 = sst [smem:[#allocation20_spill]] %s6061_s0 }
   0x2   :  { %6099 = sst [smem:[#allocation21_spill]] %s6062_s1 }
   0x3   :  { %6100 = sst [smem:[#allocation22_spill]] %s6063_s2 }
   0x4   :  { %6101 = sst [smem:[#allocation23_spill]] %s6064_s3 }
   0x5   :  { %6102 = sst [smem:[#allocation24_spill]] %s6065_s4 }
   0x6   :  { %6103 = sst [smem:[#allocation25_spill]] %s6066_s5 }
   0x7   :  { %6104 = sst [smem:[#allocation26_spill]] %s6067_s6 }
   0x8   :  { %6105 = sst [smem:[#allocation27_spill]] %s6068_s7 }
   0x9   :  { %6106 = sst [smem:[#allocation28_spill]] %s6069_s8 }
   0xa   :  { %6107 = sst [smem:[#allocation29_spill]] %s6070_s9 }
   0xb   :  { %6108 = sst [smem:[#allocation30_spill]] %s6084_s23 }
   0xc   :  { %6109 = sst [smem:[#allocation31_spill]] %s6085_s24 }
   0xd   :  { %6110 = sst [smem:[#allocation32_spill]] %s6086_s25 }
   0xe   :  { %30 = vsyncpa [#allocation3], 0 }
   0xf   :  { %31 = vsyncpa [#allocation5], 0 }
  0x10   :  { %32 = vsyncpa [#allocation8], 0 }
  0x11   :  { %33 = vsyncpa [#allocation11], 0 }
  0x12   :  { %34 = vsyncpa [#allocation14], 0  ;;  %s4921_s29 = smov [#allocation4]   ;;  %s4922_s6 = smov [#allocation7]  }
  0x13   :  { %s52_s2 = sshll.u32 %s4921_s29, 4  ;;  %s81_s30 = sshll.u32 %s4922_s6, 4  ;;  %s53_s2 = int_to_ptr.vmem [resolvable:$true] %s52_s2  ;;  %s5072_s30 = int_to_ptr.vmem [resolvable:$true] %s81_s30 }
  0x14   :  { %s6111_s26 = sld [smem:[#allocation21_spill]] }
  0x1a   :  { %s4735_s1 = scalar_lea.hbm %s6111_s26, 1024 }
  0x1b   :  { %p4736_p0 = scmp.ne.s32.totalorder %s6111_s26, %s4735_s1  ;;  %p4739_p1 = scmp.lt.u32.totalorder %s4735_s1, %s6111_s26 }
  0x1d   :  { %p4741_p2 = pnand %p4739_p1, %p4736_p0 }
  0x1f   :  { %4744 = shalt.err (!%p4741_p2)
}
  0x20   :  { %s4745_s9 = scalar_lea.vmem %s53_s2, 1024  ;;  %p4750_p4 = scmp.lt.s32.totalorder %s53_s2, %s53_s2 }
  0x21   :  { %p4746_p3 = scmp.ne.s32.totalorder %s53_s2, %s4745_s9  ;;  %p4751_p5 = scmp.lt.s32.totalorder %s4745_s9, %s4745_s9 }
  0x23   :  { %p4752_p6 = por %p4751_p5, %p4750_p4 }
  0x25   :  { %p4753_p7 = pnand %p4752_p6, %p4746_p3 }
  0x27   :  { %4756 = shalt.err (!%p4753_p7)
}
  0x28   :  { %s6093_s5 = smov 64   ;;  %s6095_s0 = smov 4  }
  0x29   :  { %58 = dma.hbm_to_vmem [thread:$0]  %s6111_s26, 1024, %s53_s2, [#allocation5], %s6093_s5, %s6093_s5, %s6095_s0  }
  0x2a   :  { %s6112_s1 = sld [smem:[#allocation25_spill]] }
  0x30   :  { %s4757_s8 = scalar_lea.hbm %s6112_s1, 16 }
  0x31   :  { %p4758_p8 = scmp.ne.s32.totalorder %s6112_s1, %s4757_s8  ;;  %p4761_p9 = scmp.lt.u32.totalorder %s4757_s8, %s6112_s1 }
  0x33   :  { %p4763_p10 = pnand %p4761_p9, %p4758_p8 }
  0x35   :  { %4766 = shalt.err (!%p4763_p10)
}
  0x36   :  { %s4767_s29 = scalar_lea.vmem %s5072_s30, 16  ;;  %s4771_s2 = scalar_lea.vmem %s5072_s30, 32 }
  0x37   :  { %p4768_p11 = scmp.ne.s32.totalorder %s5072_s30, %s4767_s29  ;;  %p4772_p12 = scmp.lt.s32.totalorder %s5072_s30, %s5072_s30 }
  0x38   :  { %p4773_p13 = scmp.lt.s32.totalorder %s4771_s2, %s4767_s29 }
  0x3a   :  { %p4774_p0 = por %p4773_p13, %p4772_p12 }
  0x3c   :  { %p4775_p1 = pnand %p4774_p0, %p4768_p11 }
  0x3e   :  { %4778 = shalt.err (!%p4775_p1)
}
  0x3f   :  { %84 = dma.hbm_to_vmem [thread:$0]  %s6112_s1, 16, %s5072_s30, [#allocation8]  }
  0x40   :  { %s4925_s7 = smov [#allocation10]   ;;  %s4926_s8 = smov [#allocation2]  }
  0x41   :  { %s108_s3 = sshll.u32 %s4925_s7, 4  ;;  %s40_s27 = sshll.u32 %s4926_s8, 4  ;;  %s109_s3 = int_to_ptr.vmem [resolvable:$true] %s108_s3  ;;  %s5107_s27 = int_to_ptr.vmem [resolvable:$true] %s40_s27 }
  0x42   :  { %s4779_s9 = scalar_lea.hbm %s6071_s10, 1024 }
  0x43   :  { %p4780_p2 = scmp.ne.s32.totalorder %s6071_s10, %s4779_s9  ;;  %p4783_p3 = scmp.lt.u32.totalorder %s4779_s9, %s6071_s10 }
  0x45   :  { %p4785_p4 = pnand %p4783_p3, %p4780_p2 }
  0x47   :  { %4788 = shalt.err (!%p4785_p4)
}
  0x48   :  { %s4789_s30 = scalar_lea.vmem %s109_s3, 1024  ;;  %p4794_p6 = scmp.lt.s32.totalorder %s109_s3, %s109_s3 }
  0x49   :  { %p4790_p5 = scmp.ne.s32.totalorder %s109_s3, %s4789_s30  ;;  %p4795_p7 = scmp.lt.s32.totalorder %s4789_s30, %s4789_s30 }
  0x4b   :  { %p4796_p8 = por %p4795_p7, %p4794_p6 }
  0x4d   :  { %p4797_p9 = pnand %p4796_p8, %p4790_p5 }
  0x4f   :  { %4800 = shalt.err (!%p4797_p9)
}
  0x50   :  { %s6113_s1 = smov 4   ;;  %s6114_s26 = smov 64  }
  0x51   :  { %114 = dma.hbm_to_vmem [thread:$0]  %s6071_s10, 1024, %s109_s3, [#allocation11], %s6114_s26, %s6114_s26, %s6113_s1  }
  0x52   :  { %s6115_s5 = sld [smem:[#allocation20_spill]] }
  0x58   :  { %s4801_s0 = scalar_lea.hbm %s6115_s5, 384 }
  0x59   :  { %p4802_p10 = scmp.ne.s32.totalorder %s6115_s5, %s4801_s0  ;;  %p4805_p11 = scmp.lt.u32.totalorder %s4801_s0, %s6115_s5 }
  0x5b   :  { %p4807_p12 = pnand %p4805_p11, %p4802_p10 }
  0x5d   :  { %4810 = shalt.err (!%p4807_p12)
}
  0x5e   :  { %s4811_s30 = scalar_lea.vmem %s5107_s27, 384  ;;  %p4816_p0 = scmp.lt.s32.totalorder %s5107_s27, %s5107_s27 }
  0x5f   :  { %p4812_p13 = scmp.ne.s32.totalorder %s5107_s27, %s4811_s30  ;;  %p4817_p1 = scmp.lt.s32.totalorder %s4811_s30, %s4811_s30 }
  0x61   :  { %p4818_p2 = por %p4817_p1, %p4816_p0 }
  0x63   :  { %p4819_p3 = pnand %p4818_p2, %p4812_p13 }
  0x65   :  { %4822 = shalt.err (!%p4819_p3)
}
  0x66   :  { %46 = dma.hbm_to_vmem [thread:$0]  %s6115_s5, 384, %s5107_s27, [#allocation3], %s6114_s26, %s6114_s26, %s6113_s1  }
  0x67   :  { %s4927_s6 = smov [#allocation6]   ;;  %s6116_s0 = sld [smem:[#allocation22_spill]] }
  0x68   :  { %s64_s7 = sshll.u32 %s4927_s6, 4  ;;  %s65_s7 = int_to_ptr.vmem [resolvable:$true] %s64_s7 }
  0x6d   :  { %s4823_s28 = scalar_lea.hbm %s6116_s0, 384 }
  0x6e   :  { %p4824_p4 = scmp.ne.s32.totalorder %s6116_s0, %s4823_s28  ;;  %p4827_p5 = scmp.lt.u32.totalorder %s4823_s28, %s6116_s0 }
  0x70   :  { %p4829_p6 = pnand %p4827_p5, %p4824_p4 }
  0x72   :  { %4832 = shalt.err (!%p4829_p6)
}
  0x73   :  { %s4833_s24 = scalar_lea.vmem %s65_s7, 384  ;;  %p4838_p8 = scmp.lt.s32.totalorder %s65_s7, %s65_s7 }
  0x74   :  { %p4834_p7 = scmp.ne.s32.totalorder %s65_s7, %s4833_s24  ;;  %p4839_p9 = scmp.lt.s32.totalorder %s4833_s24, %s4833_s24 }
  0x76   :  { %p4840_p10 = por %p4839_p9, %p4838_p8 }
  0x78   :  { %p4841_p11 = pnand %p4840_p10, %p4834_p7 }
  0x7a   :  { %4844 = shalt.err (!%p4841_p11)
}
  0x7b   :  { %s4928_s27 = smov 128   ;;  %s4929_s5 = smov 8  }
  0x7c   :  { %70 = dma.hbm_to_vmem [thread:$0]  %s6116_s0, 384, %s65_s7, [#allocation5], %s4928_s27, %s4928_s27, %s4929_s5  }
  0x7d   :  { %s4930_s6 = smov [#allocation9]   ;;  %s6117_s9 = sld [smem:[#allocation28_spill]] }
  0x7e   :  { %s94_s8 = sshll.u32 %s4930_s6, 4  ;;  %s95_s8 = int_to_ptr.vmem [resolvable:$true] %s94_s8 }
  0x83   :  { %s4845_s29 = scalar_lea.hbm %s6117_s9, 3072 }
  0x84   :  { %p4846_p12 = scmp.ne.s32.totalorder %s6117_s9, %s4845_s29  ;;  %p4849_p13 = scmp.lt.u32.totalorder %s4845_s29, %s6117_s9 }
  0x86   :  { %p4851_p0 = pnand %p4849_p13, %p4846_p12 }
  0x88   :  { %4854 = shalt.err (!%p4851_p0)
}
  0x89   :  { %s4855_s25 = scalar_lea.vmem %s95_s8, 3072  ;;  %p4860_p2 = scmp.lt.s32.totalorder %s95_s8, %s95_s8 }
  0x8a   :  { %p4856_p1 = scmp.ne.s32.totalorder %s95_s8, %s4855_s25  ;;  %p4861_p3 = scmp.lt.s32.totalorder %s4855_s25, %s4855_s25 }
  0x8c   :  { %p4862_p4 = por %p4861_p3, %p4860_p2 }
  0x8e   :  { %p4863_p5 = pnand %p4862_p4, %p4856_p1 }
  0x90   :  { %4866 = shalt.err (!%p4863_p5)
}
  0x91   :  { %s4931_s7 = smov 192   ;;  %s4932_s0 = smov 12  }
  0x92   :  { %100 = dma.hbm_to_vmem [thread:$0]  %s6117_s9, 3072, %s95_s8, [#allocation8], %s4931_s7, %s4931_s7, %s4932_s0  }
  0x93   :  { %s4933_s10 = smov [#allocation12]   ;;  %s4867_s4 = scalar_lea.hbm %s6075_s14, 4096 }
  0x94   :  { %s126_s3 = sshll.u32 %s4933_s10, 4  ;;  %p4868_p6 = scmp.ne.s32.totalorder %s6075_s14, %s4867_s4  ;;  %s127_s3 = int_to_ptr.vmem [resolvable:$true] %s126_s3 }
  0x95   :  { %p4871_p7 = scmp.lt.u32.totalorder %s4867_s4, %s6075_s14 }
  0x97   :  { %p4873_p8 = pnand %p4871_p7, %p4868_p6 }
  0x99   :  { %4876 = shalt.err (!%p4873_p8)
}
  0x9a   :  { %s4877_s30 = scalar_lea.vmem %s127_s3, 4096  ;;  %p4882_p10 = scmp.lt.s32.totalorder %s127_s3, %s127_s3 }
  0x9b   :  { %p4878_p9 = scmp.ne.s32.totalorder %s127_s3, %s4877_s30  ;;  %p4883_p11 = scmp.lt.s32.totalorder %s4877_s30, %s4877_s30 }
  0x9d   :  { %p4884_p12 = por %p4883_p11, %p4882_p10 }
  0x9f   :  { %p4885_p13 = pnand %p4884_p12, %p4878_p9 }
  0xa1   :  { %4888 = shalt.err (!%p4885_p13)
}
  0xa2   :  { %s4934_s8 = smov 256   ;;  %s4935_s9 = smov 16  }
  0xa3   :  { %132 = dma.hbm_to_vmem [thread:$0]  %s6075_s14, 4096, %s127_s3, [#allocation11], %s4934_s8, %s4934_s8, %s4935_s9  }
  0xa4   :  { %s4936_s0 = smov [#allocation13]   ;;  %s4889_s23 = scalar_lea.hbm %s6077_s16, 4096 }
  0xa5   :  { %s140_s27 = sshll.u32 %s4936_s0, 4  ;;  %p4890_p0 = scmp.ne.s32.totalorder %s6077_s16, %s4889_s23  ;;  %s141_s27 = int_to_ptr.vmem [resolvable:$true] %s140_s27 }
  0xa6   :  { %p4893_p1 = scmp.lt.u32.totalorder %s4889_s23, %s6077_s16 }
  0xa8   :  { %p4895_p2 = pnand %p4893_p1, %p4890_p0 }
  0xaa   :  { %4898 = shalt.err (!%p4895_p2)
}
  0xab   :  { %s4899_s25 = scalar_lea.vmem %s141_s27, 4096  ;;  %p4904_p4 = scmp.lt.s32.totalorder %s141_s27, %s141_s27 }
  0xac   :  { %p4900_p3 = scmp.ne.s32.totalorder %s141_s27, %s4899_s25  ;;  %p4905_p5 = scmp.lt.s32.totalorder %s4899_s25, %s4899_s25 }
  0xae   :  { %p4906_p6 = por %p4905_p5, %p4904_p4 }
  0xb0   :  { %p4907_p7 = pnand %p4906_p6, %p4900_p3 }
  0xb2   :  { %4910 = shalt.err (!%p4907_p7)
}
  0xb3   :  { %146 = dma.hbm_to_vmem [thread:$0]  %s6077_s16, 4096, %s141_s27, [#allocation14], %s6114_s26, %s6114_s26, %s6113_s1  }
  0xb4   :  { %4911 = dma.done.wait [#allocation3], 384  }
  0xb5   :  { %4912 = vsyncadd [#allocation3], 4294966912 }
  0xb6   :  { %4913 = dma.done.wait [#allocation5], 1408  }
  0xb7   :  { %4914 = vsyncadd [#allocation5], 4294965888 }
  0xb8   :  { %4915 = dma.done.wait [#allocation8], 3088  }
  0xb9   :  { %4916 = vsyncadd [#allocation8], 4294964208 }
  0xba   :  { %4917 = dma.done.wait [#allocation11], 5120  }
  0xbb   :  { %4918 = vsyncadd [#allocation11], 4294962176 }
  0xbc   :  { %4919 = dma.done.wait [#allocation14], 4096  }
  0xbd   :  { %4920 = vsyncadd [#allocation14], 4294963200  ;;  %v4937_v0 = vmov 0.0   ;;  %vm4938_vm0 = vmmov 0   ;;  %v4419_v1 = vld [vmem:[#allocation4] sm:$0xff]   ;;  %v4420_v2 = vld [vmem:[#allocation4 + $0x8] sm:$0xff]  }
  0xbe   :  { %4074 = vmatprep.subr.bf16.mxu0 %v4937_v0  ;;  %4090 = vmatprep.mubr.msk.bf16.mxu0 %vm4938_vm0, %v4937_v0  ;;  %v4421_v3 = vld [vmem:[#allocation4 + $0x10] sm:$0xff]   ;;  %v4422_v4 = vld [vmem:[#allocation4 + $0x18] sm:$0xff]   ;;  %v4423_v5 = vld [vmem:[#allocation4 + $0x20] sm:$0xff]   ;;  %s6118_s2 = sld [smem:[#allocation26_spill]]  ;;  %s6119_s9 = sld [smem:[#allocation27_spill]]  ;;  %vm794_vm1 = vcmask 261120  }
  0xbf   :  { %4075 = vmatpush3.bf16.msra.mxu0 %v4419_v1  ;;  %v4424_v6 = vld [vmem:[#allocation4 + $0x28] sm:$0xff]   ;;  %v4425_v7 = vld [vmem:[#allocation4 + $0x30] sm:$0xff]   ;;  %v4426_v8 = vld [vmem:[#allocation4 + $0x38] sm:$0xff]   ;;  %s6120_s0 = sld [smem:[#allocation29_spill]]  ;;  %vm1010_vm2 = vcmask 1043456   ;;  %s6121_s10 = sld [smem:[#allocation23_spill]] }
  0xc0   :  { %4076 = vmatprep.subr.bf16.mxu0 %v4937_v0  ;;  %v4427_v9 = vld [vmem:[#allocation2] sm:$0xff]   ;;  %v4428_v10 = vld [vmem:[#allocation2 + $0x8] sm:$0xff]   ;;  %v4429_v11 = vld [vmem:[#allocation2 + $0x10] sm:$0xff]   ;;  %vm933_vm3 = vcmask 195584   ;;  %s4940_s23 = smov 96   ;;  %s4941_s6 = smov 32  }
  0xc1   :  { %v333_v12 = vld [vmem:[#allocation6] sm:$0xff]  ;;  %v334_v17 = vld [vmem:[#allocation6 + $0x8] sm:$0xff]  ;;  %v335_v20 = vld [vmem:[#allocation6 + $0x10] sm:$0xff]  ;;  %vm344_vm4 = vcmask 1040384   ;;  %vm3663_vm5 = vcmask 392192   ;;  %s6122_s24 = sld [smem:[#allocation24_spill]] }
  0xc2   :  { %v4430_v33 = vld [vmem:[#allocation9 + $0x4] ss:$12 sps:$4 sm:$0xff]   ;;  %v4432_v34 = vld [vmem:[#allocation9] ss:$12 sps:$4 sm:$0xff]   ;;  %v4433_v35 = vld [vmem:[#allocation9 + $0x8] ss:$12 sps:$4 sm:$0xff]  }
  0xc3   :  { %4077 = vmatpush3.bf16.msra.mxu0 %v4420_v2  ;;  %v4434_v36 = vld [vmem:[#allocation9 + $0x1c] ss:$12 sps:$4 sm:$0xff]   ;;  %648 = vmatprep.subr.bf16.mxu1 %v4430_v33  ;;  %v4436_v58 = vld [vmem:[#allocation9 + $0x18] ss:$12 sps:$4 sm:$0xff]   ;;  %v4437_v59 = vld [vmem:[#allocation9 + $0x20] ss:$12 sps:$4 sm:$0xff]  }
  0xc4   :  { %4078 = vmatprep.subr.bf16.mxu0 %v4937_v0  ;;  %649 = vmatpush1.bf16.msra.mxu1 %v4432_v34  ;;  %v4438_v62 = vld [vmem:[#allocation9 + $0x34] ss:$12 sps:$4 sm:$0xff]   ;;  %v4440_v1 = vld [vmem:[#allocation9 + $0x30] ss:$12 sps:$4 sm:$0xff]   ;;  %v4441_v2 = vld [vmem:[#allocation9 + $0x38] ss:$12 sps:$4 sm:$0xff]  }
  0xc5   :  { %650 = vmatprep.subr.bf16.mxu1 %v4434_v36  ;;  %s6124_s28 = sld [smem:[#allocation30_spill]] }
  0xc7   :  { %4079 = vmatpush3.bf16.msra.mxu0 %v4421_v3  ;;  %v4442_v3 = vld [vmem:[#allocation9 + $0x4c] ss:$12 sps:$4 sm:$0xff]  }
  0xc8   :  { %4080 = vmatprep.subr.bf16.mxu0 %v4937_v0  ;;  %651 = vmatpush1.bf16.msra.mxu1 %v4436_v58 }
  0xc9   :  { %652 = vmatprep.subr.bf16.mxu1 %v4438_v62 }
  0xcb   :  { %4081 = vmatpush3.bf16.msra.mxu0 %v4422_v4  ;;  %v4444_v4 = vld [vmem:[#allocation9 + $0x48] ss:$12 sps:$4 sm:$0xff]  }
  0xcc   :  { %4082 = vmatprep.subr.bf16.mxu0 %v4937_v0  ;;  %653 = vmatpush1.bf16.msra.mxu1 %v4440_v1 }
  0xcd   :  { %654 = vmatprep.subr.bf16.mxu1 %v4442_v3 }
  0xcf   :  { %4083 = vmatpush3.bf16.msra.mxu0 %v4423_v5  ;;  %v4445_v5 = vld [vmem:[#allocation9 + $0x50] ss:$12 sps:$4 sm:$0xff]  }
  0xd0   :  { %4084 = vmatprep.subr.bf16.mxu0 %v4937_v0  ;;  %655 = vmatpush1.bf16.msra.mxu1 %v4444_v4 }
  0xd3   :  { %4085 = vmatpush3.bf16.msra.mxu0 %v4424_v6  ;;  %v4446_v6 = vld [vmem:[#allocation9 + $0x64] ss:$12 sps:$4 sm:$0xff]  }
  0xd4   :  { %4086 = vmatprep.subr.bf16.mxu0 %v4937_v0  ;;  %656 = vmatprep.subr.bf16.mxu1 %v4446_v6 }
  0xd7   :  { %4087 = vmatpush3.bf16.msra.mxu0 %v4425_v7  ;;  %v4448_v7 = vld [vmem:[#allocation9 + $0x60] ss:$12 sps:$4 sm:$0xff]  }
  0xd8   :  { %4088 = vmatprep.subr.bf16.mxu0 %v4937_v0  ;;  %657 = vmatpush1.bf16.msra.mxu1 %v4448_v7 }
  0xdb   :  { %4089 = vmatpush3.bf16.msra.mxu0 %v4426_v8  ;;  %v4449_v8 = vld [vmem:[#allocation9 + $0x68] ss:$12 sps:$4 sm:$0xff]  }
  0xdc   :  { %4102 = vmatprep.subr.bf16.mxu0 %v4937_v0 }
  0xde   :  { %4091 = vmatmul.mubr.bf16.vlgmr.msra.gmra.mrb[0].mxu0 %v4427_v9  ;;  %v4450_v9 = vld [vmem:[#allocation9 + $0x7c] ss:$12 sps:$4 sm:$0xff]  }
  0xdf   :  { %4094 = vmatprep.mubr.msk.bf16.mxu0 %vm4938_vm0, %v4937_v0  ;;  %4103 = vmatpush3.bf16.msra.mxu0 %v4433_v35 }
  0xe0   :  { %4104 = vmatprep.subr.bf16.mxu0 %v4937_v0  ;;  %658 = vmatprep.subr.bf16.mxu1 %v4450_v9 }
  0xe3   :  { %4105 = vmatpush3.bf16.msra.mxu0 %v4437_v59 }
  0xe4   :  { %4106 = vmatprep.subr.bf16.mxu0 %v4937_v0 }
  0xe6   :  { %4095 = vmatmul.mubr.bf16.gmra.mrb[4].mxu0 %v4428_v10  ;;  %v4452_v10 = vld [vmem:[#allocation9 + $0x78] ss:$12 sps:$4 sm:$0xff]  }
  0xe7   :  { %4098 = vmatprep.mubr.msk.bf16.mxu0 %vm4938_vm0, %v4937_v0  ;;  %4107 = vmatpush3.bf16.msra.mxu0 %v4441_v2 }
  0xe8   :  { %4108 = vmatprep.subr.bf16.mxu0 %v4937_v0  ;;  %659 = vmatpush1.bf16.msra.mxu1 %v4452_v10 }
  0xeb   :  { %4109 = vmatpush3.bf16.msra.mxu0 %v4445_v5 }
  0xec   :  { %4110 = vmatprep.subr.bf16.mxu0 %v4937_v0 }
  0xee   :  { %4099 = vmatmul.mubr.bf16.gmra.mrb[8].mxu0 %v4429_v11  ;;  %v4453_v11 = vld [vmem:[#allocation9 + $0x80] ss:$12 sps:$4 sm:$0xff]  }
  0xef   :  { %4118 = vmatprep.mubr.msk.bf16.mxu0 %vm4938_vm0, %v4937_v0  ;;  %4111 = vmatpush3.bf16.msra.mxu0 %v4449_v8 }
  0xf0   :  { %4112 = vmatprep.subr.bf16.mxu0 %v4937_v0 }
  0xf3   :  { %4113 = vmatpush3.bf16.msra.mxu0 %v4453_v11  ;;  %v505_v11 = vlaneseq }
  0xf4   :  { %4114 = vmatprep.subr.bf16.mxu0 %v4937_v0 }
 0x1b1   :  { %v310_v13 = vpop.f32.mrb[0].mxu0 }
 0x1b2   :  { %v5212_v14 = vadd.f32 %v333_v12, %v310_v13  ;;  %v4092_v15 = vpop.f32.mrb[1].mxu0  ;;  %v4456_v13 = vld [vmem:[#allocation9 + $0x90] ss:$12 sps:$4 sm:$0xff]  }
 0x1b3   :  { %v313_v16 = vpop.f32.mrb[2].mxu0  ;;  %v4457_v15 = vld [vmem:[#allocation9 + $0x98] ss:$12 sps:$4 sm:$0xff]  }
 0x1b4   :  { %378 = vadd.xlane.f32.xlu0 %v5212_v14  ;;  %v4093_v18 = vpop.f32.mrb[3].mxu0  ;;  %v5215_v19 = vadd.f32 %v334_v17, %v313_v16  ;;  %4115 = vmatpush3.bf16.msra.mxu0 %v4457_v15  ;;  %v4458_v16 = vld [vmem:[#allocation9 + $0xac] ss:$12 sps:$4 sm:$0xff]  }
 0x1b5   :  { %4116 = vmatprep.subr.bf16.mxu0 %v4937_v0  ;;  %v4461_v18 = vld [vmem:[#allocation9 + $0xb0] ss:$12 sps:$4 sm:$0xff]  }
 0x1b8   :  { %380 = vadd.xlane.f32.xlu0 %v5215_v19  ;;  %4117 = vmatpush3.bf16.msra.mxu0 %v4461_v18 }
 0x1b9   :  { %v318_v21 = vpop.f32.mrb[4].mxu0 }
 0x1ba   :  { %v5218_v22 = vadd.f32 %v335_v20, %v318_v21  ;;  %v4096_v23 = vpop.f32.mrb[5].mxu0 }
 0x1bb   :  { %v321_v24 = vpop.f32.mrb[6].mxu0 }
 0x1bc   :  { %382 = vadd.xlane.f32.xlu1 %v5218_v22  ;;  %v4097_v25 = vpop.f32.mrb[7].mxu0  ;;  %v5221_v26 = vadd.f32 %v333_v12, %v321_v24  ;;  %v4454_v12 = vld [vmem:[#allocation9 + $0x94] ss:$12 sps:$4 sm:$0xff]  }
 0x1bd   :  { %660 = vmatprep.subr.bf16.mxu1 %v4454_v12 }
 0x1be   :  { %661 = vmatpush1.bf16.msra.mxu1 %v4456_v13  ;;  %v503_v13 = vld [vmem:[%s6120_s0] sm:$0x7] }
 0x1bf   :  { %662 = vmatprep.subr.bf16.mxu1 %v4458_v16 }
 0x1c0   :  { %384 = vadd.xlane.f32.xlu1 %v5221_v26 }
 0x1c1   :  { %v326_v27 = vpop.f32.mrb[8].mxu0 }
 0x1c2   :  { %v5224_v28 = vadd.f32 %v334_v17, %v326_v27  ;;  %v4100_v29 = vpop.f32.mrb[9].mxu0  ;;  %v4460_v17 = vld [vmem:[#allocation9 + $0xa8] ss:$12 sps:$4 sm:$0xff]  }
 0x1c3   :  { %v329_v30 = vpop.f32.mrb[10].mxu0  ;;  %663 = vmatpush1.bf16.msra.mxu1 %v4460_v17 }
 0x1c4   :  { %v5226_v31 = vadd.f32 %v335_v20, %v329_v30  ;;  %386 = vadd.xlane.f32.xlu0 %v5224_v28  ;;  %v4101_v32 = vpop.f32.mrb[11].mxu0  ;;  %v4939_v20 = vmov 0  }
 0x1c5   :  { %680 = vmatprep.mubr.bf16.mxu1 %v4939_v20 }
 0x1c6   :  { %388 = vadd.xlane.f32.xlu1 %v5226_v31 }
 0x241   :  { %v379_v37 = vpop.xlane.xlu0 %378 }
 0x242   :  { %v390_v38 = vmul.f32 0.0078125, %v379_v37 }
 0x244   :  { %v5232_v39 = vsub.f32 %v5212_v14, %v390_v38 }
 0x245   :  { %v381_v40 = vpop.xlane.xlu0 %380 }
 0x246   :  { %v391_v41 = vmul.f32 0.0078125, %v381_v40  ;;  %v402_v42 = vmul.f32 %v5232_v39, %v5232_v39 }
 0x248   :  { %408 = vadd.xlane.f32.xlu0 %v402_v42  ;;  %v5237_v43 = vsub.f32 %v5215_v19, %v391_v41  ;;  %v3746_v42 = vld [vmem:[%s6118_s2] ss:$0 sm:$0xff] }
 0x249   :  { %v383_v44 = vpop.xlane.xlu1 %382 }
 0x24a   :  { %v392_v45 = vmul.f32 0.0078125, %v383_v44  ;;  %v403_v46 = vmul.f32 %v5237_v43, %v5237_v43 }
 0x24c   :  { %410 = vadd.xlane.f32.xlu1 %v403_v46  ;;  %v5242_v47 = vsub.f32 %v5218_v22, %v392_v45 }
 0x24d   :  { %v385_v48 = vpop.xlane.xlu1 %384 }
 0x24e   :  { %v393_v49 = vmul.f32 0.0078125, %v385_v48  ;;  %v404_v50 = vmul.f32 %v5242_v47, %v5242_v47 }
 0x250   :  { %412 = vadd.xlane.f32.xlu0 %v404_v50  ;;  %v5247_v51 = vsub.f32 %v5221_v26, %v393_v49 }
 0x251   :  { %v387_v52 = vpop.xlane.xlu0 %386 }
 0x252   :  { %v394_v53 = vmul.f32 0.0078125, %v387_v52  ;;  %v405_v54 = vmul.f32 %v5247_v51, %v5247_v51 }
 0x253   :  { %v389_v55 = vpop.xlane.xlu1 %388 }
 0x254   :  { %v395_v56 = vmul.f32 0.0078125, %v389_v55  ;;  %414 = vadd.xlane.f32.xlu1 %v405_v54  ;;  %v5252_v57 = vsub.f32 %v5224_v28, %v394_v53  ;;  %v3747_v53 = vld [vmem:[%s6119_s9] ss:$0 sm:$0xff] }
 0x256   :  { %v406_v60 = vmul.f32 %v5252_v57, %v5252_v57  ;;  %v5257_v61 = vsub.f32 %v5226_v31, %v395_v56 }
 0x258   :  { %416 = vadd.xlane.f32.xlu0 %v406_v60  ;;  %v407_v63 = vmul.f32 %v5257_v61, %v5257_v61 }
 0x25a   :  { %418 = vadd.xlane.f32.xlu1 %v407_v63 }
 0x2d5   :  { %v409_v21 = vpop.xlane.xlu0 %408 }
 0x2d6   :  { %v420_v23 = vmul.f32 0.0078125, %v409_v21 }
 0x2d8   :  { %v426_v24 = vadd.f32 1e-06, %v420_v23 }
 0x2d9   :  { %v411_v25 = vpop.xlane.xlu1 %410 }
 0x2da   :  { %4550 = vrsqrt.f32 %v426_v24  ;;  %v421_v27 = vmul.f32 0.0078125, %v411_v25 }
 0x2dc   :  { %v427_v29 = vadd.f32 1e-06, %v421_v27 }
 0x2dd   :  { %v413_v30 = vpop.xlane.xlu0 %412 }
 0x2de   :  { %4552 = vrsqrt.f32 %v427_v29  ;;  %v422_v32 = vmul.f32 0.0078125, %v413_v30 }
 0x2e0   :  { %v428_v33 = vadd.f32 1e-06, %v422_v32 }
 0x2e1   :  { %v415_v34 = vpop.xlane.xlu1 %414 }
 0x2e2   :  { %4554 = vrsqrt.f32 %v428_v33  ;;  %v423_v35 = vmul.f32 0.0078125, %v415_v34 }
 0x2e4   :  { %v4551_v36 = vpop.eup %4550  ;;  %v429_v37 = vadd.f32 1e-06, %v423_v35 }
 0x2e5   :  { %v417_v38 = vpop.xlane.xlu0 %416  ;;  %v438_v40 = vmul.f32 %v4551_v36, %v5232_v39 }
 0x2e6   :  { %4556 = vrsqrt.f32 %v429_v37  ;;  %v424_v41 = vmul.f32 0.0078125, %v417_v38 }
 0x2e7   :  { %v419_v44 = vpop.xlane.xlu1 %418  ;;  %v450_v50 = vmul.f32 %v3746_v42, %v438_v40 }
 0x2e8   :  { %v4553_v45 = vpop.eup %4552  ;;  %v430_v46 = vadd.f32 1e-06, %v424_v41  ;;  %v425_v48 = vmul.f32 0.0078125, %v419_v44 }
 0x2e9   :  { %v439_v49 = vmul.f32 %v4553_v45, %v5237_v43  ;;  %v462_v55 = vadd.f32 %v3747_v53, %v450_v50 }
 0x2ea   :  { %4558 = vrsqrt.f32 %v430_v46  ;;  %v431_v52 = vadd.f32 1e-06, %v425_v48 }
 0x2eb   :  { %v451_v39 = vmul.f32 %v3746_v42, %v439_v49 }
 0x2ec   :  { %v4555_v54 = vpop.eup %4554  ;;  %4560 = vrsqrt.f32 %v431_v52 }
 0x2ed   :  { %v463_v56 = vadd.f32 %v3747_v53, %v451_v39  ;;  %v440_v58 = vmul.f32 %v4555_v54, %v5242_v47 }
 0x2ef   :  { %v468_v59 = vpack.c.bf16 %v463_v56, %v462_v55  ;;  %v452_v62 = vmul.f32 %v3746_v42, %v440_v58 }
 0x2f0   :  { %v4557_v60 = vpop.eup %4556 }
 0x2f1   :  { %681 = vmatmul.mubr.bf16.vlgmr.msra.gmra.mrb[0].mxu1 %v468_v59  ;;  %4119 = vmatmul.mubr.bf16.vlgmr.msra.gmra.mrb[12].mxu0 %v468_v59  ;;  %v441_v43 = vmul.f32 %v4557_v60, %v5247_v51  ;;  %v464_v2 = vadd.f32 %v3747_v53, %v452_v62 }
 0x2f2   :  { %690 = vmatprep.mubr.bf16.mxu1 %v4939_v20  ;;  %4122 = vmatprep.mubr.msk.bf16.mxu0 %vm4938_vm0, %v4937_v0 }
 0x2f3   :  { %v453_v63 = vmul.f32 %v3746_v42, %v441_v43 }
 0x2f4   :  { %v4559_v1 = vpop.eup %4558 }
 0x2f5   :  { %v465_v3 = vadd.f32 %v3747_v53, %v453_v63  ;;  %v442_v4 = vmul.f32 %v4559_v1, %v5252_v57  ;;  %v5286_v57 = vshrl.u32 %v505_v11, 7 }
 0x2f6   :  { %v4561_v5 = vpop.eup %4560 }
 0x2f7   :  { %v469_v47 = vpack.c.bf16 %v465_v3, %v464_v2  ;;  %v443_v6 = vmul.f32 %v4561_v5, %v5257_v61  ;;  %v454_v7 = vmul.f32 %v3746_v42, %v442_v4  ;;  %v507_v12 = vsub.s32 0, %v5286_v57 }
 0x2f8   :  { %v515_v61 = vsub.s32 2, %v5286_v57  ;;  %v511_v15 = vsub.s32 1, %v5286_v57 }
 0x2f9   :  { %691 = vmatmul.mubr.bf16.gmra.mrb[4].mxu1 %v469_v47  ;;  %4123 = vmatmul.mubr.bf16.gmra.mrb[16].mxu0 %v469_v47  ;;  %v455_v51 = vmul.f32 %v3746_v42, %v443_v6  ;;  %v466_v9 = vadd.f32 %v3747_v53, %v454_v7  ;;  %v5296_v16 = vrot.slane %v503_v13, %v507_v12 }
 0x2fa   :  { %700 = vmatprep.mubr.bf16.mxu1 %v4939_v20  ;;  %4126 = vmatprep.mubr.msk.bf16.mxu0 %vm4938_vm0, %v4937_v0  ;;  %v5300_v17 = vrot.slane %v503_v13, %v515_v61  ;;  %v512_v23 = vrot.slane %v503_v13, %v511_v15 }
 0x2fb   :  { %v467_v8 = vadd.f32 %v3747_v53, %v455_v51 }
 0x2fd   :  { %v470_v10 = vpack.c.bf16 %v467_v8, %v466_v9 }
 0x301   :  { %701 = vmatmul.mubr.bf16.gmra.mrb[8].mxu1 %v470_v10  ;;  %4127 = vmatmul.mubr.bf16.gmra.mrb[20].mxu0 %v470_v10 }
 0x3c4   :  { %v682_v18 = vpop.f32.mrb[0].mxu1  ;;  %v745_v21 = vpop.f32.mrb[12].mxu0 }
 0x3c5   :  { %v684_v24 = vpop.f32.mrb[1].mxu1  ;;  %v4120_v25 = vpop.f32.mrb[13].mxu0  ;;  %v683_v30 = vadd.f32 %v682_v18, %v5296_v16  ;;  %v746_v32 = vadd.f32 %v745_v21, %v5300_v17 }
 0x3c6   :  { %v686_v27 = vpop.f32.mrb[2].mxu1  ;;  %v748_v29 = vpop.f32.mrb[14].mxu0  ;;  %v685_v37 = vadd.f32 %v684_v24, %v512_v23 }
 0x3c7   :  { %v687_v33 = vadd.f32 %v686_v27, %v5296_v16  ;;  %v749_v34 = vadd.f32 %v748_v29, %v5300_v17  ;;  %v688_v35 = vpop.f32.mrb[3].mxu1  ;;  %v4121_v36 = vpop.f32.mrb[15].mxu0 }
 0x3c8   :  { %v689_v38 = vadd.f32 %v688_v35, %v512_v23  ;;  %v5380_v35 = vld [vmem:[%s6121_s10] ss:$0 sm:$0xff] }
 0x3c9   :  { %v5308_v40 = vpack.c.bf16 %v687_v33, %v683_v30  ;;  %v5310_v41 = vpack.c.bf16 %v749_v34, %v746_v32 }
 0x3ca   :  { %v5312_v42 = vpack.c.bf16 %v689_v38, %v685_v37 }
 0x3cb   :  { %4134 = vmatprep.mubr.msk.bf16.mxu1 %vm794_vm1, %v5308_v40 }
 0x3cc   :  { %v692_v44 = vpop.f32.mrb[4].mxu1  ;;  %v753_v45 = vpop.f32.mrb[16].mxu0  ;;  %4374 = vmatprep.subr.msk.bf16.mxu1 %vm794_vm1, %v5312_v42  ;;  %v802_v46 = vsel %vm794_vm1, %v5312_v42, 0 }
 0x3cd   :  { %v694_v48 = vpop.f32.mrb[5].mxu1  ;;  %v4124_v49 = vpop.f32.mrb[17].mxu0  ;;  %4131 = vmatpush3.bf16.xpose.msra.mxu1 %v802_v46  ;;  %v693_v3 = vadd.f32 %v692_v44, %v5296_v16  ;;  %v754_v30 = vadd.f32 %v753_v45, %v5300_v17 }
 0x3ce   :  { %v695_v50 = vadd.f32 %v694_v48, %v512_v23  ;;  %v696_v52 = vpop.f32.mrb[6].mxu1  ;;  %v756_v53 = vpop.f32.mrb[18].mxu0 }
 0x3cf   :  { %v698_v39 = vpop.f32.mrb[7].mxu1  ;;  %v4125_v54 = vpop.f32.mrb[19].mxu0  ;;  %v697_v60 = vadd.f32 %v696_v52, %v5296_v16  ;;  %v757_v43 = vadd.f32 %v756_v53, %v5300_v17  ;;  %v5341_v21 = vpack.c.bf16 %v693_v3, %v693_v3  ;;  %v5367_v33 = vpack.c.bf16 %v754_v30, %v754_v30 }
 0x3d0   :  { %v5320_v55 = vpack.c.bf16 %v695_v50, %v695_v50  ;;  %v699_v4 = vadd.f32 %v698_v39, %v512_v23 }
 0x3d1   :  { %v1012_v34 = vsel %vm1010_vm2, %v5367_v33, 0 }
 0x3d2   :  { %4375 = vmatprep.subr.msk.bf16.mxu1 %vm794_vm1, %v5320_v55  ;;  %v805_v59 = vsel %vm794_vm1, %v5320_v55, 0 }
 0x3d4   :  { %v702_v56 = vpop.f32.mrb[8].mxu1  ;;  %v761_v58 = vpop.f32.mrb[20].mxu0 }
 0x3d5   :  { %v703_v62 = vadd.f32 %v702_v56, %v5296_v16  ;;  %v762_v63 = vadd.f32 %v761_v58, %v5300_v17  ;;  %v704_v1 = vpop.f32.mrb[9].mxu1  ;;  %v4128_v2 = vpop.f32.mrb[21].mxu0  ;;  %4133 = vmatpush3.bf16.xpose.msra.mxu1 %v805_v59 }
 0x3d6   :  { %v705_v5 = vadd.f32 %v704_v1, %v512_v23  ;;  %v706_v47 = vpop.f32.mrb[10].mxu1  ;;  %v764_v6 = vpop.f32.mrb[22].mxu0 }
 0x3d7   :  { %v5331_v7 = vpack.c.bf16 %v703_v62, %v697_v60  ;;  %v5333_v51 = vpack.c.bf16 %v762_v63, %v757_v43  ;;  %v765_v8 = vadd.f32 %v764_v6, %v5300_v17  ;;  %v708_v9 = vpop.f32.mrb[11].mxu1  ;;  %v4129_v10 = vpop.f32.mrb[23].mxu0  ;;  %v707_v29 = vadd.f32 %v706_v47, %v5296_v16 }
 0x3d8   :  { %v5336_v11 = vpack.c.bf16 %v705_v5, %v699_v4  ;;  %v709_v13 = vadd.f32 %v708_v9, %v512_v23 }
 0x3d9   :  { %v5338_v18 = vpack.c.bf16 %v765_v8, %v765_v8  ;;  %4154 = vmatprep.subr.bf16.mxu0 %v5333_v51  ;;  %v5365_v32 = vpack.c.bf16 %v707_v29, %v707_v29 }
 0x3da   :  { %4376 = vmatprep.subr.msk.bf16.mxu1 %vm794_vm1, %v5336_v11  ;;  %4155 = vmatpush3.bf16.msra.mxu0 %v5333_v51  ;;  %v5348_v24 = vpack.c.bf16 %v709_v13, %v709_v13  ;;  %v862_v23 = vsel %vm794_vm1, %v5336_v11, 0 }
 0x3db   :  { %4379 = vmatprep.subr.msk.bf16.mxu0 %vm1010_vm2, %v5338_v18  ;;  %v1069_v25 = vsel %vm1010_vm2, %v5338_v18, 0 }
 0x3dc   :  { %4135 = vmatmul.mubr.msk.bf16.vlgmr.msra.gmra.mrb[12].mxu1 %vm794_vm1, %v5341_v21  ;;  %v865_v27 = vsel %vm794_vm1, %v5348_v24, 0 }
 0x3dd   :  { %4139 = vmatpush3.bf16.xpose.msra.mxu1 %v862_v23  ;;  %4142 = vmatprep.mubr.msk.bf16.mxu1 %vm794_vm1, %v5331_v7 }
 0x3de   :  { %4377 = vmatprep.subr.msk.bf16.mxu1 %vm794_vm1, %v5348_v24  ;;  %4157 = vmatpush3.bf16.msra.mxu0 %v1069_v25 }
 0x3e5   :  { %4141 = vmatpush3.bf16.xpose.msra.mxu1 %v865_v27 }
 0x3e6   :  { %4146 = vmatprep.subr.bf16.mxu1 %v5310_v41 }
 0x3ec   :  { %4143 = vmatmul.mubr.msk.bf16.vlgmr.msra.gmra.mrb[16].mxu1 %vm794_vm1, %v5365_v32 }
 0x3ed   :  { %4147 = vmatpush3.bf16.msra.mxu1 %v5310_v41 }
 0x3ee   :  { %4378 = vmatprep.subr.msk.bf16.mxu1 %vm1010_vm2, %v5367_v33 }
 0x3f1   :  { %4149 = vmatpush3.bf16.msra.mxu1 %v1012_v34 }
 0x3f2   :  { %4162 = vmatprep.subr.bf16.mxu1 %v4937_v0 }
 0x4af   :  { %v4136_v16 = vpop.f32.mrb[12].mxu1 }
 0x4b0   :  { %v841_v17 = vpop.f32.mrb[13].mxu1  ;;  %v917_v36 = vmul.f32 0.17677669, %v4136_v16 }
 0x4b1   :  { %v915_v37 = vmul.f32 0.17677669, %v841_v17  ;;  %v4137_v38 = vpop.f32.mrb[14].mxu1 }
 0x4b2   :  { %v844_v44 = vpop.f32.mrb[15].mxu1  ;;  %v929_v50 = vadd.f32 %v5380_v35, %v917_v36 }
 0x4b3   :  { %v916_v45 = vmul.f32 0.17677669, %v844_v44  ;;  %v927_v46 = vadd.f32 %v5380_v35, %v915_v37 }
 0x4b4   :  { %v940_v53 = vsel %vm933_vm3, %v929_v50, -inf }
 0x4b5   :  { %v934_v48 = vsel %vm933_vm3, %v927_v46, -inf  ;;  %v928_v49 = vadd.f32 %v5380_v35, %v916_v45 }
 0x4b6   :  { %935 = vmax.xlane.f32.xlu0 %v934_v48 }
 0x4b7   :  { %v937_v52 = vsel %vm933_vm3, %v928_v49, -inf }
 0x4b8   :  { %938 = vmax.xlane.f32.xlu1 %v937_v52 }
 0x4ba   :  { %941 = vmax.xlane.f32.xlu0 %v940_v53 }
 0x4bf   :  { %v4144_v39 = vpop.f32.mrb[16].mxu1 }
 0x4c0   :  { %v901_v54 = vpop.f32.mrb[17].mxu1  ;;  %v920_v56 = vmul.f32 0.17677669, %v4144_v39 }
 0x4c1   :  { %v918_v58 = vmul.f32 0.17677669, %v901_v54  ;;  %v4145_v59 = vpop.f32.mrb[18].mxu1 }
 0x4c2   :  { %v904_v60 = vpop.f32.mrb[19].mxu1  ;;  %v932_v2 = vadd.f32 %v5380_v35, %v920_v56 }
 0x4c3   :  { %v919_v43 = vmul.f32 0.17677669, %v904_v60  ;;  %v930_v62 = vadd.f32 %v5380_v35, %v918_v58 }
 0x4c4   :  { %v949_v4 = vsel %vm933_vm3, %v932_v2, -inf }
 0x4c5   :  { %v943_v63 = vsel %vm933_vm3, %v930_v62, -inf  ;;  %v931_v1 = vadd.f32 %v5380_v35, %v919_v43 }
 0x4c6   :  { %944 = vmax.xlane.f32.xlu1 %v943_v63 }
 0x4c7   :  { %v946_v3 = vsel %vm933_vm3, %v931_v1, -inf }
 0x4c8   :  { %947 = vmax.xlane.f32.xlu0 %v946_v3 }
 0x4ca   :  { %950 = vmax.xlane.f32.xlu1 %v949_v4 }
 0x543   :  { %v936_v5 = vpop.xlane.xlu0 %935 }
 0x544   :  { %v952_v47 = vsub.f32 %v927_v46, %v936_v5 }
 0x545   :  { %v939_v6 = vpop.xlane.xlu1 %938 }
 0x546   :  { %v958_v8 = vmul.f32 1.442695, %v952_v47  ;;  %v953_v9 = vsub.f32 %v928_v49, %v939_v6  ;;  %v4462_v6 = vld [vmem:[#allocation10] sm:$0xff]  }
 0x547   :  { %v942_v10 = vpop.xlane.xlu0 %941 }
 0x548   :  { %4562 = vpow2.f32 %v958_v8  ;;  %v960_v13 = vmul.f32 1.442695, %v953_v9  ;;  %v954_v23 = vsub.f32 %v929_v50, %v942_v10 }
 0x54a   :  { %4564 = vpow2.f32 %v960_v13  ;;  %v962_v25 = vmul.f32 1.442695, %v954_v23  ;;  %v4463_v13 = vld [vmem:[#allocation10 + $0x8] sm:$0xff]  }
 0x54c   :  { %4566 = vpow2.f32 %v962_v25 }
 0x552   :  { %v4563_v27 = vpop.eup %4562 }
 0x553   :  { %v945_v29 = vpop.xlane.xlu1 %944  ;;  %v970_v30 = vsel %vm933_vm3, %v4563_v27, 0.0 }
 0x554   :  { %v4565_v34 = vpop.eup %4564  ;;  %v955_v16 = vsub.f32 %v930_v62, %v945_v29  ;;  %971 = vadd.xlane.f32.xlu0 %v970_v30 }
 0x555   :  { %v948_v17 = vpop.xlane.xlu0 %947  ;;  %v973_v36 = vsel %vm933_vm3, %v4565_v34, 0.0 }
 0x556   :  { %v4567_v37 = vpop.eup %4566  ;;  %v964_v38 = vmul.f32 1.442695, %v955_v16  ;;  %v956_v44 = vsub.f32 %v931_v1, %v948_v17  ;;  %974 = vadd.xlane.f32.xlu1 %v973_v36 }
 0x557   :  { %v951_v45 = vpop.xlane.xlu1 %950  ;;  %v976_v46 = vsel %vm933_vm3, %v4567_v37, 0.0 }
 0x558   :  { %4568 = vpow2.f32 %v964_v38  ;;  %v966_v48 = vmul.f32 1.442695, %v956_v44  ;;  %v957_v49 = vsub.f32 %v932_v2, %v951_v45  ;;  %977 = vadd.xlane.f32.xlu0 %v976_v46 }
 0x55a   :  { %4570 = vpow2.f32 %v966_v48  ;;  %v968_v50 = vmul.f32 1.442695, %v957_v49 }
 0x55c   :  { %4572 = vpow2.f32 %v968_v50 }
 0x562   :  { %v4569_v52 = vpop.eup %4568 }
 0x563   :  { %v979_v53 = vsel %vm933_vm3, %v4569_v52, 0.0 }
 0x564   :  { %v4571_v39 = vpop.eup %4570  ;;  %980 = vadd.xlane.f32.xlu1 %v979_v53 }
 0x565   :  { %v982_v54 = vsel %vm933_vm3, %v4571_v39, 0.0 }
 0x566   :  { %v4573_v56 = vpop.eup %4572  ;;  %983 = vadd.xlane.f32.xlu0 %v982_v54 }
 0x567   :  { %v985_v58 = vsel %vm933_vm3, %v4573_v56, 0.0 }
 0x568   :  { %986 = vadd.xlane.f32.xlu1 %v985_v58 }
 0x579   :  { %1220 = vrot.lane.b32.xlu1 %v5320_v55, %s4940_s23 }
 0x57c   :  { %1218 = vrot.lane.b32.xlu0 %v5312_v42, %s4940_s23 }
 0x57d   :  { %1290 = vrot.lane.b32.xlu1 %v5336_v11, %s4940_s23 }
 0x580   :  { %1214 = vrot.lane.b32.xlu0 %v5341_v21, %s4940_s23 }
 0x581   :  { %1212 = vrot.lane.b32.xlu1 %v5308_v40, %s4940_s23 }
 0x584   :  { %1284 = vrot.lane.b32.xlu0 %v5331_v7, %s4940_s23 }
 0x585   :  { %1292 = vrot.lane.b32.xlu1 %v5348_v24, %s4940_s23 }
 0x589   :  { %1286 = vrot.lane.b32.xlu1 %v5365_v32, %s4940_s23 }
 0x5e1   :  { %v972_v59 = vpop.xlane.xlu0 %971 }
 0x5e2   :  { %4574 = vrcp.f32 %v972_v59 }
 0x5e3   :  { %v975_v60 = vpop.xlane.xlu1 %974 }
 0x5e4   :  { %4576 = vrcp.f32 %v975_v60 }
 0x5e5   :  { %v978_v43 = vpop.xlane.xlu0 %977 }
 0x5e6   :  { %4578 = vrcp.f32 %v978_v43 }
 0x5ec   :  { %v4575_v62 = vpop.eup %4574 }
 0x5ed   :  { %v989_v1 = vmul.f32 %v4575_v62, %v4563_v27 }
 0x5ee   :  { %v4577_v63 = vpop.eup %4576 }
 0x5ef   :  { %v991_v2 = vmul.f32 %v4577_v63, %v4565_v34 }
 0x5f0   :  { %v4579_v3 = vpop.eup %4578 }
 0x5f1   :  { %v981_v4 = vpop.xlane.xlu1 %980  ;;  %v1000_v5 = vpack.c.bf16 %v991_v2, %v989_v1  ;;  %v993_v47 = vmul.f32 %v4579_v3, %v4567_v37 }
 0x5f2   :  { %4580 = vrcp.f32 %v981_v4 }
 0x5f3   :  { %4150 = vmatprep.mubr.msk.bf16.mxu1 %vm933_vm3, %v1000_v5  ;;  %v984_v8 = vpop.xlane.xlu0 %983  ;;  %v1001_v9 = vpack.c.bf16 %v993_v47, %v993_v47 }
 0x5f4   :  { %4582 = vrcp.f32 %v984_v8 }
 0x5f5   :  { %v987_v10 = vpop.xlane.xlu1 %986  ;;  %4151 = vmatmul.mubr.msk.bf16.vlgmr.msra.gmra.mrb[20].mxu1 %vm933_vm3, %v1001_v9 }
 0x5f6   :  { %4584 = vrcp.f32 %v987_v10  ;;  %4163 = vmatpush3.bf16.msra.mxu1 %v4462_v6  ;;  %4166 = vmatprep.mubr.msk.bf16.mxu1 %vm4938_vm0, %v4937_v0 }
 0x5f7   :  { %v1219_v23 = vpop.permute.xlu0 %1218  ;;  %4164 = vmatprep.subr.bf16.mxu1 %v4937_v0 }
 0x5f8   :  { %4380 = vmatprep.subr.msk.bf16.mxu0 %vm794_vm1, %v1219_v23  ;;  %v1229_v45 = vsel %vm794_vm1, %v1219_v23, 0 }
 0x5f9   :  { %v1221_v25 = vpop.permute.xlu1 %1220 }
 0x5fa   :  { %4165 = vmatpush3.bf16.msra.mxu1 %v4463_v13  ;;  %v1232_v46 = vsel %vm794_vm1, %v1221_v25, 0 }
 0x5fb   :  { %v1215_v48 = vpop.permute.xlu0 %1214 }
 0x5fc   :  { %v4581_v27 = vpop.eup %4580 }
 0x5fd   :  { %v1291_v29 = vpop.permute.xlu1 %1290  ;;  %v995_v34 = vmul.f32 %v4581_v27, %v4569_v52 }
 0x5fe   :  { %v4583_v30 = vpop.eup %4582  ;;  %4382 = vmatprep.subr.msk.bf16.mxu1 %vm794_vm1, %v1291_v29  ;;  %v1301_v54 = vsel %vm794_vm1, %v1291_v29, 0 }
 0x5ff   :  { %v997_v16 = vmul.f32 %v4583_v30, %v4571_v39  ;;  %v1285_v2 = vpop.permute.xlu0 %1284 }
 0x600   :  { %v4585_v17 = vpop.eup %4584 }
 0x601   :  { %v999_v36 = vmul.f32 %v4585_v17, %v4573_v56  ;;  %v1002_v37 = vpack.c.bf16 %v997_v16, %v995_v34  ;;  %v1213_v44 = vpop.permute.xlu1 %1212 }
 0x603   :  { %v1003_v38 = vpack.c.bf16 %v999_v36, %v999_v36  ;;  %4158 = vmatprep.mubr.msk.bf16.mxu0 %vm933_vm3, %v1002_v37 }
 0x605   :  { %4159 = vmatmul.mubr.msk.bf16.vlgmr.msra.gmra.mrb[24].mxu0 %vm933_vm3, %v1003_v38  ;;  %v1293_v56 = vpop.permute.xlu1 %1292 }
 0x606   :  { %4179 = vmatpush3.bf16.xpose.msra.mxu0 %v1229_v45  ;;  %4182 = vmatprep.mubr.msk.bf16.mxu0 %vm794_vm1, %v1213_v44  ;;  %v1304_v58 = vsel %vm794_vm1, %v1293_v56, 0 }
 0x607   :  { %4381 = vmatprep.subr.msk.bf16.mxu0 %vm794_vm1, %v1221_v25 }
 0x609   :  { %v1287_v8 = vpop.permute.xlu1 %1286 }
 0x60e   :  { %4181 = vmatpush3.bf16.xpose.msra.mxu0 %v1232_v46 }
 0x615   :  { %4183 = vmatmul.mubr.msk.bf16.vlgmr.msra.gmra.mrb[28].mxu0 %vm794_vm1, %v1215_v48 }
 0x6c8   :  { %v4152_v49 = vpop.f32.mrb[20].mxu1 }
 0x6c9   :  { %v1048_v50 = vpop.f32.mrb[21].mxu1 }
 0x6ca   :  { %v4153_v52 = vpop.f32.mrb[22].mxu1 }
 0x6cb   :  { %v1051_v53 = vpop.f32.mrb[23].mxu1 }
 0x6cc   :  { %v1119_v39 = vpack.c.bf16 %v1051_v53, %v1048_v50 }
 0x6ce   :  { %4167 = vmatmul.mubr.msk.bf16.vlgmr.msra.gmra.mrb[24].mxu1 %vm794_vm1, %v1119_v39 }
 0x6cf   :  { %4187 = vmatpush3.bf16.xpose.msra.mxu1 %v1301_v54  ;;  %4170 = vmatprep.mubr.msk.bf16.mxu1 %vm4938_vm0, %v4937_v0 }
 0x6d0   :  { %4383 = vmatprep.subr.msk.bf16.mxu1 %vm794_vm1, %v1293_v56 }
 0x6d7   :  { %4189 = vmatpush3.bf16.xpose.msra.mxu1 %v1304_v58 }
 0x6d8   :  { %v4160_v59 = vpop.f32.mrb[24].mxu0  ;;  %4210 = vmatprep.subr.bf16.mxu1 %v4937_v0 }
 0x6d9   :  { %v1105_v60 = vpop.f32.mrb[25].mxu0 }
 0x6da   :  { %v1120_v43 = vpack.c.bf16 %v1105_v60, %v4152_v49  ;;  %v4161_v62 = vpop.f32.mrb[26].mxu0 }
 0x6db   :  { %v1108_v63 = vpop.f32.mrb[27].mxu0 }
 0x6dc   :  { %v1121_v1 = vpack.c.bf16 %v4160_v59, %v1108_v63  ;;  %4171 = vmatmul.mubr.msk.bf16.gmra.mrb[28].mxu1 %vm794_vm1, %v1120_v43 }
 0x6dd   :  { %4174 = vmatprep.mubr.msk.bf16.mxu1 %vm4938_vm0, %v4937_v0 }
 0x6e4   :  { %4175 = vmatmul.mubr.msk.bf16.gmra.mrb[32].mxu1 %vm794_vm1, %v1121_v1 }
 0x6e5   :  { %4190 = vmatprep.mubr.msk.bf16.mxu1 %vm794_vm1, %v1285_v2 }
 0x6e8   :  { %v4184_v3 = vpop.f32.mrb[28].mxu0 }
 0x6e9   :  { %v1268_v4 = vpop.f32.mrb[29].mxu0  ;;  %v1356_v5 = vmul.f32 0.17677669, %v4184_v3 }
 0x6ea   :  { %v1354_v47 = vmul.f32 0.17677669, %v1268_v4  ;;  %v4185_v6 = vpop.f32.mrb[30].mxu0 }
 0x6eb   :  { %v1271_v9 = vpop.f32.mrb[31].mxu0  ;;  %v1362_v27 = vadd.f32 %v5380_v35, %v1356_v5 }
 0x6ec   :  { %v1355_v10 = vmul.f32 0.17677669, %v1271_v9  ;;  %4191 = vmatmul.mubr.msk.bf16.vlgmr.msra.gmra.mrb[36].mxu1 %vm794_vm1, %v1287_v8  ;;  %v1360_v13 = vadd.f32 %v5380_v35, %v1354_v47 }
 0x6ed   :  { %4214 = vmatprep.mubr.msk.bf16.mxu1 %vm4938_vm0, %v4937_v0  ;;  %v1372_v30 = vsel %vm933_vm3, %v1362_v27, -inf }
 0x6ee   :  { %v1366_v23 = vsel %vm933_vm3, %v1360_v13, -inf  ;;  %v1361_v25 = vadd.f32 %v5380_v35, %v1355_v10 }
 0x6ef   :  { %1367 = vmax.xlane.f32.xlu0 %v1366_v23 }
 0x6f0   :  { %v1369_v29 = vsel %vm933_vm3, %v1361_v25, -inf }
 0x6f1   :  { %1370 = vmax.xlane.f32.xlu1 %v1369_v29 }
 0x6f3   :  { %1373 = vmax.xlane.f32.xlu0 %v1372_v30 }
 0x77c   :  { %v1368_v16 = vpop.xlane.xlu0 %1367 }
 0x77d   :  { %v1384_v37 = vsub.f32 %v1360_v13, %v1368_v16 }
 0x77e   :  { %v1371_v34 = vpop.xlane.xlu1 %1370 }
 0x77f   :  { %v1385_v17 = vsub.f32 %v1361_v25, %v1371_v34  ;;  %v1390_v44 = vmul.f32 1.442695, %v1384_v37 }
 0x780   :  { %v1374_v38 = vpop.xlane.xlu0 %1373 }
 0x781   :  { %v1392_v36 = vmul.f32 1.442695, %v1385_v17  ;;  %v1386_v45 = vsub.f32 %v1362_v27, %v1374_v38 }
 0x783   :  { %4586 = vpow2.f32 %v1392_v36  ;;  %v1394_v48 = vmul.f32 1.442695, %v1386_v45 }
 0x784   :  { %4588 = vpow2.f32 %v1390_v44 }
 0x785   :  { %4590 = vpow2.f32 %v1394_v48 }
 0x78d   :  { %v4587_v60 = vpop.eup %4586 }
 0x78e   :  { %v1405_v63 = vsel %vm933_vm3, %v4587_v60, 0.0  ;;  %v4589_v2 = vpop.eup %4588 }
 0x78f   :  { %v1402_v3 = vsel %vm933_vm3, %v4589_v2, 0.0  ;;  %v5459_v4 = vpop.eup %4590 }
 0x790   :  { %v1408_v5 = vsel %vm933_vm3, %v5459_v4, 0.0 }
 0x7bf   :  { %v4192_v46 = vpop.f32.mrb[36].mxu1 }
 0x7c0   :  { %v1359_v49 = vmul.f32 0.17677669, %v4192_v46  ;;  %v1340_v50 = vpop.f32.mrb[37].mxu1 }
 0x7c1   :  { %v1357_v52 = vmul.f32 0.17677669, %v1340_v50  ;;  %v4193_v53 = vpop.f32.mrb[38].mxu1  ;;  %v4464_v50 = vld [vmem:[#allocation10 + $0x10] sm:$0xff]  }
 0x7c2   :  { %v1343_v39 = vpop.f32.mrb[39].mxu1  ;;  %v1365_v54 = vadd.f32 %v5380_v35, %v1359_v49  ;;  %4211 = vmatpush3.bf16.msra.mxu1 %v4464_v50 }
 0x7c3   :  { %v1358_v56 = vmul.f32 0.17677669, %v1343_v39  ;;  %v1363_v58 = vadd.f32 %v5380_v35, %v1357_v52  ;;  %4212 = vmatprep.subr.bf16.mxu1 %v4937_v0  ;;  %v4465_v52 = vld [vmem:[#allocation10 + $0x18] sm:$0xff]  }
 0x7c4   :  { %v1381_v59 = vsel %vm933_vm3, %v1365_v54, -inf }
 0x7c5   :  { %1382 = vmax.xlane.f32.xlu1 %v1381_v59  ;;  %v1375_v43 = vsel %vm933_vm3, %v1363_v58, -inf  ;;  %v1364_v62 = vadd.f32 %v5380_v35, %v1358_v56 }
 0x7c6   :  { %1376 = vmax.xlane.f32.xlu0 %v1375_v43  ;;  %4213 = vmatpush3.bf16.msra.mxu1 %v4465_v52 }
 0x7c7   :  { %v1378_v1 = vsel %vm933_vm3, %v1364_v62, -inf }
 0x7c9   :  { %1406 = vadd.xlane.f32.xlu1 %v1405_v63 }
 0x7ca   :  { %1379 = vmax.xlane.f32.xlu0 %v1378_v1 }
 0x7ce   :  { %1403 = vadd.xlane.f32.xlu0 %v1402_v3 }
 0x7d2   :  { %1409 = vadd.xlane.f32.xlu0 %v1408_v5 }
 0x852   :  { %v1383_v47 = vpop.xlane.xlu1 %1382 }
 0x853   :  { %v1389_v6 = vsub.f32 %v1365_v54, %v1383_v47  ;;  %v1377_v8 = vpop.xlane.xlu0 %1376 }
 0x854   :  { %v1387_v9 = vsub.f32 %v1363_v58, %v1377_v8 }
 0x855   :  { %v1400_v10 = vmul.f32 1.442695, %v1389_v6 }
 0x856   :  { %v1396_v13 = vmul.f32 1.442695, %v1387_v9  ;;  %v1407_v25 = vpop.xlane.xlu1 %1406 }
 0x857   :  { %4592 = vpow2.f32 %v1400_v10  ;;  %v1380_v23 = vpop.xlane.xlu0 %1379 }
 0x858   :  { %v1388_v27 = vsub.f32 %v1364_v62, %v1380_v23  ;;  %4594 = vpow2.f32 %v1396_v13 }
 0x859   :  { %4596 = vrcp.f32 %v1407_v25 }
 0x85a   :  { %v1398_v29 = vmul.f32 1.442695, %v1388_v27 }
 0x85b   :  { %v1404_v30 = vpop.xlane.xlu0 %1403 }
 0x85c   :  { %4598 = vpow2.f32 %v1398_v29 }
 0x85d   :  { %4600 = vrcp.f32 %v1404_v30 }
 0x85f   :  { %v1410_v53 = vpop.xlane.xlu0 %1409 }
 0x860   :  { %4602 = vrcp.f32 %v1410_v53 }
 0x861   :  { %v5463_v34 = vpop.eup %4592 }
 0x862   :  { %v1417_v16 = vsel %vm933_vm3, %v5463_v34, 0.0  ;;  %v4595_v17 = vpop.eup %4594 }
 0x863   :  { %1418 = vadd.xlane.f32.xlu1 %v1417_v16  ;;  %v4597_v36 = vpop.eup %4596  ;;  %v1411_v38 = vsel %vm933_vm3, %v4595_v17, 0.0 }
 0x864   :  { %v1423_v48 = vmul.f32 %v4597_v36, %v4587_v60 }
 0x866   :  { %v4599_v37 = vpop.eup %4598 }
 0x867   :  { %v4601_v44 = vpop.eup %4600  ;;  %1412 = vadd.xlane.f32.xlu1 %v1411_v38  ;;  %v1414_v45 = vsel %vm933_vm3, %v4599_v37, 0.0 }
 0x868   :  { %1415 = vadd.xlane.f32.xlu0 %v1414_v45  ;;  %v1421_v46 = vmul.f32 %v4601_v44, %v4589_v2 }
 0x86a   :  { %v1432_v49 = vpack.c.bf16 %v1423_v48, %v1421_v46  ;;  %v4603_v59 = vpop.eup %4602 }
 0x86b   :  { %v1425_v43 = vmul.f32 %v4603_v59, %v5459_v4 }
 0x86c   :  { %4198 = vmatprep.mubr.msk.bf16.mxu0 %vm933_vm3, %v1432_v49 }
 0x86d   :  { %v1433_v47 = vpack.c.bf16 %v1425_v43, %v1425_v43 }
 0x878   :  { %1440 = vrot.lane.b32.xlu1 %v5367_v33, %s4940_s23 }
 0x87c   :  { %1502 = vrot.lane.b32.xlu1 %v5333_v51, %s4940_s23 }
 0x87e   :  { %1438 = vrot.lane.b32.xlu0 %v5310_v41, %s4940_s23 }
 0x880   :  { %1504 = vrot.lane.b32.xlu1 %v5338_v18, %s4940_s23  ;;  %s6123_s23 = sld [smem:[#allocation32_spill]] }
 0x882   :  { %1659 = vrot.lane.b32.xlu0 %v5312_v42, %s6114_s26 }
 0x884   :  { %1661 = vrot.lane.b32.xlu1 %v5320_v55, %s6114_s26 }
 0x886   :  { %1727 = vrot.lane.b32.xlu0 %v5336_v11, %s6114_s26 }
 0x888   :  { %1655 = vrot.lane.b32.xlu1 %v5308_v40, %s6114_s26 }
 0x88a   :  { %1657 = vrot.lane.b32.xlu0 %v5341_v21, %s6114_s26 }
 0x88c   :  { %1729 = vrot.lane.b32.xlu1 %v5348_v24, %s6114_s26 }
 0x88e   :  { %1723 = vrot.lane.b32.xlu0 %v5331_v7, %s6114_s26 }
 0x890   :  { %1725 = vrot.lane.b32.xlu1 %v5365_v32, %s6114_s26 }
 0x8f0   :  { %v1419_v39 = vpop.xlane.xlu1 %1418 }
 0x8f4   :  { %v1413_v54 = vpop.xlane.xlu1 %1412 }
 0x8f5   :  { %4604 = vrcp.f32 %v1413_v54  ;;  %v1416_v56 = vpop.xlane.xlu0 %1415 }
 0x8f6   :  { %4606 = vrcp.f32 %v1416_v56 }
 0x8f7   :  { %4608 = vrcp.f32 %v1419_v39 }
 0x8f8   :  { %v1441_v58 = vpop.permute.xlu1 %1440 }
 0x8f9   :  { %v1439_v60 = vpop.permute.xlu0 %1438  ;;  %v1450_v1 = vsel %vm1010_vm2, %v1441_v58, 0 }
 0x8fa   :  { %4194 = vmatprep.subr.bf16.mxu0 %v1439_v60 }
 0x8fb   :  { %4195 = vmatpush3.bf16.msra.mxu0 %v1439_v60 }
 0x8fc   :  { %v1503_v62 = vpop.permute.xlu1 %1502  ;;  %4384 = vmatprep.subr.msk.bf16.mxu0 %vm1010_vm2, %v1441_v58 }
 0x8fd   :  { %v1660_v63 = vpop.permute.xlu0 %1659 }
 0x8fe   :  { %v1670_v30 = vsel %vm794_vm1, %v1660_v63, 0 }
 0x8ff   :  { %v4605_v2 = vpop.eup %4604  ;;  %4197 = vmatpush3.bf16.msra.mxu0 %v1450_v1 }
 0x900   :  { %v4607_v3 = vpop.eup %4606  ;;  %v1505_v5 = vpop.permute.xlu1 %1504  ;;  %4202 = vmatprep.subr.bf16.mxu0 %v1503_v62  ;;  %v1427_v6 = vmul.f32 %v4605_v2, %v4595_v17 }
 0x901   :  { %v4609_v8 = vpop.eup %4608  ;;  %v1728_v9 = vpop.permute.xlu0 %1727  ;;  %v1429_v10 = vmul.f32 %v4607_v3, %v4599_v37  ;;  %v1514_v25 = vsel %vm1010_vm2, %v1505_v5, 0 }
 0x902   :  { %4199 = vmatmul.mubr.msk.bf16.vlgmr.msra.gmra.mrb[32].mxu0 %vm933_vm3, %v1433_v47  ;;  %4388 = vmatprep.subr.msk.bf16.mxu1 %vm794_vm1, %v1728_v9  ;;  %v1431_v13 = vmul.f32 %v4609_v8, %v5463_v34  ;;  %v1738_v45 = vsel %vm794_vm1, %v1728_v9, 0 }
 0x903   :  { %4203 = vmatpush3.bf16.msra.mxu0 %v1503_v62  ;;  %v1434_v4 = vpack.c.bf16 %v1429_v10, %v1427_v6 }
 0x904   :  { %v1662_v23 = vpop.permute.xlu1 %1661  ;;  %4385 = vmatprep.subr.msk.bf16.mxu0 %vm1010_vm2, %v1505_v5  ;;  %v1435_v27 = vpack.c.bf16 %v1431_v13, %v1431_v13 }
 0x905   :  { %4206 = vmatprep.mubr.msk.bf16.mxu0 %vm933_vm3, %v1434_v4  ;;  %v1673_v34 = vsel %vm794_vm1, %v1662_v23, 0  ;;  %v1658_v16 = vpop.permute.xlu0 %1657 }
 0x907   :  { %4205 = vmatpush3.bf16.msra.mxu0 %v1514_v25 }
 0x908   :  { %4386 = vmatprep.subr.msk.bf16.mxu0 %vm794_vm1, %v1660_v63  ;;  %v1656_v29 = vpop.permute.xlu1 %1655 }
 0x909   :  { %v1724_v56 = vpop.permute.xlu0 %1723 }
 0x90a   :  { %4207 = vmatmul.mubr.msk.bf16.vlgmr.msra.gmra.mrb[36].mxu0 %vm933_vm3, %v1435_v27 }
 0x90b   :  { %4230 = vmatprep.mubr.msk.bf16.mxu0 %vm794_vm1, %v1656_v29 }
 0x90c   :  { %v1730_v46 = vpop.permute.xlu1 %1729 }
 0x90d   :  { %v1741_v54 = vsel %vm794_vm1, %v1730_v46, 0 }
 0x910   :  { %4227 = vmatpush3.bf16.xpose.msra.mxu0 %v1670_v30  ;;  %v1726_v58 = vpop.permute.xlu1 %1725 }
 0x911   :  { %4387 = vmatprep.subr.msk.bf16.mxu0 %vm794_vm1, %v1662_v23 }
 0x918   :  { %4229 = vmatpush3.bf16.xpose.msra.mxu0 %v1673_v34 }
 0x91f   :  { %4231 = vmatmul.mubr.msk.bf16.vlgmr.msra.gmra.mrb[40].mxu0 %vm794_vm1, %v1658_v16 }
 0x9d5   :  { %v4200_v17 = vpop.f32.mrb[32].mxu0 }
 0x9d6   :  { %v1486_v36 = vpop.f32.mrb[33].mxu0 }
 0x9d7   :  { %v4201_v37 = vpop.f32.mrb[34].mxu0 }
 0x9d8   :  { %v1489_v38 = vpop.f32.mrb[35].mxu0 }
 0x9d9   :  { %v1564_v44 = vpack.c.bf16 %v1489_v38, %v1486_v36 }
 0x9db   :  { %4215 = vmatmul.mubr.msk.bf16.vlgmr.msra.gmra.mrb[24].mxu1 %vm794_vm1, %v1564_v44 }
 0x9dc   :  { %4235 = vmatpush3.bf16.xpose.msra.mxu1 %v1738_v45  ;;  %4218 = vmatprep.mubr.msk.bf16.mxu1 %vm4938_vm0, %v4937_v0 }
 0x9dd   :  { %4389 = vmatprep.subr.msk.bf16.mxu1 %vm794_vm1, %v1730_v46  ;;  %v4208_v48 = vpop.f32.mrb[36].mxu0 }
 0x9de   :  { %v1550_v49 = vpop.f32.mrb[37].mxu0 }
 0x9df   :  { %v1565_v50 = vpack.c.bf16 %v1550_v49, %v4200_v17  ;;  %v4209_v52 = vpop.f32.mrb[38].mxu0 }
 0x9e0   :  { %v1553_v53 = vpop.f32.mrb[39].mxu0 }
 0x9e1   :  { %v1566_v39 = vpack.c.bf16 %v4208_v48, %v1553_v53 }
 0x9e3   :  { %4219 = vmatmul.mubr.msk.bf16.gmra.mrb[28].mxu1 %vm794_vm1, %v1565_v50 }
 0x9e4   :  { %4237 = vmatpush3.bf16.xpose.msra.mxu1 %v1741_v54  ;;  %4222 = vmatprep.mubr.msk.bf16.mxu1 %vm4938_vm0, %v4937_v0 }
 0x9e5   :  { %4258 = vmatprep.subr.bf16.mxu1 %v4937_v0 }
 0x9eb   :  { %4223 = vmatmul.mubr.msk.bf16.gmra.mrb[32].mxu1 %vm794_vm1, %v1566_v39 }
 0x9ec   :  { %4238 = vmatprep.mubr.msk.bf16.mxu1 %vm794_vm1, %v1724_v56 }
 0x9f2   :  { %v4232_v59 = vpop.f32.mrb[40].mxu0 }
 0x9f3   :  { %v1709_v60 = vpop.f32.mrb[41].mxu0  ;;  %4239 = vmatmul.mubr.msk.bf16.vlgmr.msra.gmra.mrb[40].mxu1 %vm794_vm1, %v1726_v58  ;;  %v1793_v43 = vmul.f32 0.17677669, %v4232_v59 }
 0x9f4   :  { %v1791_v62 = vmul.f32 0.17677669, %v1709_v60  ;;  %v4233_v63 = vpop.f32.mrb[42].mxu0  ;;  %4262 = vmatprep.mubr.msk.bf16.mxu1 %vm4938_vm0, %v4937_v0 }
 0x9f5   :  { %v1712_v1 = vpop.f32.mrb[43].mxu0  ;;  %v1799_v6 = vadd.f32 %v5380_v35, %v1793_v43 }
 0x9f6   :  { %v1792_v2 = vmul.f32 0.17677669, %v1712_v1  ;;  %v1797_v3 = vadd.f32 %v5380_v35, %v1791_v62 }
 0x9f7   :  { %v1809_v9 = vsel %vm933_vm3, %v1799_v6, -inf }
 0x9f8   :  { %v1803_v5 = vsel %vm933_vm3, %v1797_v3, -inf  ;;  %v1798_v47 = vadd.f32 %v5380_v35, %v1792_v2 }
 0x9f9   :  { %1804 = vmax.xlane.f32.xlu0 %v1803_v5 }
 0x9fa   :  { %v1806_v8 = vsel %vm933_vm3, %v1798_v47, -inf }
 0x9fb   :  { %1807 = vmax.xlane.f32.xlu1 %v1806_v8 }
 0x9fd   :  { %1810 = vmax.xlane.f32.xlu0 %v1809_v9 }
 0xa86   :  { %v1805_v4 = vpop.xlane.xlu0 %1804 }
 0xa87   :  { %v1821_v25 = vsub.f32 %v1797_v3, %v1805_v4 }
 0xa88   :  { %v1808_v10 = vpop.xlane.xlu1 %1807 }
 0xa89   :  { %v1822_v13 = vsub.f32 %v1798_v47, %v1808_v10  ;;  %v1827_v29 = vmul.f32 1.442695, %v1821_v25 }
 0xa8a   :  { %v1811_v27 = vpop.xlane.xlu0 %1810 }
 0xa8b   :  { %v1829_v23 = vmul.f32 1.442695, %v1822_v13  ;;  %v1823_v30 = vsub.f32 %v1799_v6, %v1811_v27 }
 0xa8d   :  { %4610 = vpow2.f32 %v1829_v23  ;;  %v1831_v16 = vmul.f32 1.442695, %v1823_v30 }
 0xa8e   :  { %4612 = vpow2.f32 %v1827_v29 }
 0xa8f   :  { %4614 = vpow2.f32 %v1831_v16 }
 0xa97   :  { %v4611_v50 = vpop.eup %4610 }
 0xa98   :  { %v1842_v39 = vsel %vm933_vm3, %v4611_v50, 0.0  ;;  %v4613_v56 = vpop.eup %4612 }
 0xa99   :  { %v1839_v58 = vsel %vm933_vm3, %v4613_v56, 0.0  ;;  %v5540_v59 = vpop.eup %4614 }
 0xa9a   :  { %v1845_v60 = vsel %vm933_vm3, %v5540_v59, 0.0 }
 0xac6   :  { %v4240_v34 = vpop.f32.mrb[40].mxu1 }
 0xac7   :  { %v1796_v17 = vmul.f32 0.17677669, %v4240_v34  ;;  %v1777_v36 = vpop.f32.mrb[41].mxu1 }
 0xac8   :  { %v1794_v37 = vmul.f32 0.17677669, %v1777_v36  ;;  %v4241_v38 = vpop.f32.mrb[42].mxu1  ;;  %v4467_v36 = vld [vmem:[#allocation10 + $0x28] sm:$0xff]  }
 0xac9   :  { %v1780_v44 = vpop.f32.mrb[43].mxu1  ;;  %v1802_v45 = vadd.f32 %v5380_v35, %v1796_v17  ;;  %v4466_v17 = vld [vmem:[#allocation10 + $0x20] sm:$0xff]  }
 0xaca   :  { %v1795_v46 = vmul.f32 0.17677669, %v1780_v44  ;;  %v1800_v48 = vadd.f32 %v5380_v35, %v1794_v37  ;;  %4259 = vmatpush3.bf16.msra.mxu1 %v4466_v17 }
 0xacb   :  { %v1818_v49 = vsel %vm933_vm3, %v1802_v45, -inf  ;;  %4260 = vmatprep.subr.bf16.mxu1 %v4937_v0 }
 0xacc   :  { %1819 = vmax.xlane.f32.xlu1 %v1818_v49  ;;  %v1812_v52 = vsel %vm933_vm3, %v1800_v48, -inf  ;;  %v1801_v53 = vadd.f32 %v5380_v35, %v1795_v46 }
 0xacd   :  { %1813 = vmax.xlane.f32.xlu0 %v1812_v52 }
 0xace   :  { %v1815_v54 = vsel %vm933_vm3, %v1801_v53, -inf  ;;  %4261 = vmatpush3.bf16.msra.mxu1 %v4467_v36 }
 0xad0   :  { %1843 = vadd.xlane.f32.xlu1 %v1842_v39 }
 0xad1   :  { %1816 = vmax.xlane.f32.xlu0 %v1815_v54 }
 0xad5   :  { %1840 = vadd.xlane.f32.xlu0 %v1839_v58 }
 0xad9   :  { %1846 = vadd.xlane.f32.xlu0 %v1845_v60 }
 0xb59   :  { %v1820_v43 = vpop.xlane.xlu1 %1819 }
 0xb5a   :  { %v1826_v62 = vsub.f32 %v1802_v45, %v1820_v43  ;;  %v1814_v35 = vpop.xlane.xlu0 %1813 }
 0xb5b   :  { %v1824_v63 = vsub.f32 %v1800_v48, %v1814_v35 }
 0xb5c   :  { %v1837_v1 = vmul.f32 1.442695, %v1826_v62 }
 0xb5d   :  { %v1833_v2 = vmul.f32 1.442695, %v1824_v63  ;;  %v1844_v5 = vpop.xlane.xlu1 %1843 }
 0xb5e   :  { %4616 = vpow2.f32 %v1837_v1  ;;  %v1817_v3 = vpop.xlane.xlu0 %1816 }
 0xb5f   :  { %v1825_v47 = vsub.f32 %v1801_v53, %v1817_v3  ;;  %4618 = vpow2.f32 %v1833_v2 }
 0xb60   :  { %4620 = vrcp.f32 %v1844_v5 }
 0xb61   :  { %v1835_v6 = vmul.f32 1.442695, %v1825_v47 }
 0xb62   :  { %v1841_v8 = vpop.xlane.xlu0 %1840 }
 0xb63   :  { %4622 = vpow2.f32 %v1835_v6 }
 0xb64   :  { %4624 = vrcp.f32 %v1841_v8 }
 0xb68   :  { %v5544_v9 = vpop.eup %4616 }
 0xb69   :  { %v1854_v10 = vsel %vm933_vm3, %v5544_v9, 0.0  ;;  %v4619_v4 = vpop.eup %4618 }
 0xb6a   :  { %1855 = vadd.xlane.f32.xlu1 %v1854_v10  ;;  %v4621_v13 = vpop.eup %4620  ;;  %v1848_v25 = vsel %vm933_vm3, %v4619_v4, 0.0 }
 0xb6b   :  { %v1860_v34 = vmul.f32 %v4621_v13, %v4611_v50 }
 0xb6d   :  { %v4623_v23 = vpop.eup %4622 }
 0xb6e   :  { %v4625_v27 = vpop.eup %4624  ;;  %1849 = vadd.xlane.f32.xlu1 %v1848_v25  ;;  %v1851_v29 = vsel %vm933_vm3, %v4623_v23, 0.0 }
 0xb6f   :  { %1852 = vadd.xlane.f32.xlu0 %v1851_v29  ;;  %v1858_v30 = vmul.f32 %v4625_v27, %v4613_v56 }
 0xb71   :  { %v1869_v16 = vpack.c.bf16 %v1860_v34, %v1858_v30 }
 0xb73   :  { %4246 = vmatprep.mubr.msk.bf16.mxu0 %vm933_vm3, %v1869_v16 }
 0xb7f   :  { %1875 = vrot.lane.b32.xlu1 %v5367_v33, %s6114_s26 }
 0xb83   :  { %1935 = vrot.lane.b32.xlu1 %v5333_v51, %s6114_s26 }
 0xb85   :  { %1873 = vrot.lane.b32.xlu0 %v5310_v41, %s6114_s26 }
 0xb87   :  { %1937 = vrot.lane.b32.xlu1 %v5338_v18, %s6114_s26 }
 0xb89   :  { %2092 = vrot.lane.b32.xlu0 %v5312_v42, %s4941_s6  ;;  %v1847_v42 = vpop.xlane.xlu0 %1846 }
 0xb8a   :  { %4626 = vrcp.f32 %v1847_v42 }
 0xb8b   :  { %2094 = vrot.lane.b32.xlu1 %v5320_v55, %s4941_s6 }
 0xb8d   :  { %2160 = vrot.lane.b32.xlu0 %v5336_v11, %s4941_s6 }
 0xb8f   :  { %2088 = vrot.lane.b32.xlu1 %v5308_v40, %s4941_s6 }
 0xb91   :  { %2090 = vrot.lane.b32.xlu0 %v5341_v21, %s4941_s6 }
 0xb93   :  { %2162 = vrot.lane.b32.xlu1 %v5348_v24, %s4941_s6 }
 0xb94   :  { %v4627_v38 = vpop.eup %4626 }
 0xb95   :  { %2156 = vrot.lane.b32.xlu0 %v5331_v7, %s4941_s6  ;;  %v1862_v24 = vmul.f32 %v4627_v38, %v5540_v59 }
 0xb97   :  { %2158 = vrot.lane.b32.xlu1 %v5365_v32, %s4941_s6  ;;  %v1870_v49 = vpack.c.bf16 %v1862_v24, %v1862_v24 }
 0xbf7   :  { %v1856_v55 = vpop.xlane.xlu1 %1855 }
 0xbfb   :  { %v1850_v37 = vpop.xlane.xlu1 %1849 }
 0xbfc   :  { %4628 = vrcp.f32 %v1850_v37  ;;  %v1853_v11 = vpop.xlane.xlu0 %1852 }
 0xbfd   :  { %4630 = vrcp.f32 %v1853_v11  ;;  %v4734_v11 = vld [vmem:[%s6121_s10] ss:$0 sm:$0xff] }
 0xbfe   :  { %4632 = vrcp.f32 %v1856_v55 }
 0xbff   :  { %v1876_v40 = vpop.permute.xlu1 %1875 }
 0xc00   :  { %v1874_v21 = vpop.permute.xlu0 %1873  ;;  %v1885_v32 = vsel %vm1010_vm2, %v1876_v40, 0 }
 0xc01   :  { %4242 = vmatprep.subr.bf16.mxu0 %v1874_v21 }
 0xc02   :  { %4243 = vmatpush3.bf16.msra.mxu0 %v1874_v21 }
 0xc03   :  { %v1936_v44 = vpop.permute.xlu1 %1935  ;;  %4390 = vmatprep.subr.msk.bf16.mxu0 %vm1010_vm2, %v1876_v40 }
 0xc04   :  { %v2093_v7 = vpop.permute.xlu0 %2092 }
 0xc05   :  { %v2103_v62 = vsel %vm794_vm1, %v2093_v7, 0 }
 0xc06   :  { %v4629_v45 = vpop.eup %4628  ;;  %4245 = vmatpush3.bf16.msra.mxu0 %v1885_v32 }
 0xc07   :  { %v4631_v46 = vpop.eup %4630  ;;  %v1938_v48 = vpop.permute.xlu1 %1937  ;;  %4250 = vmatprep.subr.bf16.mxu0 %v1936_v44  ;;  %v1864_v50 = vmul.f32 %v4629_v45, %v4619_v4 }
 0xc08   :  { %v4633_v52 = vpop.eup %4632  ;;  %v2161_v53 = vpop.permute.xlu0 %2160  ;;  %v1866_v39 = vmul.f32 %v4631_v46, %v4623_v23  ;;  %v1947_v59 = vsel %vm1010_vm2, %v1938_v48, 0 }
 0xc09   :  { %4247 = vmatmul.mubr.msk.bf16.vlgmr.msra.gmra.mrb[44].mxu0 %vm933_vm3, %v1870_v49  ;;  %4394 = vmatprep.subr.msk.bf16.mxu1 %vm794_vm1, %v2161_v53  ;;  %v1868_v56 = vmul.f32 %v4633_v52, %v5544_v9  ;;  %v2171_v6 = vsel %vm794_vm1, %v2161_v53, 0 }
 0xc0a   :  { %4251 = vmatpush3.bf16.msra.mxu0 %v1936_v44  ;;  %v1871_v54 = vpack.c.bf16 %v1866_v39, %v1864_v50 }
 0xc0b   :  { %v2095_v58 = vpop.permute.xlu1 %2094  ;;  %4391 = vmatprep.subr.msk.bf16.mxu0 %vm1010_vm2, %v1938_v48  ;;  %v1872_v60 = vpack.c.bf16 %v1868_v56, %v1868_v56 }
 0xc0c   :  { %4254 = vmatprep.mubr.msk.bf16.mxu0 %vm933_vm3, %v1871_v54  ;;  %v2106_v35 = vsel %vm794_vm1, %v2095_v58, 0  ;;  %v2091_v63 = vpop.permute.xlu0 %2090 }
 0xc0e   :  { %4253 = vmatpush3.bf16.msra.mxu0 %v1947_v59 }
 0xc0f   :  { %4392 = vmatprep.subr.msk.bf16.mxu0 %vm794_vm1, %v2093_v7  ;;  %v2089_v43 = vpop.permute.xlu1 %2088 }
 0xc10   :  { %v2157_v29 = vpop.permute.xlu0 %2156 }
 0xc11   :  { %4255 = vmatmul.mubr.msk.bf16.vlgmr.msra.gmra.mrb[48].mxu0 %vm933_vm3, %v1872_v60 }
 0xc12   :  { %4278 = vmatprep.mubr.msk.bf16.mxu0 %vm794_vm1, %v2089_v43 }
 0xc13   :  { %v2163_v8 = vpop.permute.xlu1 %2162 }
 0xc14   :  { %v2174_v27 = vsel %vm794_vm1, %v2163_v8, 0 }
 0xc17   :  { %4275 = vmatpush3.bf16.xpose.msra.mxu0 %v2103_v62  ;;  %v2159_v30 = vpop.permute.xlu1 %2158 }
 0xc18   :  { %4393 = vmatprep.subr.msk.bf16.mxu0 %vm794_vm1, %v2095_v58 }
 0xc1f   :  { %4277 = vmatpush3.bf16.xpose.msra.mxu0 %v2106_v35 }
 0xc26   :  { %4279 = vmatmul.mubr.msk.bf16.vlgmr.msra.gmra.mrb[52].mxu0 %vm794_vm1, %v2091_v63 }
 0xcdc   :  { %v4248_v1 = vpop.f32.mrb[44].mxu0 }
 0xcdd   :  { %v1921_v2 = vpop.f32.mrb[45].mxu0 }
 0xcde   :  { %v4249_v3 = vpop.f32.mrb[46].mxu0 }
 0xcdf   :  { %v1924_v5 = vpop.f32.mrb[47].mxu0 }
 0xce0   :  { %v1997_v47 = vpack.c.bf16 %v1924_v5, %v1921_v2 }
 0xce2   :  { %4263 = vmatmul.mubr.msk.bf16.vlgmr.msra.gmra.mrb[24].mxu1 %vm794_vm1, %v1997_v47 }
 0xce3   :  { %4283 = vmatpush3.bf16.xpose.msra.mxu1 %v2171_v6  ;;  %4266 = vmatprep.mubr.msk.bf16.mxu1 %vm4938_vm0, %v4937_v0 }
 0xce4   :  { %4395 = vmatprep.subr.msk.bf16.mxu1 %vm794_vm1, %v2163_v8  ;;  %v4256_v9 = vpop.f32.mrb[48].mxu0 }
 0xce5   :  { %v1983_v10 = vpop.f32.mrb[49].mxu0 }
 0xce6   :  { %v1998_v4 = vpack.c.bf16 %v1983_v10, %v4248_v1  ;;  %v4257_v13 = vpop.f32.mrb[50].mxu0 }
 0xce7   :  { %v1986_v23 = vpop.f32.mrb[51].mxu0 }
 0xce8   :  { %v1999_v25 = vpack.c.bf16 %v4256_v9, %v1986_v23 }
 0xcea   :  { %4267 = vmatmul.mubr.msk.bf16.gmra.mrb[28].mxu1 %vm794_vm1, %v1998_v4 }
 0xceb   :  { %4285 = vmatpush3.bf16.xpose.msra.mxu1 %v2174_v27  ;;  %4270 = vmatprep.mubr.msk.bf16.mxu1 %vm4938_vm0, %v4937_v0 }
 0xcec   :  { %4306 = vmatprep.subr.bf16.mxu1 %v4937_v0 }
 0xcf2   :  { %4271 = vmatmul.mubr.msk.bf16.gmra.mrb[32].mxu1 %vm794_vm1, %v1999_v25 }
 0xcf3   :  { %4286 = vmatprep.mubr.msk.bf16.mxu1 %vm794_vm1, %v2157_v29 }
 0xcf9   :  { %v4280_v34 = vpop.f32.mrb[52].mxu0 }
 0xcfa   :  { %v2142_v16 = vpop.f32.mrb[53].mxu0  ;;  %4287 = vmatmul.mubr.msk.bf16.vlgmr.msra.gmra.mrb[44].mxu1 %vm794_vm1, %v2159_v30  ;;  %v2226_v17 = vmul.f32 0.17677669, %v4280_v34 }
 0xcfb   :  { %v2224_v36 = vmul.f32 0.17677669, %v2142_v16  ;;  %v4281_v42 = vpop.f32.mrb[54].mxu0  ;;  %4310 = vmatprep.mubr.msk.bf16.mxu1 %vm4938_vm0, %v4937_v0 }
 0xcfc   :  { %v2145_v55 = vpop.f32.mrb[55].mxu0  ;;  %v2232_v24 = vadd.f32 %v4734_v11, %v2226_v17 }
 0xcfd   :  { %v2225_v37 = vmul.f32 0.17677669, %v2145_v55  ;;  %v2230_v40 = vadd.f32 %v4734_v11, %v2224_v36 }
 0xcfe   :  { %v2242_v7 = vsel %vm933_vm3, %v2232_v24, -inf }
 0xcff   :  { %v2236_v38 = vsel %vm933_vm3, %v2230_v40, -inf  ;;  %v2231_v21 = vadd.f32 %v4734_v11, %v2225_v37 }
 0xd00   :  { %2237 = vmax.xlane.f32.xlu0 %v2236_v38 }
 0xd01   :  { %v2239_v44 = vsel %vm933_vm3, %v2231_v21, -inf }
 0xd02   :  { %2240 = vmax.xlane.f32.xlu1 %v2239_v44 }
 0xd04   :  { %2243 = vmax.xlane.f32.xlu0 %v2242_v7 }
 0xd8d   :  { %v2238_v45 = vpop.xlane.xlu0 %2237 }
 0xd8e   :  { %v2254_v49 = vsub.f32 %v2230_v40, %v2238_v45 }
 0xd8f   :  { %v2241_v32 = vpop.xlane.xlu1 %2240 }
 0xd90   :  { %v2255_v46 = vsub.f32 %v2231_v21, %v2241_v32  ;;  %v2260_v52 = vmul.f32 1.442695, %v2254_v49 }
 0xd91   :  { %v2244_v50 = vpop.xlane.xlu0 %2243 }
 0xd92   :  { %v2262_v48 = vmul.f32 1.442695, %v2255_v46  ;;  %v2256_v53 = vsub.f32 %v2232_v24, %v2244_v50  ;;  %v4468_v46 = vld [vmem:[#allocation10 + $0x30] sm:$0xff]  }
 0xd93   :  { %4307 = vmatpush3.bf16.msra.mxu1 %v4468_v46 }
 0xd94   :  { %4634 = vpow2.f32 %v2262_v48  ;;  %v2264_v54 = vmul.f32 1.442695, %v2256_v53  ;;  %4308 = vmatprep.subr.bf16.mxu1 %v4937_v0 }
 0xd95   :  { %4636 = vpow2.f32 %v2260_v52 }
 0xd96   :  { %4638 = vpow2.f32 %v2264_v54 }
 0xd9e   :  { %v4635_v2 = vpop.eup %4634 }
 0xd9f   :  { %v2275_v47 = vsel %vm933_vm3, %v4635_v2, 0.0  ;;  %v4637_v8 = vpop.eup %4636 }
 0xda0   :  { %v2272_v9 = vsel %vm933_vm3, %v4637_v8, 0.0  ;;  %v4639_v10 = vpop.eup %4638 }
 0xda1   :  { %v2278_v4 = vsel %vm933_vm3, %v4639_v10, 0.0 }
 0xdcd   :  { %v4288_v39 = vpop.f32.mrb[44].mxu1 }
 0xdce   :  { %v2229_v56 = vmul.f32 0.17677669, %v4288_v39  ;;  %v2210_v58 = vpop.f32.mrb[45].mxu1 }
 0xdcf   :  { %v2227_v59 = vmul.f32 0.17677669, %v2210_v58  ;;  %v4289_v60 = vpop.f32.mrb[46].mxu1 }
 0xdd0   :  { %v2213_v43 = vpop.f32.mrb[47].mxu1  ;;  %v2235_v62 = vadd.f32 %v4734_v11, %v2229_v56 }
 0xdd1   :  { %v2228_v35 = vmul.f32 0.17677669, %v2213_v43  ;;  %v2233_v63 = vadd.f32 %v4734_v11, %v2227_v59 }
 0xdd2   :  { %v2251_v1 = vsel %vm933_vm3, %v2235_v62, -inf }
 0xdd3   :  { %2252 = vmax.xlane.f32.xlu1 %v2251_v1  ;;  %v2245_v3 = vsel %vm933_vm3, %v2233_v63, -inf  ;;  %v2234_v5 = vadd.f32 %v4734_v11, %v2228_v35 }
 0xdd4   :  { %2246 = vmax.xlane.f32.xlu0 %v2245_v3  ;;  %v4469_v3 = vld [vmem:[#allocation10 + $0x38] sm:$0xff]  }
 0xdd5   :  { %v2248_v6 = vsel %vm933_vm3, %v2234_v5, -inf  ;;  %4309 = vmatpush3.bf16.msra.mxu1 %v4469_v3 }
 0xdd7   :  { %2276 = vadd.xlane.f32.xlu1 %v2275_v47 }
 0xdd8   :  { %2249 = vmax.xlane.f32.xlu0 %v2248_v6 }
 0xddc   :  { %2273 = vadd.xlane.f32.xlu0 %v2272_v9 }
 0xde0   :  { %2279 = vadd.xlane.f32.xlu0 %v2278_v4 }
 0xe60   :  { %v2253_v13 = vpop.xlane.xlu1 %2252 }
 0xe61   :  { %v2259_v23 = vsub.f32 %v2235_v62, %v2253_v13  ;;  %v2247_v25 = vpop.xlane.xlu0 %2246 }
 0xe62   :  { %v2257_v27 = vsub.f32 %v2233_v63, %v2247_v25 }
 0xe63   :  { %v2270_v29 = vmul.f32 1.442695, %v2259_v23 }
 0xe64   :  { %v2266_v30 = vmul.f32 1.442695, %v2257_v27  ;;  %v2277_v16 = vpop.xlane.xlu1 %2276 }
 0xe65   :  { %4640 = vpow2.f32 %v2270_v29  ;;  %v2250_v34 = vpop.xlane.xlu0 %2249  ;;  %v3772_v29 = vld [vmem:[%s6072_s11] ss:$0 sm:$0xff]  ;;  %s6125_s11 = sld [smem:[#allocation31_spill]] }
 0xe66   :  { %v2258_v17 = vsub.f32 %v2234_v5, %v2250_v34  ;;  %4642 = vpow2.f32 %v2266_v30  ;;  %v776_v30 = vadd.f32 %v3772_v29, %v5212_v14 }
 0xe67   :  { %4644 = vrcp.f32 %v2277_v16 }
 0xe68   :  { %v2268_v36 = vmul.f32 1.442695, %v2258_v17 }
 0xe69   :  { %v2274_v42 = vpop.xlane.xlu0 %2273 }
 0xe6a   :  { %4646 = vpow2.f32 %v2268_v36  ;;  %v777_v36 = vadd.f32 %v3772_v29, %v5215_v19 }
 0xe6b   :  { %4648 = vrcp.f32 %v2274_v42 }
 0xe6d   :  { %v2280_v48 = vpop.xlane.xlu0 %2279 }
 0xe6e   :  { %4650 = vrcp.f32 %v2280_v48  ;;  %v781_v48 = vadd.f32 %v3772_v29, %v5226_v31 }
 0xe6f   :  { %v4641_v55 = vpop.eup %4640 }
 0xe70   :  { %v2287_v37 = vsel %vm933_vm3, %v4641_v55, 0.0  ;;  %v4643_v11 = vpop.eup %4642 }
 0xe71   :  { %2288 = vadd.xlane.f32.xlu1 %v2287_v37  ;;  %v4645_v40 = vpop.eup %4644  ;;  %v2281_v21 = vsel %vm933_vm3, %v4643_v11, 0.0 }
 0xe72   :  { %v2293_v32 = vmul.f32 %v4645_v40, %v4635_v2 }
 0xe74   :  { %v4647_v38 = vpop.eup %4646 }
 0xe75   :  { %v4649_v24 = vpop.eup %4648  ;;  %2282 = vadd.xlane.f32.xlu1 %v2281_v21  ;;  %v2284_v44 = vsel %vm933_vm3, %v4647_v38, 0.0 }
 0xe76   :  { %2285 = vadd.xlane.f32.xlu0 %v2284_v44  ;;  %v2291_v7 = vmul.f32 %v4649_v24, %v4637_v8  ;;  %v779_v24 = vadd.f32 %v3772_v29, %v5221_v26 }
 0xe78   :  { %v2302_v45 = vpack.c.bf16 %v2293_v32, %v2291_v7  ;;  %v780_v7 = vadd.f32 %v3772_v29, %v5224_v28  ;;  %v4481_v28 = vld [vmem:[#allocation12 + $0x2c] ss:$16 sps:$4 sm:$0xff]  }
 0xe7a   :  { %4294 = vmatprep.mubr.msk.bf16.mxu0 %vm933_vm3, %v2302_v45 }
 0xe86   :  { %2308 = vrot.lane.b32.xlu1 %v5367_v33, %s4941_s6 }
 0xe8a   :  { %2368 = vrot.lane.b32.xlu1 %v5333_v51, %s4941_s6  ;;  %v4651_v51 = vpop.eup %4650 }
 0xe8c   :  { %2306 = vrot.lane.b32.xlu0 %v5310_v41, %s4941_s6  ;;  %v2295_v41 = vmul.f32 %v4651_v51, %v4639_v10  ;;  %v4473_v51 = vld [vmem:[#allocation12 + $0x8] ss:$16 sps:$4 sm:$0xff]  }
 0xe8e   :  { %2370 = vrot.lane.b32.xlu1 %v5338_v18, %s4941_s6  ;;  %v2303_v58 = vpack.c.bf16 %v2295_v41, %v2295_v41  ;;  %v4478_v41 = vld [vmem:[#allocation12 + $0x24] ss:$16 sps:$4 sm:$0xff]  }
 0xefe   :  { %v2289_v49 = vpop.xlane.xlu1 %2288 }
 0xf02   :  { %v2283_v50 = vpop.xlane.xlu1 %2282 }
 0xf03   :  { %4652 = vrcp.f32 %v2283_v50  ;;  %v2286_v52 = vpop.xlane.xlu0 %2285 }
 0xf04   :  { %4654 = vrcp.f32 %v2286_v52  ;;  %v4470_v52 = vld [vmem:[#allocation12] ss:$16 sps:$4 sm:$0xff]  }
 0xf05   :  { %4656 = vrcp.f32 %v2289_v49 }
 0xf06   :  { %v2309_v33 = vpop.permute.xlu1 %2308 }
 0xf07   :  { %v2307_v53 = vpop.permute.xlu0 %2306  ;;  %v2318_v39 = vsel %vm1010_vm2, %v2309_v33, 0 }
 0xf08   :  { %4290 = vmatprep.subr.bf16.mxu0 %v2307_v53 }
 0xf09   :  { %4291 = vmatpush3.bf16.msra.mxu0 %v2307_v53  ;;  %v4475_v53 = vld [vmem:[#allocation12 + $0xc] ss:$16 sps:$4 sm:$0xff]  }
 0xf0a   :  { %4396 = vmatprep.subr.msk.bf16.mxu0 %vm1010_vm2, %v2309_v33  ;;  %v2369_v18 = vpop.permute.xlu1 %2368  ;;  %v4472_v33 = vld [vmem:[#allocation12 + $0x4] ss:$16 sps:$4 sm:$0xff]   ;;  %2893 = vmatprep.subr.bf16.mxu1 %v4475_v53  ;;  %v4517_v53 = vld [vmem:[#allocation12 + $0xec] ss:$16 sps:$4 sm:$0xff]  }
 0xf0d   :  { %v4653_v54 = vpop.eup %4652  ;;  %4293 = vmatpush3.bf16.msra.mxu0 %v2318_v39  ;;  %v4479_v39 = vld [vmem:[#allocation12 + $0x28] ss:$16 sps:$4 sm:$0xff]  }
 0xf0e   :  { %v4655_v56 = vpop.eup %4654  ;;  %4298 = vmatprep.subr.bf16.mxu0 %v2369_v18  ;;  %v2297_v59 = vmul.f32 %v4653_v54, %v4643_v11  ;;  %v2371_v62 = vpop.permute.xlu1 %2370  ;;  %v778_v11 = vadd.f32 %v3772_v29, %v5218_v22  ;;  %v4484_v29 = vld [vmem:[#allocation12 + $0x44] ss:$16 sps:$4 sm:$0xff]  }
 0xf0f   :  { %v4657_v60 = vpop.eup %4656  ;;  %v2299_v43 = vmul.f32 %v4655_v56, %v4647_v38  ;;  %v2380_v1 = vsel %vm1010_vm2, %v2371_v62, 0 }
 0xf10   :  { %4295 = vmatmul.mubr.msk.bf16.vlgmr.msra.gmra.mrb[56].mxu0 %vm933_vm3, %v2303_v58  ;;  %v2301_v63 = vmul.f32 %v4657_v60, %v4641_v55 }
 0xf11   :  { %4299 = vmatpush3.bf16.msra.mxu0 %v2369_v18  ;;  %v2304_v35 = vpack.c.bf16 %v2299_v43, %v2297_v59  ;;  %v4476_v18 = vld [vmem:[#allocation12 + $0x20] ss:$16 sps:$4 sm:$0xff]  }
 0xf12   :  { %4397 = vmatprep.subr.msk.bf16.mxu0 %vm1010_vm2, %v2371_v62  ;;  %v2305_v2 = vpack.c.bf16 %v2301_v63, %v2301_v63 }
 0xf13   :  { %4302 = vmatprep.mubr.msk.bf16.mxu0 %vm933_vm3, %v2304_v35 }
 0xf15   :  { %4301 = vmatpush3.bf16.msra.mxu0 %v2380_v1 }
 0xf16   :  { %2830 = vmatprep.subr.bf16.mxu0 %v4472_v33  ;;  %v4509_v33 = vld [vmem:[#allocation12 + $0xc8] ss:$16 sps:$4 sm:$0xff]  }
 0xf18   :  { %4303 = vmatmul.mubr.msk.bf16.vlgmr.msra.gmra.mrb[60].mxu0 %vm933_vm3, %v2305_v2 }
 0xf19   :  { %2862 = vmatprep.mubr.bf16.mxu0 %v4939_v20  ;;  %2831 = vmatpush1.bf16.msra.mxu0 %v4470_v52  ;;  %v4506_v52 = vld [vmem:[#allocation12 + $0xc0] ss:$16 sps:$4 sm:$0xff]  }
 0xf1a   :  { %2832 = vmatprep.subr.bf16.mxu0 %v4478_v41  ;;  %v4512_v41 = vld [vmem:[#allocation12 + $0xe0] ss:$16 sps:$4 sm:$0xff]  }
 0xf1d   :  { %2833 = vmatpush1.bf16.msra.mxu0 %v4476_v18 }
 0xf1e   :  { %2834 = vmatprep.subr.bf16.mxu0 %v4484_v29 }
 0xfe3   :  { %v4296_v5 = vpop.f32.mrb[56].mxu0 }
 0xfe4   :  { %v2354_v47 = vpop.f32.mrb[57].mxu0 }
 0xfe5   :  { %v4297_v6 = vpop.f32.mrb[58].mxu0 }
 0xfe6   :  { %v2357_v8 = vpop.f32.mrb[59].mxu0 }
 0xfe7   :  { %v2430_v9 = vpack.c.bf16 %v2357_v8, %v2354_v47 }
 0xfe9   :  { %4311 = vmatmul.mubr.msk.bf16.vlgmr.msra.gmra.mrb[24].mxu1 %vm794_vm1, %v2430_v9 }
 0xfea   :  { %4314 = vmatprep.mubr.msk.bf16.mxu1 %vm4938_vm0, %v4937_v0  ;;  %2894 = vmatpush1.bf16.msra.mxu1 %v4473_v51  ;;  %v4514_v51 = vld [vmem:[#allocation12 + $0xe4] ss:$16 sps:$4 sm:$0xff]  }
 0xfeb   :  { %v4304_v10 = vpop.f32.mrb[60].mxu0  ;;  %2895 = vmatprep.subr.bf16.mxu1 %v4481_v28  ;;  %v4515_v28 = vld [vmem:[#allocation12 + $0xe8] ss:$16 sps:$4 sm:$0xff]  }
 0xfec   :  { %v2416_v4 = vpop.f32.mrb[61].mxu0 }
 0xfed   :  { %v2431_v13 = vpack.c.bf16 %v2416_v4, %v4296_v5  ;;  %v4305_v23 = vpop.f32.mrb[62].mxu0 }
 0xfee   :  { %v2419_v25 = vpop.f32.mrb[63].mxu0  ;;  %2896 = vmatpush1.bf16.msra.mxu1 %v4479_v39 }
 0xfef   :  { %v2432_v27 = vpack.c.bf16 %v4304_v10, %v2419_v25 }
 0xff1   :  { %4315 = vmatmul.mubr.msk.bf16.gmra.mrb[28].mxu1 %vm794_vm1, %v2431_v13 }
 0xff2   :  { %4318 = vmatprep.mubr.msk.bf16.mxu1 %vm4938_vm0, %v4937_v0 }
 0xff9   :  { %4319 = vmatmul.mubr.msk.bf16.gmra.mrb[32].mxu1 %vm794_vm1, %v2432_v27 }
 0xffa   :  { %2925 = vmatprep.mubr.bf16.mxu1 %v4939_v20 }
0x10bc   :  { %v2492_v34 = vpop.f32.mrb[24].mxu1 }
0x10bd   :  { %v5652_v16 = vadd.f32 %v2492_v34, %v776_v30  ;;  %v4312_v17 = vpop.f32.mrb[25].mxu1  ;;  %v4487_v30 = vld [vmem:[#allocation12 + $0x4c] ss:$16 sps:$4 sm:$0xff]  }
0x10be   :  { %v2495_v42 = vpop.f32.mrb[26].mxu1  ;;  %v4482_v17 = vld [vmem:[#allocation12 + $0x40] ss:$16 sps:$4 sm:$0xff]   ;;  %2897 = vmatprep.subr.bf16.mxu1 %v4487_v30 }
0x10bf   :  { %v5655_v55 = vadd.f32 %v2495_v42, %v777_v36  ;;  %2523 = vadd.xlane.f32.xlu0 %v5652_v16  ;;  %v4313_v37 = vpop.f32.mrb[27].mxu1  ;;  %v4485_v36 = vld [vmem:[#allocation12 + $0x48] ss:$16 sps:$4 sm:$0xff]   ;;  %2835 = vmatpush1.bf16.msra.mxu0 %v4482_v17  ;;  %v4490_v42 = vld [vmem:[#allocation12 + $0x64] ss:$16 sps:$4 sm:$0xff]  }
0x10c0   :  { %2898 = vmatpush1.bf16.msra.mxu1 %v4485_v36  ;;  %v4493_v37 = vld [vmem:[#allocation12 + $0x6c] ss:$16 sps:$4 sm:$0xff]   ;;  %2836 = vmatprep.subr.bf16.mxu0 %v4490_v42 }
0x10c1   :  { %2525 = vadd.xlane.f32.xlu1 %v5655_v55  ;;  %2899 = vmatprep.subr.bf16.mxu1 %v4493_v37  ;;  %v3827_v36 = vld [vmem:[%s6074_s13] ss:$0 sm:$0xff] }
0x10c4   :  { %v2500_v40 = vpop.f32.mrb[28].mxu1 }
0x10c5   :  { %v5660_v38 = vadd.f32 %v2500_v40, %v778_v11  ;;  %v4316_v14 = vpop.f32.mrb[29].mxu1  ;;  %v4488_v11 = vld [vmem:[#allocation12 + $0x60] ss:$16 sps:$4 sm:$0xff]   ;;  %v4491_v40 = vld [vmem:[#allocation12 + $0x68] ss:$16 sps:$4 sm:$0xff]  }
0x10c6   :  { %v2503_v21 = vpop.f32.mrb[30].mxu1  ;;  %2837 = vmatpush1.bf16.msra.mxu0 %v4488_v11  ;;  %2900 = vmatpush1.bf16.msra.mxu1 %v4491_v40  ;;  %v4496_v14 = vld [vmem:[#allocation12 + $0x84] ss:$16 sps:$4 sm:$0xff]  }
0x10c7   :  { %2527 = vadd.xlane.f32.xlu0 %v5660_v38  ;;  %v4317_v19 = vpop.f32.mrb[31].mxu1  ;;  %v5664_v44 = vadd.f32 %v2503_v21, %v779_v24  ;;  %v4499_v21 = vld [vmem:[#allocation12 + $0x8c] ss:$16 sps:$4 sm:$0xff]   ;;  %v4494_v24 = vld [vmem:[#allocation12 + $0x80] ss:$16 sps:$4 sm:$0xff]   ;;  %2838 = vmatprep.subr.bf16.mxu0 %v4496_v14 }
0x10c8   :  { %v4497_v19 = vld [vmem:[#allocation12 + $0x88] ss:$16 sps:$4 sm:$0xff]   ;;  %2901 = vmatprep.subr.bf16.mxu1 %v4499_v21 }
0x10ca   :  { %2839 = vmatpush1.bf16.msra.mxu0 %v4494_v24  ;;  %2902 = vmatpush1.bf16.msra.mxu1 %v4497_v19 }
0x10cb   :  { %2529 = vadd.xlane.f32.xlu0 %v5664_v44 }
0x10cc   :  { %v2508_v32 = vpop.f32.mrb[32].mxu1 }
0x10cd   :  { %v5668_v45 = vadd.f32 %v2508_v32, %v780_v7  ;;  %v4320_v46 = vpop.f32.mrb[33].mxu1  ;;  %v4502_v7 = vld [vmem:[#allocation12 + $0xa4] ss:$16 sps:$4 sm:$0xff]   ;;  %v4505_v32 = vld [vmem:[#allocation12 + $0xac] ss:$16 sps:$4 sm:$0xff]  }
0x10ce   :  { %v2511_v49 = vpop.f32.mrb[34].mxu1  ;;  %v4500_v46 = vld [vmem:[#allocation12 + $0xa0] ss:$16 sps:$4 sm:$0xff]   ;;  %2840 = vmatprep.subr.bf16.mxu0 %v4502_v7  ;;  %2903 = vmatprep.subr.bf16.mxu1 %v4505_v32 }
0x10cf   :  { %v5671_v50 = vadd.f32 %v2511_v49, %v781_v48  ;;  %2531 = vadd.xlane.f32.xlu0 %v5668_v45  ;;  %v4321_v26 = vpop.f32.mrb[35].mxu1  ;;  %v4503_v48 = vld [vmem:[#allocation12 + $0xa8] ss:$16 sps:$4 sm:$0xff]   ;;  %2841 = vmatpush1.bf16.msra.mxu0 %v4500_v46  ;;  %v4508_v49 = vld [vmem:[#allocation12 + $0xc4] ss:$16 sps:$4 sm:$0xff]  }
0x10d0   :  { %2904 = vmatpush1.bf16.msra.mxu1 %v4503_v48  ;;  %v4511_v26 = vld [vmem:[#allocation12 + $0xcc] ss:$16 sps:$4 sm:$0xff]   ;;  %2842 = vmatprep.subr.bf16.mxu0 %v4508_v49 }
0x10d1   :  { %2533 = vadd.xlane.f32.xlu1 %v5671_v50  ;;  %2905 = vmatprep.subr.bf16.mxu1 %v4511_v26 }
0x10d3   :  { %2843 = vmatpush1.bf16.msra.mxu0 %v4506_v52 }
0x10d4   :  { %2906 = vmatpush1.bf16.msra.mxu1 %v4509_v33  ;;  %2844 = vmatprep.subr.bf16.mxu0 %v4514_v51 }
0x10d5   :  { %2907 = vmatprep.subr.bf16.mxu1 %v4517_v53 }
0x10d7   :  { %2845 = vmatpush1.bf16.msra.mxu0 %v4512_v41 }
0x10d8   :  { %2908 = vmatpush1.bf16.msra.mxu1 %v4515_v28  ;;  %v4518_v28 = vld [vmem:[#allocation13 + $0x40] sm:$0xff]  }
0x10d9   :  { %4002 = vmatprep.subr.bf16.mxu0 %v4518_v28 }
0x114c   :  { %v2524_v54 = vpop.xlane.xlu0 %2523 }
0x114d   :  { %v2535_v56 = vmul.f32 0.0078125, %v2524_v54 }
0x114e   :  { %v2526_v58 = vpop.xlane.xlu1 %2525 }
0x114f   :  { %v5676_v59 = vsub.f32 %v5652_v16, %v2535_v56  ;;  %v2536_v60 = vmul.f32 0.0078125, %v2526_v58 }
0x1151   :  { %v5679_v43 = vsub.f32 %v5655_v55, %v2536_v60  ;;  %v2547_v62 = vmul.f32 %v5676_v59, %v5676_v59 }
0x1153   :  { %2553 = vadd.xlane.f32.xlu0 %v2547_v62  ;;  %v2548_v35 = vmul.f32 %v5679_v43, %v5679_v43 }
0x1154   :  { %v2528_v63 = vpop.xlane.xlu0 %2527 }
0x1155   :  { %v2537_v1 = vmul.f32 0.0078125, %v2528_v63  ;;  %2555 = vadd.xlane.f32.xlu1 %v2548_v35 }
0x1157   :  { %v5686_v2 = vsub.f32 %v5660_v38, %v2537_v1 }
0x1158   :  { %v2530_v3 = vpop.xlane.xlu0 %2529 }
0x1159   :  { %v2538_v5 = vmul.f32 0.0078125, %v2530_v3  ;;  %v2549_v47 = vmul.f32 %v5686_v2, %v5686_v2 }
0x115b   :  { %v5691_v6 = vsub.f32 %v5664_v44, %v2538_v5  ;;  %2557 = vadd.xlane.f32.xlu0 %v2549_v47 }
0x115c   :  { %v2532_v8 = vpop.xlane.xlu0 %2531 }
0x115d   :  { %v2539_v9 = vmul.f32 0.0078125, %v2532_v8  ;;  %v2550_v10 = vmul.f32 %v5691_v6, %v5691_v6  ;;  %v3826_v8 = vld [vmem:[%s6073_s12] ss:$0 sm:$0xff] }
0x115e   :  { %v2534_v4 = vpop.xlane.xlu1 %2533 }
0x115f   :  { %v5696_v13 = vsub.f32 %v5668_v45, %v2539_v9  ;;  %v2540_v23 = vmul.f32 0.0078125, %v2534_v4  ;;  %2559 = vadd.xlane.f32.xlu1 %v2550_v10 }
0x1161   :  { %v5699_v25 = vsub.f32 %v5671_v50, %v2540_v23  ;;  %v2551_v27 = vmul.f32 %v5696_v13, %v5696_v13 }
0x1163   :  { %2561 = vadd.xlane.f32.xlu0 %v2551_v27  ;;  %v2552_v34 = vmul.f32 %v5699_v25, %v5699_v25 }
0x1165   :  { %2563 = vadd.xlane.f32.xlu1 %v2552_v34 }
0x11e0   :  { %v2554_v18 = vpop.xlane.xlu0 %2553 }
0x11e1   :  { %v2565_v39 = vmul.f32 0.0078125, %v2554_v18  ;;  %v4519_v18 = vld [vmem:[#allocation13 + $0xc0] sm:$0xff]  }
0x11e2   :  { %v2556_v54 = vpop.xlane.xlu1 %2555  ;;  %4036 = vmatprep.subr.bf16.mxu1 %v4519_v18 }
0x11e3   :  { %v2571_v56 = vadd.f32 1e-06, %v2565_v39  ;;  %v2566_v58 = vmul.f32 0.0078125, %v2556_v54  ;;  %v4521_v39 = vld [vmem:[#allocation13 + $0x80] sm:$0xff]   ;;  %v4523_v54 = vld [vmem:[#allocation13 + $0xc8] sm:$0xff]  }
0x11e5   :  { %4658 = vrsqrt.f32 %v2571_v56  ;;  %v2572_v60 = vadd.f32 1e-06, %v2566_v58  ;;  %v4524_v56 = vld [vmem:[#allocation13 + $0x8] sm:$0xff]  }
0x11e6   :  { %v4525_v58 = vld [vmem:[#allocation13 + $0x88] sm:$0xff]  }
0x11e7   :  { %4660 = vrsqrt.f32 %v2572_v60  ;;  %v4527_v60 = vld [vmem:[#allocation13 + $0xd0] sm:$0xff]  }
0x11e8   :  { %v2558_v62 = vpop.xlane.xlu0 %2557 }
0x11e9   :  { %v2567_v35 = vmul.f32 0.0078125, %v2558_v62  ;;  %v4528_v62 = vld [vmem:[#allocation13 + $0x10] sm:$0xff]  }
0x11eb   :  { %v2573_v63 = vadd.f32 1e-06, %v2567_v35  ;;  %v4529_v35 = vld [vmem:[#allocation13 + $0x90] sm:$0xff]  }
0x11ec   :  { %v2560_v1 = vpop.xlane.xlu1 %2559 }
0x11ed   :  { %4662 = vrsqrt.f32 %v2573_v63  ;;  %v2568_v3 = vmul.f32 0.0078125, %v2560_v1  ;;  %v4530_v63 = vld [vmem:[#allocation13 + $0x58] sm:$0xff]  }
0x11ee   :  { %v4531_v1 = vld [vmem:[#allocation13 + $0xd8] sm:$0xff]  }
0x11ef   :  { %v4659_v5 = vpop.eup %4658  ;;  %v2574_v47 = vadd.f32 1e-06, %v2568_v3  ;;  %v4532_v3 = vld [vmem:[#allocation13 + $0x18] sm:$0xff]  }
0x11f0   :  { %v2583_v9 = vmul.f32 %v4659_v5, %v5676_v59  ;;  %v2562_v10 = vpop.xlane.xlu0 %2561  ;;  %v4533_v5 = vld [vmem:[#allocation13 + $0x98] sm:$0xff]  }
0x11f1   :  { %v4661_v4 = vpop.eup %4660  ;;  %4664 = vrsqrt.f32 %v2574_v47  ;;  %v2569_v23 = vmul.f32 0.0078125, %v2562_v10  ;;  %v4534_v47 = vld [vmem:[#allocation13 + $0x60] sm:$0xff]  }
0x11f2   :  { %v2584_v27 = vmul.f32 %v4661_v4, %v5679_v43  ;;  %v2564_v29 = vpop.xlane.xlu1 %2563  ;;  %v2595_v30 = vmul.f32 %v3826_v8, %v2583_v9  ;;  %v4536_v9 = vld [vmem:[#allocation13 + $0x20] sm:$0xff]   ;;  %v4538_v4 = vld [vmem:[#allocation13 + $0x68] sm:$0xff]  }
0x11f3   :  { %v2575_v34 = vadd.f32 1e-06, %v2569_v23  ;;  %v2570_v17 = vmul.f32 0.0078125, %v2564_v29  ;;  %v4537_v10 = vld [vmem:[#allocation13 + $0xa0] sm:$0xff]   ;;  %v4539_v23 = vld [vmem:[#allocation13 + $0xe8] sm:$0xff]  }
0x11f4   :  { %v2596_v42 = vmul.f32 %v3826_v8, %v2584_v27  ;;  %v2607_v11 = vadd.f32 %v3827_v36, %v2595_v30  ;;  %v4540_v27 = vld [vmem:[#allocation13 + $0x28] sm:$0xff]   ;;  %v4542_v30 = vld [vmem:[#allocation13 + $0x70] sm:$0xff]  }
0x11f5   :  { %4666 = vrsqrt.f32 %v2575_v34  ;;  %v2576_v37 = vadd.f32 1e-06, %v2570_v17  ;;  %v4541_v29 = vld [vmem:[#allocation13 + $0xa8] sm:$0xff]   ;;  %v4543_v34 = vld [vmem:[#allocation13 + $0xf0] sm:$0xff]  }
0x11f6   :  { %v2608_v40 = vadd.f32 %v3827_v36, %v2596_v42  ;;  %v4544_v17 = vld [vmem:[#allocation13 + $0x30] sm:$0xff]   ;;  %v4546_v42 = vld [vmem:[#allocation13 + $0x78] sm:$0xff]  }
0x11f7   :  { %v4663_v59 = vpop.eup %4662  ;;  %4668 = vrsqrt.f32 %v2576_v37  ;;  %v4547_v37 = vld [vmem:[#allocation13 + $0xf8] sm:$0xff]  }
0x11f8   :  { %v2613_v14 = vpack.c.bf16 %v2608_v40, %v2607_v11  ;;  %v2585_v21 = vmul.f32 %v4663_v59, %v5686_v2  ;;  %v4548_v11 = vld [vmem:[#allocation13 + $0x38] sm:$0xff]  }
0x11f9   :  { %v4549_v40 = vld [vmem:[#allocation13 + $0xb8] sm:$0xff]  }
0x11fa   :  { %2863 = vmatmul.mubr.bf16.vlgmr.msra.gmra.mrb[64].mxu0 %v2613_v14  ;;  %2926 = vmatmul.mubr.bf16.vlgmr.msra.gmra.mrb[48].mxu1 %v2613_v14  ;;  %v2597_v19 = vmul.f32 %v3826_v8, %v2585_v21  ;;  %v2648_v59 = vld [vmem:[%s6076_s15] sm:$0xf]  ;;  %v2664_v14 = vsub.s32 3, %v5286_v57 }
0x11fb   :  { %v4665_v43 = vpop.eup %4664  ;;  %2872 = vmatprep.mubr.bf16.mxu0 %v4939_v20  ;;  %2935 = vmatprep.mubr.bf16.mxu1 %v4939_v20  ;;  %v5728_v21 = vrot.slane %v2648_v59, %v507_v12 }
0x11fc   :  { %v2586_v24 = vmul.f32 %v4665_v43, %v5691_v6  ;;  %v2609_v46 = vadd.f32 %v3827_v36, %v2597_v19  ;;  %4037 = vmatpush3.bf16.msra.mxu1 %v4521_v39  ;;  %v5732_v43 = vrot.slane %v2648_v59, %v515_v61  ;;  %v5738_v19 = vrot.slane %v2648_v59, %v2664_v14 }
0x11fd   :  { %4038 = vmatprep.subr.bf16.mxu1 %v4523_v54 }
0x11fe   :  { %v2598_v7 = vmul.f32 %v3826_v8, %v2586_v24  ;;  %v5736_v24 = vrot.slane %v2648_v59, %v511_v15 }
0x11ff   :  { %v4667_v32 = vpop.eup %4666 }
0x1200   :  { %v2610_v48 = vadd.f32 %v3827_v36, %v2598_v7  ;;  %v2587_v49 = vmul.f32 %v4667_v32, %v5696_v13  ;;  %v4520_v13 = vld [vmem:[#allocation13] sm:$0xff]   ;;  %4039 = vmatpush3.bf16.msra.mxu1 %v4525_v58 }
0x1201   :  { %v4669_v26 = vpop.eup %4668  ;;  %4003 = vmatpush3.bf16.msra.mxu0 %v4520_v13  ;;  %4040 = vmatprep.subr.bf16.mxu1 %v4527_v60 }
0x1202   :  { %v2614_v52 = vpack.c.bf16 %v2610_v48, %v2609_v46  ;;  %v2588_v2 = vmul.f32 %v4669_v26, %v5699_v25  ;;  %v2599_v33 = vmul.f32 %v3826_v8, %v2587_v49  ;;  %v4522_v25 = vld [vmem:[#allocation13 + $0x48] sm:$0xff]  }
0x1203   :  { %4004 = vmatprep.subr.bf16.mxu0 %v4522_v25 }
0x1204   :  { %2873 = vmatmul.mubr.bf16.gmra.mrb[68].mxu0 %v2614_v52  ;;  %2936 = vmatmul.mubr.bf16.gmra.mrb[52].mxu1 %v2614_v52  ;;  %v2600_v51 = vmul.f32 %v3826_v8, %v2588_v2  ;;  %v2611_v53 = vadd.f32 %v3827_v36, %v2599_v33  ;;  %v4535_v8 = vld [vmem:[#allocation13 + $0xe0] sm:$0xff]  }
0x1205   :  { %2882 = vmatprep.mubr.bf16.mxu0 %v4939_v20  ;;  %2945 = vmatprep.mubr.bf16.mxu1 %v4939_v20  ;;  %v4526_v20 = vld [vmem:[#allocation13 + $0x50] sm:$0xff]  }
0x1206   :  { %v2612_v6 = vadd.f32 %v3827_v36, %v2600_v51  ;;  %4005 = vmatpush3.bf16.msra.mxu0 %v4524_v56  ;;  %4041 = vmatpush3.bf16.msra.mxu1 %v4529_v35  ;;  %v4545_v36 = vld [vmem:[#allocation13 + $0xb0] sm:$0xff]  }
0x1207   :  { %4006 = vmatprep.subr.bf16.mxu0 %v4526_v20  ;;  %4042 = vmatprep.subr.bf16.mxu1 %v4531_v1 }
0x1208   :  { %v2615_v41 = vpack.c.bf16 %v2612_v6, %v2611_v53 }
0x120a   :  { %4007 = vmatpush3.bf16.msra.mxu0 %v4528_v62  ;;  %4043 = vmatpush3.bf16.msra.mxu1 %v4533_v5 }
0x120b   :  { %4008 = vmatprep.subr.bf16.mxu0 %v4530_v63  ;;  %4044 = vmatprep.subr.bf16.mxu1 %v4535_v8 }
0x120c   :  { %2883 = vmatmul.mubr.bf16.gmra.mrb[72].mxu0 %v2615_v41  ;;  %2946 = vmatmul.mubr.bf16.gmra.mrb[56].mxu1 %v2615_v41 }
0x120e   :  { %4009 = vmatpush3.bf16.msra.mxu0 %v4532_v3  ;;  %4045 = vmatpush3.bf16.msra.mxu1 %v4537_v10 }
0x120f   :  { %4010 = vmatprep.subr.bf16.mxu0 %v4534_v47  ;;  %4046 = vmatprep.subr.bf16.mxu1 %v4539_v23 }
0x1212   :  { %4011 = vmatpush3.bf16.msra.mxu0 %v4536_v9  ;;  %4047 = vmatpush3.bf16.msra.mxu1 %v4541_v29 }
0x1213   :  { %4012 = vmatprep.subr.bf16.mxu0 %v4538_v4  ;;  %4048 = vmatprep.subr.bf16.mxu1 %v4543_v34 }
0x1216   :  { %4013 = vmatpush3.bf16.msra.mxu0 %v4540_v27  ;;  %4049 = vmatpush3.bf16.msra.mxu1 %v4545_v36 }
0x1217   :  { %4014 = vmatprep.subr.bf16.mxu0 %v4542_v30  ;;  %4050 = vmatprep.subr.bf16.mxu1 %v4547_v37 }
0x121a   :  { %4015 = vmatpush3.bf16.msra.mxu0 %v4544_v17  ;;  %4051 = vmatpush3.bf16.msra.mxu1 %v4549_v40 }
0x121b   :  { %4016 = vmatprep.subr.bf16.mxu0 %v4546_v42 }
0x121e   :  { %4017 = vmatpush3.bf16.msra.mxu0 %v4548_v11 }
0x121f   :  { %4322 = vmatprep.subr.bf16.mxu0 %v4937_v0 }
0x12cd   :  { %v2864_v7 = vpop.f32.mrb[64].mxu0  ;;  %v2927_v32 = vpop.f32.mrb[48].mxu1 }
0x12ce   :  { %v5741_v46 = vadd.f32 %v2864_v7, %v5728_v21  ;;  %v5744_v48 = vadd.f32 %v2927_v32, %v5732_v43  ;;  %v2866_v12 = vpop.f32.mrb[65].mxu0  ;;  %v2929_v49 = vpop.f32.mrb[49].mxu1 }
0x12cf   :  { %v5747_v26 = vadd.f32 %v2866_v12, %v5736_v24  ;;  %v5750_v61 = vadd.f32 %v2929_v49, %v5738_v19  ;;  %v2868_v57 = vpop.f32.mrb[66].mxu0  ;;  %v2931_v15 = vpop.f32.mrb[50].mxu1 }
0x12d0   :  { %v2956_v52 = vmul.f32 %v5741_v46, %v5741_v46  ;;  %v2958_v2 = vmul.f32 %v5744_v48, %v5744_v48  ;;  %v5757_v33 = vadd.f32 %v2868_v57, %v5728_v21  ;;  %v5760_v51 = vadd.f32 %v2931_v15, %v5732_v43  ;;  %v2870_v6 = vpop.f32.mrb[67].mxu0  ;;  %v2933_v53 = vpop.f32.mrb[51].mxu1 }
0x12d1   :  { %v2957_v41 = vmul.f32 %v5747_v26, %v5747_v26  ;;  %v2959_v28 = vmul.f32 %v5750_v61, %v5750_v61  ;;  %v5767_v18 = vadd.f32 %v2870_v6, %v5736_v24  ;;  %v5770_v13 = vadd.f32 %v2933_v53, %v5738_v19 }
0x12d2   :  { %v2980_v39 = vmul.f32 %v2956_v52, %v5741_v46  ;;  %v2982_v25 = vmul.f32 %v2958_v2, %v5744_v48  ;;  %v2960_v54 = vmul.f32 %v5757_v33, %v5757_v33  ;;  %v2962_v56 = vmul.f32 %v5760_v51, %v5760_v51 }
0x12d3   :  { %v2981_v58 = vmul.f32 %v2957_v41, %v5747_v26  ;;  %v2983_v20 = vmul.f32 %v2959_v28, %v5750_v61  ;;  %v2961_v60 = vmul.f32 %v5767_v18, %v5767_v18  ;;  %v2963_v62 = vmul.f32 %v5770_v13, %v5770_v13 }
0x12d4   :  { %v3004_v35 = vmul.f32 0.044715, %v2980_v39  ;;  %v3006_v63 = vmul.f32 0.044715, %v2982_v25  ;;  %v2984_v1 = vmul.f32 %v2960_v54, %v5757_v33  ;;  %v2986_v3 = vmul.f32 %v2962_v56, %v5760_v51 }
0x12d5   :  { %v3005_v5 = vmul.f32 0.044715, %v2981_v58  ;;  %v3007_v47 = vmul.f32 0.044715, %v2983_v20  ;;  %v2985_v8 = vmul.f32 %v2961_v60, %v5767_v18  ;;  %v2987_v9 = vmul.f32 %v2963_v62, %v5770_v13 }
0x12d6   :  { %v3028_v10 = vadd.f32 %v3004_v35, %v5741_v46  ;;  %v3030_v4 = vadd.f32 %v3006_v63, %v5744_v48  ;;  %v3008_v23 = vmul.f32 0.044715, %v2984_v1  ;;  %v3010_v27 = vmul.f32 0.044715, %v2986_v3 }
0x12d7   :  { %v3029_v29 = vadd.f32 %v3005_v5, %v5747_v26  ;;  %v3031_v30 = vadd.f32 %v3007_v47, %v5750_v61  ;;  %v3009_v34 = vmul.f32 0.044715, %v2985_v8  ;;  %v3011_v17 = vmul.f32 0.044715, %v2987_v9  ;;  %v2874_v36 = vpop.f32.mrb[68].mxu0  ;;  %v2937_v42 = vpop.f32.mrb[52].mxu1 }
0x12d8   :  { %v3052_v37 = vmul.f32 0.7978846, %v3028_v10  ;;  %v3054_v11 = vmul.f32 0.7978846, %v3030_v4  ;;  %v3032_v40 = vadd.f32 %v3008_v23, %v5757_v33  ;;  %v3034_v59 = vadd.f32 %v3010_v27, %v5760_v51  ;;  %v2876_v14 = vpop.f32.mrb[69].mxu0  ;;  %v2939_v7 = vpop.f32.mrb[53].mxu1 }
0x12d9   :  { %v3053_v32 = vmul.f32 0.7978846, %v3029_v29  ;;  %v3055_v12 = vmul.f32 0.7978846, %v3031_v30  ;;  %v3033_v49 = vadd.f32 %v3009_v34, %v5767_v18  ;;  %v3035_v57 = vadd.f32 %v3011_v17, %v5770_v13  ;;  %v2878_v15 = vpop.f32.mrb[70].mxu0  ;;  %v2941_v52 = vpop.f32.mrb[54].mxu1 }
0x12da   :  { %4670 = vtanh.f32 %v3052_v37  ;;  %v3056_v2 = vmul.f32 0.7978846, %v3032_v40  ;;  %v3058_v6 = vmul.f32 0.7978846, %v3034_v59  ;;  %v5797_v53 = vadd.f32 %v2874_v36, %v5728_v21  ;;  %v2880_v41 = vpop.f32.mrb[71].mxu0  ;;  %v2943_v28 = vpop.f32.mrb[55].mxu1 }
0x12db   :  { %4672 = vtanh.f32 %v3054_v11  ;;  %v3057_v39 = vmul.f32 0.7978846, %v3033_v49  ;;  %v3059_v25 = vmul.f32 0.7978846, %v3035_v57  ;;  %v5800_v54 = vadd.f32 %v2937_v42, %v5732_v43 }
0x12dc   :  { %4674 = vtanh.f32 %v3053_v32  ;;  %v2964_v56 = vmul.f32 %v5797_v53, %v5797_v53  ;;  %v5805_v58 = vadd.f32 %v2876_v14, %v5736_v24  ;;  %v5808_v20 = vadd.f32 %v2939_v7, %v5738_v19 }
0x12dd   :  { %4676 = vtanh.f32 %v3055_v12  ;;  %v2966_v60 = vmul.f32 %v5800_v54, %v5800_v54  ;;  %v5813_v62 = vadd.f32 %v2878_v15, %v5728_v21  ;;  %v5816_v35 = vadd.f32 %v2941_v52, %v5732_v43 }
0x12de   :  { %4678 = vtanh.f32 %v3056_v2  ;;  %v2988_v63 = vmul.f32 %v2964_v56, %v5797_v53  ;;  %v2965_v1 = vmul.f32 %v5805_v58, %v5805_v58  ;;  %v2967_v3 = vmul.f32 %v5808_v20, %v5808_v20 }
0x12df   :  { %4680 = vtanh.f32 %v3058_v6  ;;  %v2990_v5 = vmul.f32 %v2966_v60, %v5800_v54  ;;  %v2968_v47 = vmul.f32 %v5813_v62, %v5813_v62  ;;  %v2970_v8 = vmul.f32 %v5816_v35, %v5816_v35  ;;  %v2884_v9 = vpop.f32.mrb[72].mxu0  ;;  %v5828_v10 = vpop.f32.mrb[56].mxu1 }
0x12e0   :  { %4682 = vtanh.f32 %v3057_v39  ;;  %v3012_v4 = vmul.f32 0.044715, %v2988_v63  ;;  %v2989_v23 = vmul.f32 %v2965_v1, %v5805_v58  ;;  %v2991_v27 = vmul.f32 %v2967_v3, %v5808_v20  ;;  %v2886_v29 = vpop.f32.mrb[73].mxu0  ;;  %v5832_v30 = vpop.f32.mrb[57].mxu1 }
0x12e1   :  { %4684 = vtanh.f32 %v3059_v25  ;;  %v3014_v34 = vmul.f32 0.044715, %v2990_v5  ;;  %v2992_v17 = vmul.f32 %v2968_v47, %v5813_v62  ;;  %v2994_v36 = vmul.f32 %v2970_v8, %v5816_v35  ;;  %v5836_v42 = vpop.f32.mrb[74].mxu0  ;;  %v5838_v37 = vpop.f32.mrb[58].mxu1 }
0x12e2   :  { %v3036_v11 = vadd.f32 %v3012_v4, %v5797_v53  ;;  %v3013_v40 = vmul.f32 0.044715, %v2989_v23  ;;  %v3015_v59 = vmul.f32 0.044715, %v2991_v27  ;;  %v5842_v14 = vadd.f32 %v2880_v41, %v5736_v24  ;;  %v5844_v7 = vpop.f32.mrb[75].mxu0  ;;  %v5846_v32 = vpop.f32.mrb[59].mxu1 }
0x12e3   :  { %v3038_v12 = vadd.f32 %v3014_v34, %v5800_v54  ;;  %v3016_v49 = vmul.f32 0.044715, %v2992_v17  ;;  %v3018_v57 = vmul.f32 0.044715, %v2994_v36  ;;  %v5850_v15 = vadd.f32 %v2943_v28, %v5738_v19 }
0x12e4   :  { %v4671_v52 = vpop.eup %4670  ;;  %v3060_v2 = vmul.f32 0.7978846, %v3036_v11  ;;  %v3037_v6 = vadd.f32 %v3013_v40, %v5805_v58  ;;  %v3039_v39 = vadd.f32 %v3015_v59, %v5808_v20  ;;  %v2969_v41 = vmul.f32 %v5842_v14, %v5842_v14 }
0x12e5   :  { %v4673_v25 = vpop.eup %4672  ;;  %v3100_v56 = vadd.f32 1.0, %v4671_v52  ;;  %v3062_v60 = vmul.f32 0.7978846, %v3038_v12  ;;  %v3040_v63 = vadd.f32 %v3016_v49, %v5813_v62  ;;  %v3042_v1 = vadd.f32 %v3018_v57, %v5816_v35 }
0x12e6   :  { %v5858_v3 = vpop.eup %4674  ;;  %v3102_v28 = vadd.f32 1.0, %v4673_v25  ;;  %4686 = vtanh.f32 %v3060_v2  ;;  %v3061_v5 = vmul.f32 0.7978846, %v3037_v6  ;;  %v3063_v47 = vmul.f32 0.7978846, %v3039_v39 }
0x12e7   :  { %v5860_v8 = vpop.eup %4676  ;;  %v3124_v4 = vmul.f32 0.5, %v3100_v56  ;;  %4688 = vtanh.f32 %v3062_v60  ;;  %v3064_v23 = vmul.f32 0.7978846, %v3040_v63  ;;  %v3066_v27 = vmul.f32 0.7978846, %v3042_v1 }
0x12e8   :  { %v4679_v34 = vpop.eup %4678  ;;  %v3126_v17 = vmul.f32 0.5, %v3102_v28  ;;  %4690 = vtanh.f32 %v3061_v5  ;;  %v2993_v36 = vmul.f32 %v2969_v41, %v5842_v14  ;;  %v2971_v11 = vmul.f32 %v5850_v15, %v5850_v15 }
0x12e9   :  { %v4681_v40 = vpop.eup %4680  ;;  %v5866_v59 = vmul.f32 %v3124_v4, %v5741_v46  ;;  %v3104_v12 = vadd.f32 1.0, %v4679_v34  ;;  %4692 = vtanh.f32 %v3063_v47  ;;  %v5869_v49 = vadd.f32 %v2884_v9, %v5728_v21 }
0x12ea   :  { %v5871_v57 = vpop.eup %4682  ;;  %v5874_v52 = vmul.f32 %v3126_v17, %v5744_v48  ;;  %v3106_v2 = vadd.f32 1.0, %v4681_v40  ;;  %4694 = vtanh.f32 %v3064_v23  ;;  %v3017_v6 = vmul.f32 0.044715, %v2993_v36 }
0x12eb   :  { %v5876_v39 = vpop.eup %4684  ;;  %v3128_v41 = vmul.f32 0.5, %v3104_v12  ;;  %4696 = vtanh.f32 %v3066_v27  ;;  %v2995_v46 = vmul.f32 %v2971_v11, %v5850_v15  ;;  %v2972_v25 = vmul.f32 %v5869_v49, %v5869_v49 }
0x12ec   :  { %v3130_v56 = vmul.f32 0.5, %v3106_v2  ;;  %v3041_v9 = vadd.f32 %v3017_v6, %v5842_v14  ;;  %v5884_v60 = vadd.f32 %v5828_v10, %v5732_v43  ;;  %v5887_v48 = vadd.f32 %v2886_v29, %v5736_v24 }
0x12ed   :  { %v5890_v63 = vmul.f32 %v3128_v41, %v5757_v33  ;;  %v3019_v1 = vmul.f32 0.044715, %v2995_v46  ;;  %v2996_v28 = vmul.f32 %v2972_v25, %v5869_v49  ;;  %v5895_v5 = vadd.f32 %v5832_v30, %v5738_v19 }
0x12ee   :  { %v5898_v47 = vmul.f32 %v3130_v56, %v5760_v51  ;;  %v3065_v4 = vmul.f32 0.7978846, %v3041_v9  ;;  %v2974_v10 = vmul.f32 %v5884_v60, %v5884_v60  ;;  %v2973_v29 = vmul.f32 %v5887_v48, %v5887_v48 }
0x12ef   :  { %v3172_v33 = vpack.c.bf16 %v5890_v63, %v5866_v59  ;;  %v3043_v23 = vadd.f32 %v3019_v1, %v5850_v15  ;;  %v3020_v27 = vmul.f32 0.044715, %v2996_v28  ;;  %v2975_v30 = vmul.f32 %v5895_v5, %v5895_v5 }
0x12f0   :  { %v5909_v34 = vpop.eup %4686  ;;  %v3174_v51 = vpack.c.bf16 %v5898_v47, %v5874_v52  ;;  %4698 = vtanh.f32 %v3065_v4  ;;  %v2998_v17 = vmul.f32 %v2974_v10, %v5884_v60  ;;  %v2997_v36 = vmul.f32 %v2973_v29, %v5887_v48 }
0x12f1   :  { %v5915_v11 = vpop.eup %4688  ;;  %v3067_v40 = vmul.f32 0.7978846, %v3043_v23  ;;  %v3044_v12 = vadd.f32 %v3020_v27, %v5869_v49  ;;  %v2999_v2 = vmul.f32 %v2975_v30, %v5895_v5  ;;  %v5921_v6 = vadd.f32 %v5836_v42, %v5728_v21 }
0x12f2   :  { %v4691_v41 = vpop.eup %4690  ;;  %v3022_v46 = vmul.f32 0.044715, %v2998_v17  ;;  %v3021_v25 = vmul.f32 0.044715, %v2997_v36  ;;  %v5925_v56 = vadd.f32 %v5838_v37, %v5732_v43  ;;  %v5929_v9 = vadd.f32 %v5844_v7, %v5736_v24 }
0x12f3   :  { %v4693_v1 = vpop.eup %4692  ;;  %4700 = vtanh.f32 %v3067_v40  ;;  %v3068_v28 = vmul.f32 0.7978846, %v3044_v12  ;;  %v3023_v4 = vmul.f32 0.044715, %v2999_v2  ;;  %v2976_v10 = vmul.f32 %v5921_v6, %v5921_v6 }
0x12f4   :  { %v4695_v21 = vpop.eup %4694  ;;  %v3046_v42 = vadd.f32 %v3022_v46, %v5884_v60  ;;  %v3045_v29 = vadd.f32 %v3021_v25, %v5887_v48  ;;  %v2978_v43 = vmul.f32 %v5925_v56, %v5925_v56  ;;  %v2977_v37 = vmul.f32 %v5929_v9, %v5929_v9 }
0x12f5   :  { %v5939_v24 = vpop.eup %4696  ;;  %4702 = vtanh.f32 %v3068_v28  ;;  %v3047_v7 = vadd.f32 %v3023_v4, %v5895_v5  ;;  %v3000_v23 = vmul.f32 %v2976_v10, %v5921_v6  ;;  %v5945_v27 = vadd.f32 %v5846_v32, %v5738_v19 }
0x12f6   :  { %v3070_v30 = vmul.f32 0.7978846, %v3046_v42  ;;  %v3069_v17 = vmul.f32 0.7978846, %v3045_v29  ;;  %v3002_v36 = vmul.f32 %v2978_v43, %v5925_v56  ;;  %v3001_v40 = vmul.f32 %v2977_v37, %v5929_v9 }
0x12f7   :  { %v3071_v12 = vmul.f32 0.7978846, %v3047_v7  ;;  %v3024_v2 = vmul.f32 0.044715, %v3000_v23  ;;  %v2979_v46 = vmul.f32 %v5945_v27, %v5945_v27  ;;  %v3101_v25 = vadd.f32 1.0, %v5858_v3 }
0x12f8   :  { %4704 = vtanh.f32 %v3070_v30  ;;  %v3026_v28 = vmul.f32 0.044715, %v3002_v36  ;;  %v3025_v4 = vmul.f32 0.044715, %v3001_v40  ;;  %v3105_v10 = vadd.f32 1.0, %v5871_v57 }
0x12f9   :  { %4706 = vtanh.f32 %v3069_v17  ;;  %v3048_v19 = vadd.f32 %v3024_v2, %v5921_v6  ;;  %v3003_v32 = vmul.f32 %v2979_v46, %v5945_v27  ;;  %v3125_v42 = vmul.f32 0.5, %v3101_v25 }
0x12fa   :  { %v4699_v29 = vpop.eup %4698  ;;  %4708 = vtanh.f32 %v3071_v12  ;;  %v3050_v43 = vadd.f32 %v3026_v28, %v5925_v56  ;;  %v3049_v37 = vadd.f32 %v3025_v4, %v5929_v9  ;;  %v3129_v7 = vmul.f32 0.5, %v3105_v10 }
0x12fb   :  { %v3072_v23 = vmul.f32 0.7978846, %v3048_v19  ;;  %v3027_v3 = vmul.f32 0.044715, %v3003_v32  ;;  %v3149_v30 = vmul.f32 %v3125_v42, %v5747_v26  ;;  %v3103_v36 = vadd.f32 1.0, %v5860_v8 }
0x12fc   :  { %v3074_v57 = vmul.f32 0.7978846, %v3050_v43  ;;  %v3073_v17 = vmul.f32 0.7978846, %v3049_v37  ;;  %v3153_v40 = vmul.f32 %v3129_v7, %v5767_v18  ;;  %v3107_v2 = vadd.f32 1.0, %v5876_v39 }
0x12fd   :  { %v4701_v46 = vpop.eup %4700  ;;  %4710 = vtanh.f32 %v3072_v23  ;;  %v3051_v12 = vadd.f32 %v3027_v3, %v5945_v27  ;;  %v3127_v25 = vmul.f32 0.5, %v3103_v36  ;;  %v3109_v28 = vadd.f32 1.0, %v4691_v41 }
0x12fe   :  { %4712 = vtanh.f32 %v3074_v57  ;;  %v3173_v4 = vpack.c.bf16 %v3153_v40, %v3149_v30  ;;  %v3131_v10 = vmul.f32 0.5, %v3107_v2  ;;  %v3113_v19 = vadd.f32 1.0, %v4699_v29 }
0x12ff   :  { %v4703_v32 = vpop.eup %4702  ;;  %4714 = vtanh.f32 %v3073_v17  ;;  %v3075_v26 = vmul.f32 0.7978846, %v3051_v12  ;;  %v3151_v8 = vmul.f32 %v3127_v25, %v5750_v61  ;;  %v3133_v42 = vmul.f32 0.5, %v3109_v28 }
0x1300   :  { %3479 = vmatprep.mubr.bf16.mxu0 %v3173_v4  ;;  %v3155_v18 = vmul.f32 %v3131_v10, %v5770_v13  ;;  %v3137_v39 = vmul.f32 0.5, %v3113_v19  ;;  %v3111_v43 = vadd.f32 1.0, %v4693_v1  ;;  %v3115_v37 = vadd.f32 1.0, %v4701_v46 }
0x1301   :  { %4716 = vtanh.f32 %v3075_v26  ;;  %3480 = vmatmul.mubr.bf16.vlgmr.msra.gmra.mrb[76].mxu0 %v3172_v33  ;;  %v3157_v41 = vmul.f32 %v3133_v42, %v5805_v58  ;;  %v3108_v29 = vadd.f32 1.0, %v5909_v34  ;;  %v3112_v7 = vadd.f32 1.0, %v4695_v21 }
0x1302   :  { %v4705_v23 = vpop.eup %4704  ;;  %v3175_v3 = vpack.c.bf16 %v3155_v18, %v3151_v8  ;;  %v3161_v61 = vmul.f32 %v3137_v39, %v5842_v14  ;;  %v3135_v30 = vmul.f32 0.5, %v3111_v43  ;;  %v3139_v36 = vmul.f32 0.5, %v3115_v37 }
0x1303   :  { %v4707_v13 = vpop.eup %4706  ;;  %v3132_v57 = vmul.f32 0.5, %v3108_v29  ;;  %v3136_v1 = vmul.f32 0.5, %v3112_v7  ;;  %v3110_v17 = vadd.f32 1.0, %v5915_v11  ;;  %v3114_v40 = vadd.f32 1.0, %v5939_v24 }
0x1304   :  { %v4709_v59 = vpop.eup %4708  ;;  %3536 = vmatprep.mubr.bf16.mxu1 %v3175_v3  ;;  %v3177_v63 = vpack.c.bf16 %v3161_v61, %v3157_v41  ;;  %v3159_v58 = vmul.f32 %v3135_v30, %v5808_v20  ;;  %v3163_v33 = vmul.f32 %v3139_v36, %v5850_v15  ;;  %v3117_v24 = vadd.f32 1.0, %v4707_v13 }
0x1305   :  { %3537 = vmatmul.mubr.bf16.vlgmr.msra.gmra.mrb[60].mxu1 %v3174_v51  ;;  %v3156_v14 = vmul.f32 %v3132_v57, %v5797_v53  ;;  %v3160_v34 = vmul.f32 %v3136_v1, %v5813_v62  ;;  %v3134_v21 = vmul.f32 0.5, %v3110_v17  ;;  %v3138_v2 = vmul.f32 0.5, %v3114_v40 }
0x1306   :  { %3487 = vmatprep.mubr.bf16.mxu0 %v3177_v63  ;;  %v3179_v11 = vpack.c.bf16 %v3163_v33, %v3159_v58  ;;  %v3119_v46 = vadd.f32 1.0, %v4709_v59  ;;  %v3116_v12 = vadd.f32 1.0, %v4703_v32  ;;  %v3118_v4 = vadd.f32 1.0, %v4705_v23 }
0x1307   :  { %v4711_v25 = vpop.eup %4710  ;;  %v3176_v28 = vpack.c.bf16 %v3160_v34, %v3156_v14  ;;  %v3158_v20 = vmul.f32 %v3134_v21, %v5800_v54  ;;  %v3162_v15 = vmul.f32 %v3138_v2, %v5816_v35  ;;  %v3141_v8 = vmul.f32 0.5, %v3117_v24 }
0x1308   :  { %v4713_v52 = vpop.eup %4712  ;;  %3544 = vmatprep.mubr.bf16.mxu1 %v3179_v11  ;;  %v3120_v47 = vadd.f32 1.0, %v4711_v25  ;;  %v3140_v53 = vmul.f32 0.5, %v3116_v12  ;;  %v3142_v19 = vmul.f32 0.5, %v3118_v4  ;;  %v3143_v18 = vmul.f32 0.5, %v3119_v46 }
0x1309   :  { %v4715_v51 = vpop.eup %4714  ;;  %3488 = vmatmul.mubr.bf16.gmra.mrb[80].mxu0 %v3176_v28  ;;  %v3178_v62 = vpack.c.bf16 %v3162_v15, %v3158_v20  ;;  %v3122_v10 = vadd.f32 1.0, %v4713_v52  ;;  %v3165_v7 = vmul.f32 %v3141_v8, %v5887_v48  ;;  %v3860_v48 = vld [vmem:[%s6078_s17] ss:$0 sm:$0xff] }
0x130a   :  { %v3121_v26 = vadd.f32 1.0, %v4715_v51  ;;  %v3144_v42 = vmul.f32 0.5, %v3120_v47  ;;  %v3164_v35 = vmul.f32 %v3140_v53, %v5869_v49  ;;  %v3166_v41 = vmul.f32 %v3142_v19, %v5884_v60 }
0x130b   :  { %v4717_v32 = vpop.eup %4716  ;;  %v3146_v39 = vmul.f32 0.5, %v3122_v10  ;;  %v3167_v13 = vmul.f32 %v3143_v18, %v5895_v5 }
0x130c   :  { %v3145_v43 = vmul.f32 0.5, %v3121_v26  ;;  %v3123_v54 = vadd.f32 1.0, %v4717_v32  ;;  %v3168_v37 = vmul.f32 %v3144_v42, %v5921_v6 }
0x130d   :  { %3545 = vmatmul.mubr.bf16.gmra.mrb[64].mxu1 %v3178_v62  ;;  %v3170_v29 = vmul.f32 %v3146_v39, %v5925_v56 }
0x130e   :  { %v3169_v23 = vmul.f32 %v3145_v43, %v5929_v9  ;;  %v3147_v3 = vmul.f32 0.5, %v3123_v54  ;;  %v3180_v61 = vpack.c.bf16 %v3168_v37, %v3164_v35 }
0x130f   :  { %v3182_v30 = vpack.c.bf16 %v3170_v29, %v3166_v41 }
0x1310   :  { %v3181_v36 = vpack.c.bf16 %v3169_v23, %v3165_v7  ;;  %v3171_v57 = vmul.f32 %v3147_v3, %v5945_v27 }
0x1312   :  { %3495 = vmatprep.mubr.bf16.mxu0 %v3181_v36  ;;  %v3183_v49 = vpack.c.bf16 %v3171_v57, %v3167_v13 }
0x1313   :  { %3496 = vmatmul.mubr.bf16.gmra.mrb[84].mxu0 %v3180_v61 }
0x1314   :  { %3552 = vmatprep.mubr.bf16.mxu1 %v3183_v49  ;;  %4328 = vmatprep.mubr.msk.bf16.mxu0 %vm4938_vm0, %v4937_v0 }
0x1315   :  { %3553 = vmatmul.mubr.bf16.gmra.mrb[68].mxu1 %v3182_v30 }
0x13d4   :  { %v4018_v60 = vpop.f32.mrb[76].mxu0 }
0x13d5   :  { %v4019_v6 = vpop.f32.mrb[77].mxu0 }
0x13d6   :  { %v4020_v56 = vadd.f32 %v4019_v6, %v4018_v60  ;;  %v4021_v9 = vpop.f32.mrb[78].mxu0 }
0x13d7   :  { %v4022_v1 = vpop.f32.mrb[79].mxu0 }
0x13d8   :  { %v4052_v5 = vpop.f32.mrb[60].mxu1  ;;  %v3482_v17 = vadd.f32 %v4020_v56, %v3860_v48  ;;  %v4023_v27 = vadd.f32 %v4022_v1, %v4021_v9 }
0x13d9   :  { %v4053_v40 = vpop.f32.mrb[61].mxu1 }
0x13da   :  { %v4054_v59 = vadd.f32 %v4053_v40, %v4052_v5  ;;  %v4055_v63 = vpop.f32.mrb[62].mxu1  ;;  %v3485_v58 = vadd.f32 %v4023_v27, %v3860_v48 }
0x13db   :  { %v4056_v33 = vpop.f32.mrb[63].mxu1 }
0x13dc   :  { %v3539_v14 = vadd.f32 %v4054_v59, %v3482_v17  ;;  %v4057_v34 = vadd.f32 %v4056_v33, %v4055_v63  ;;  %v4024_v21 = vpop.f32.mrb[80].mxu0 }
0x13dd   :  { %v4025_v2 = vpop.f32.mrb[81].mxu0 }
0x13de   :  { %v3542_v11 = vadd.f32 %v4057_v34, %v3485_v58  ;;  %v3561_v24 = vadd.f32 %v5652_v16, %v3539_v14  ;;  %v4026_v46 = vadd.f32 %v4025_v2, %v4024_v21  ;;  %v4027_v12 = vpop.f32.mrb[82].mxu0 }
0x13df   :  { %v4028_v25 = vpop.f32.mrb[83].mxu0 }
0x13e0   :  { %v4058_v28 = vpop.f32.mrb[64].mxu1  ;;  %3569 = vadd.xlane.f32.xlu0 %v3561_v24  ;;  %v3490_v20 = vadd.f32 %v4026_v46, %v3860_v48  ;;  %v3562_v15 = vadd.f32 %v5655_v55, %v3542_v11  ;;  %v4029_v4 = vadd.f32 %v4028_v25, %v4027_v12  ;;  %v345_v11 = vsel %vm344_vm4, %v5218_v22, 0.0 }
0x13e1   :  { %v4059_v52 = vpop.f32.mrb[65].mxu1 }
0x13e2   :  { %v4060_v47 = vadd.f32 %v4059_v52, %v4058_v28  ;;  %v4061_v53 = vpop.f32.mrb[66].mxu1  ;;  %3571 = vadd.xlane.f32.xlu1 %v3562_v15  ;;  %v3493_v51 = vadd.f32 %v4029_v4, %v3860_v48 }
0x13e3   :  { %v4062_v62 = vpop.f32.mrb[67].mxu1 }
0x13e4   :  { %v3547_v10 = vadd.f32 %v4060_v47, %v3490_v20  ;;  %v4063_v19 = vadd.f32 %v4062_v62, %v4061_v53 }
0x13e6   :  { %v3550_v26 = vadd.f32 %v4063_v19, %v3493_v51  ;;  %v4030_v8 = vpop.f32.mrb[84].mxu0  ;;  %v3563_v16 = vadd.f32 %v5660_v38, %v3547_v10  ;;  %v3893_v19 = vld [vmem:[%s6079_s18] ss:$0 sm:$0xff] }
0x13e7   :  { %v4031_v42 = vpop.f32.mrb[85].mxu0 }
0x13e8   :  { %v4064_v32 = vpop.f32.mrb[68].mxu1  ;;  %v4032_v18 = vadd.f32 %v4031_v42, %v4030_v8  ;;  %v4033_v39 = vpop.f32.mrb[86].mxu0  ;;  %3573 = vadd.xlane.f32.xlu0 %v3563_v16  ;;  %v3564_v55 = vadd.f32 %v5664_v44, %v3550_v26 }
0x13e9   :  { %v4065_v43 = vpop.f32.mrb[69].mxu1  ;;  %v4034_v54 = vpop.f32.mrb[87].mxu0 }
0x13ea   :  { %v3498_v35 = vadd.f32 %v4032_v18, %v3860_v48  ;;  %v4066_v37 = vadd.f32 %v4065_v43, %v4064_v32  ;;  %v4067_v41 = vpop.f32.mrb[70].mxu1  ;;  %v4035_v29 = vadd.f32 %v4034_v54, %v4033_v39  ;;  %3575 = vadd.xlane.f32.xlu1 %v3564_v55  ;;  %v3894_v54 = vld [vmem:[%s6080_s19] ss:$0 sm:$0xff] }
0x13eb   :  { %v4068_v7 = vpop.f32.mrb[71].mxu1 }
0x13ec   :  { %v3555_v23 = vadd.f32 %v4066_v37, %v3498_v35  ;;  %v3501_v3 = vadd.f32 %v4035_v29, %v3860_v48  ;;  %v4069_v61 = vadd.f32 %v4068_v7, %v4067_v41 }
0x13ee   :  { %v3558_v30 = vadd.f32 %v4069_v61, %v3501_v3  ;;  %v3565_v38 = vadd.f32 %v5668_v45, %v3555_v23 }
0x13f0   :  { %3577 = vadd.xlane.f32.xlu0 %v3565_v38  ;;  %v3566_v36 = vadd.f32 %v5671_v50, %v3558_v30 }
0x13f2   :  { %3579 = vadd.xlane.f32.xlu1 %v3566_v36 }
0x146d   :  { %v3570_v13 = vpop.xlane.xlu0 %3569 }
0x146e   :  { %v3581_v44 = vmul.f32 0.0078125, %v3570_v13 }
0x146f   :  { %v3572_v57 = vpop.xlane.xlu1 %3571 }
0x1470   :  { %v3587_v49 = vsub.f32 %v3561_v24, %v3581_v44  ;;  %v3582_v60 = vmul.f32 0.0078125, %v3572_v57  ;;  %v348_v24 = vsel %vm344_vm4, %v5226_v31, 0.0 }
0x1472   :  { %v3588_v6 = vsub.f32 %v3562_v15, %v3582_v60  ;;  %v3593_v56 = vmul.f32 %v3587_v49, %v3587_v49 }
0x1474   :  { %3599 = vadd.xlane.f32.xlu0 %v3593_v56  ;;  %v3594_v9 = vmul.f32 %v3588_v6, %v3588_v6 }
0x1475   :  { %v3574_v1 = vpop.xlane.xlu0 %3573 }
0x1476   :  { %3601 = vadd.xlane.f32.xlu1 %v3594_v9  ;;  %v3583_v48 = vmul.f32 0.0078125, %v3574_v1 }
0x1477   :  { %v3576_v5 = vpop.xlane.xlu1 %3575 }
0x1478   :  { %v3589_v17 = vsub.f32 %v3563_v16, %v3583_v48  ;;  %v3584_v27 = vmul.f32 0.0078125, %v3576_v5 }
0x147a   :  { %v6000_v45 = vsub.f32 %v3564_v55, %v3584_v27  ;;  %v3595_v40 = vmul.f32 %v3589_v17, %v3589_v17 }
0x147c   :  { %3603 = vadd.xlane.f32.xlu0 %v3595_v40  ;;  %v3596_v50 = vmul.f32 %v6000_v45, %v6000_v45 }
0x147d   :  { %v3578_v59 = vpop.xlane.xlu0 %3577 }
0x147e   :  { %v3585_v63 = vmul.f32 0.0078125, %v3578_v59  ;;  %3605 = vadd.xlane.f32.xlu1 %v3596_v50 }
0x147f   :  { %v3580_v58 = vpop.xlane.xlu1 %3579 }
0x1480   :  { %v6004_v33 = vsub.f32 %v3565_v38, %v3585_v63  ;;  %v3586_v14 = vmul.f32 0.0078125, %v3580_v58 }
0x1482   :  { %v6006_v34 = vsub.f32 %v3566_v36, %v3586_v14  ;;  %v3597_v21 = vmul.f32 %v6004_v33, %v6004_v33 }
0x1484   :  { %3607 = vadd.xlane.f32.xlu0 %v3597_v21  ;;  %v3598_v2 = vmul.f32 %v6006_v34, %v6006_v34  ;;  %v3659_v21 = vld [vmem:[%s6081_s20] sm:$0xf] }
0x1486   :  { %3609 = vadd.xlane.f32.xlu1 %v3598_v2 }
0x1488   :  { %346 = vadd.xlane.f32.xlu0 %v345_v11 }
0x148a   :  { %349 = vadd.xlane.f32.xlu1 %v348_v24 }
0x1501   :  { %v3600_v46 = vpop.xlane.xlu0 %3599 }
0x1502   :  { %v3611_v12 = vmul.f32 0.0078125, %v3600_v46 }
0x1503   :  { %v3602_v25 = vpop.xlane.xlu1 %3601 }
0x1504   :  { %v3617_v28 = vadd.f32 1e-06, %v3611_v12  ;;  %v3612_v20 = vmul.f32 0.0078125, %v3602_v25  ;;  %v342_v12 = vld [vmem:[%s6122_s24] sm:$0x1] }
0x1506   :  { %4718 = vrsqrt.f32 %v3617_v28  ;;  %v3618_v15 = vadd.f32 1e-06, %v3612_v20  ;;  %v343_v20 = vld [vmem:[#allocation7] sm:$0x1] }
0x1508   :  { %4720 = vrsqrt.f32 %v3618_v15 }
0x1509   :  { %v3604_v4 = vpop.xlane.xlu0 %3603 }
0x150a   :  { %v3613_v52 = vmul.f32 0.0078125, %v3604_v4 }
0x150b   :  { %v3606_v47 = vpop.xlane.xlu1 %3605 }
0x150c   :  { %v3619_v53 = vadd.f32 1e-06, %v3613_v52  ;;  %v3614_v51 = vmul.f32 0.0078125, %v3606_v47  ;;  %v3710_v52 = vld [vmem:[%s6082_s21] sm:$0x1] }
0x150e   :  { %4722 = vrsqrt.f32 %v3619_v53  ;;  %v3620_v62 = vadd.f32 1e-06, %v3614_v51  ;;  %v3713_v51 = vld [vmem:[%s6083_s22] sm:$0x1] }
0x1510   :  { %v4719_v10 = vpop.eup %4718  ;;  %4724 = vrsqrt.f32 %v3620_v62 }
0x1511   :  { %v3629_v26 = vmul.f32 %v4719_v10, %v3587_v49  ;;  %v3608_v8 = vpop.xlane.xlu0 %3607 }
0x1512   :  { %v4721_v16 = vpop.eup %4720  ;;  %v3615_v42 = vmul.f32 0.0078125, %v3608_v8 }
0x1513   :  { %v3630_v32 = vmul.f32 %v4721_v16, %v3588_v6  ;;  %v3610_v18 = vpop.xlane.xlu1 %3609  ;;  %v3641_v39 = vmul.f32 %v3893_v19, %v3629_v26  ;;  %v3718_v16 = vld [vmem:[%s6124_s28] sm:$0xf] }
0x1514   :  { %v3621_v55 = vadd.f32 1e-06, %v3615_v42  ;;  %v3616_v43 = vmul.f32 0.0078125, %v3610_v18 }
0x1515   :  { %v347_v35 = vpop.xlane.xlu0 %346  ;;  %v3642_v37 = vmul.f32 %v3893_v19, %v3630_v32  ;;  %v3653_v23 = vadd.f32 %v3894_v54, %v3641_v39  ;;  %v3721_v32 = vld [vmem:[%s6125_s11] sm:$0xf] }
0x1516   :  { %4726 = vrsqrt.f32 %v3621_v55  ;;  %v3622_v41 = vadd.f32 1e-06, %v3616_v43  ;;  %v352_v29 = vmul.f32 0.0078125, %v347_v35 }
0x1517   :  { %v350_v7 = vpop.xlane.xlu1 %349  ;;  %v3654_v3 = vadd.f32 %v3894_v54, %v3642_v37 }
0x1518   :  { %v4723_v61 = vpop.eup %4722  ;;  %4728 = vrsqrt.f32 %v3622_v41  ;;  %v354_v30 = vsub.f32 %v5218_v22, %v352_v29  ;;  %v353_v38 = vmul.f32 0.0078125, %v350_v7 }
0x1519   :  { %v3631_v36 = vmul.f32 %v4723_v61, %v3589_v17  ;;  %v3660_v13 = vpack.c.bf16 %v3654_v3, %v3653_v23 }
0x151a   :  { %v4725_v44 = vpop.eup %4724  ;;  %v355_v57 = vsub.f32 %v5226_v31, %v353_v38  ;;  %v356_v49 = vmul.f32 %v354_v30, %v354_v30 }
0x151b   :  { %v3632_v60 = vmul.f32 %v4725_v44, %v6000_v45  ;;  %4323 = vmatpush3.bf16.msra.mxu0 %v3660_v13  ;;  %v3643_v6 = vmul.f32 %v3893_v19, %v3631_v36 }
0x151c   :  { %v358_v56 = vsel %vm344_vm4, %v356_v49, 0.0  ;;  %v357_v9 = vmul.f32 %v355_v57, %v355_v57  ;;  %4324 = vmatprep.subr.bf16.mxu0 %v4937_v0 }
0x151d   :  { %359 = vadd.xlane.f32.xlu0 %v358_v56  ;;  %v3644_v1 = vmul.f32 %v3893_v19, %v3632_v60  ;;  %v3655_v48 = vadd.f32 %v3894_v54, %v3643_v6 }
0x151e   :  { %v361_v22 = vsel %vm344_vm4, %v357_v9, 0.0 }
0x151f   :  { %362 = vadd.xlane.f32.xlu1 %v361_v22  ;;  %v3656_v5 = vadd.f32 %v3894_v54, %v3644_v1 }
0x1520   :  { %v4727_v17 = vpop.eup %4726 }
0x1521   :  { %v3633_v31 = vmul.f32 %v4727_v17, %v6004_v33  ;;  %v3661_v27 = vpack.c.bf16 %v3656_v5, %v3655_v48 }
0x1522   :  { %v4729_v40 = vpop.eup %4728 }
0x1523   :  { %v3634_v45 = vmul.f32 %v4729_v40, %v6006_v34  ;;  %4325 = vmatpush3.bf16.msra.mxu0 %v3661_v27  ;;  %v3645_v50 = vmul.f32 %v3893_v19, %v3633_v31 }
0x1524   :  { %4326 = vmatprep.subr.bf16.mxu0 %v4937_v0 }
0x1525   :  { %v3646_v59 = vmul.f32 %v3893_v19, %v3634_v45  ;;  %v3657_v63 = vadd.f32 %v3894_v54, %v3645_v50 }
0x1527   :  { %v3658_v58 = vadd.f32 %v3894_v54, %v3646_v59 }
0x1529   :  { %v3662_v14 = vpack.c.bf16 %v3658_v58, %v3657_v63 }
0x152b   :  { %4327 = vmatpush3.bf16.msra.mxu0 %v3662_v14 }
0x152e   :  { %4329 = vmatmul.mubr.msk.bf16.vlgmr.msra.gmra.mrb[88].mxu0 %vm3663_vm5, %v3659_v21 }
0x15aa   :  { %v360_v33 = vpop.xlane.xlu0 %359 }
0x15ab   :  { %v364_v2 = vmul.f32 0.0078125, %v360_v33 }
0x15ac   :  { %v363_v11 = vpop.xlane.xlu1 %362 }
0x15ad   :  { %v366_v24 = vadd.f32 1e-06, %v364_v2  ;;  %v365_v34 = vmul.f32 0.0078125, %v363_v11 }
0x15af   :  { %4730 = vrsqrt.f32 %v366_v24  ;;  %v367_v46 = vadd.f32 1e-06, %v365_v34 }
0x15b1   :  { %4732 = vrsqrt.f32 %v367_v46 }
0x15b9   :  { %v4731_v0 = vpop.eup %4730 }
0x15ba   :  { %v370_v25 = vmul.f32 %v4731_v0, %v354_v30 }
0x15bb   :  { %v4733_v28 = vpop.eup %4732 }
0x15bc   :  { %v372_v15 = vmul.f32 %v370_v25, %v342_v12  ;;  %v371_v4 = vmul.f32 %v4733_v28, %v355_v57 }
0x15be   :  { %v374_v47 = vadd.f32 %v372_v15, %v343_v20  ;;  %v373_v53 = vmul.f32 %v371_v4, %v342_v12 }
0x15c0   :  { %v3711_v62 = vmul.f32 %v3710_v52, %v374_v47  ;;  %v375_v10 = vadd.f32 %v373_v53, %v343_v20 }
0x15c2   :  { %v3714_v19 = vadd.f32 %v3713_v51, %v3711_v62  ;;  %v3712_v26 = vmul.f32 %v3710_v52, %v375_v10 }
0x15c4   :  { %3716 = vst [vmem:[%s6123_s23] sm:$0x1] %v3714_v19  ;;  %v3715_v8 = vadd.f32 %v3713_v51, %v3712_v26 }
0x15c6   :  { %3717 = vst [vmem:[%s6123_s23 + $0x8] sm:$0x1] %v3715_v8 }
0x1601   :  { %v3701_v42 = vpop.f32.mrb[88].mxu0 }
0x1602   :  { %v3708_v18 = vcombine.high %v3701_v42, %v3701_v42  ;;  %v3719_v39 = vmul.f32 %v3718_v16, %v3701_v42  ;;  %v4330_v55 = vpop.f32.mrb[89].mxu0 }
0x1603   :  { %v3704_v43 = vpop.f32.mrb[90].mxu0 }
0x1604   :  { %v3720_v54 = vmul.f32 %v3718_v16, %v3708_v18  ;;  %v3722_v35 = vadd.f32 %v3721_v32, %v3719_v39  ;;  %v4331_v37 = vpop.f32.mrb[91].mxu0 }
0x1606   :  { %v3723_v41 = vadd.f32 %v3721_v32, %v3720_v54  ;;  %3724 = vst [vmem:[%s6123_s23 + $0x1] sm:$0xf] %v3722_v35 }
0x1608   :  { %3725 = vst [vmem:[%s6123_s23 + $0x9] sm:$0xf] %v3723_v41 }
0x1609   :  { %3730 = vsyncpa [#allocation3], 1 }
0x160a   :  { %3731 = vsyncpa [#allocation5], 1 }
0x160b   :  { %3732 = vsyncpa [#allocation8], 1 }
0x160c   :  { %3733 = vsyncpa [#allocation11], 1 }
0x160d   :  { %3734 = vsyncpa [#allocation14], 1 }

</bundles_post_ra>
